<compile_context>
chip_gen: v7x
topology: tpu7x:2x2x1
jax: 0.10.0
libtpu: 0.0.40
codegen_flags: <defaults>
</compile_context>

<pallas_src>
import functools

import jax
import jax.numpy as jnp
from jax import lax
from jax.experimental import pallas as pl
from jax.experimental.pallas import tpu as pltpu


def self_atten_kernel(xq_ref, k_ref, v_ref, wq_ref, bq_ref, bvf_ref, o_ref,
                      q_acc, m_acc, l_acc, o_acc, *, tk):
    ki = pl.program_id(2)
    mx_dtype = k_ref.dtype            # matmul input dtype (bf16 or f32)

    # --- init per query tile: project Q once, reset online-softmax state ----
    @pl.when(ki == 0)
    def _init():
        xq = xq_ref[...].astype(mx_dtype)                              # (tq, C)
        q = jnp.dot(xq, wq_ref[...],
                    preferred_element_type=jnp.float32) + bq_ref[...]  # (tq, DK)
        q_acc[...] = q.astype(q_acc.dtype)        # stored in mx dtype, bias added
        m_acc[...] = jnp.full(m_acc.shape, -jnp.inf, dtype=m_acc.dtype)
        l_acc[...] = jnp.zeros(l_acc.shape, dtype=l_acc.dtype)
        o_acc[...] = jnp.zeros(o_acc.shape, dtype=o_acc.dtype)

    # --- slice current key tile out of the VMEM-resident K / V' blocks ------
    off = ki * tk
    if tk % 128 == 0:
        off = pl.multiple_of(off, 128)
    k_t = k_ref[pl.ds(off, tk), :]                                     # (tk, DK)
    v_t = v_ref[pl.ds(off, tk), :]                                     # (tk, C)

    # energy tile: (tq, tk) = q @ k^T  (contract padded head dim)
    s = lax.dot_general(q_acc[...], k_t, (((1,), (1,)), ((), ())),
                        preferred_element_type=jnp.float32)

    # --- online (flash) softmax update --------------------------------------
    m_prev = m_acc[...]
    m_new = jnp.maximum(m_prev, jnp.max(s, axis=-1, keepdims=True))    # (tq, 1)
    alpha = jnp.exp(m_prev - m_new)
    p = jnp.exp(s - m_new)                                             # (tq, tk)
    l_acc[...] = alpha * l_acc[...] + jnp.sum(p, axis=-1, keepdims=True)
    o_acc[...] = alpha * o_acc[...] + jnp.dot(p.astype(mx_dtype), v_t,
                                              preferred_element_type=jnp.float32)
    m_acc[...] = m_new

    # --- finalize: normalize, add folded bias, residual ---------------------
    @pl.when(ki == pl.num_programs(2) - 1)
    def _finalize():
        inv_l = pl.reciprocal(l_acc[...], approx=False)
        y = o_acc[...] * inv_l + bvf_ref[...]                          # (tq, C)
        o_ref[...] = (y + xq_ref[...]).astype(o_ref.dtype)


def _pick_tile(n, max_tile=512):
    """Largest tile <= max_tile dividing n (prefer multiples of 128)."""
    for t in range(min(n, max_tile), 0, -1):
        if n % t == 0 and t % 128 == 0:
            return t
    for t in range(min(n, max_tile), 0, -1):
        if n % t == 0 and t % 8 == 0:
            return t
    return n  # ragged N: single full-N tile


def self_atten_pallas(x_nchw, params, *, use_bf16_matmul=True, max_tile=512):
    """x_nchw: (B, C, W, H) float32.  params: dict of 1x1-conv weights/biases."""
    B, C, W, H = x_nchw.shape
    N = W * H
    C8 = C // 8
    DK = max(128, ((C8 + 127) // 128) * 128)   # padded q/k head dim (lane-dense)
    mx_dtype = jnp.bfloat16 if use_bf16_matmul else jnp.float32
    f32 = jnp.float32

    # NCHW -> (B, N, C), n = w*H + h (matches torch .view flattening).
    x_nnc = jnp.transpose(x_nchw.reshape(B, C, N), (0, 2, 1)).astype(f32)

    wq_m = params["wq"].reshape(C8, C).astype(f32)
    wk_m = params["wk"].reshape(C8, C).astype(f32)
    wv_m = params["wv"].reshape(C, C).astype(f32)
    wf_m = params["wf"].reshape(C, C).astype(f32)

    # Query projection stays in-kernel (x is streamed anyway for the residual);
    # weights zero-padded to DK lanes.
    wq_pad = jnp.zeros((C, DK), f32).at[:, :C8].set(wq_m.T).astype(mx_dtype)
    bq_pad = jnp.zeros((1, DK), f32).at[0, :C8].set(params["bq"].astype(f32))

    # Key projection hoisted to the wrapper (bias pre-added, zero-padded head
    # dim; padded cols are zero in both Q and K so the energy is unchanged).
    k_all = jnp.einsum("bnc,dc->bnd", x_nnc, wk_m) + params["bk"].astype(f32)
    k_pad = jnp.zeros((B, N, DK), f32).at[:, :, :C8].set(k_all).astype(mx_dtype)

    # Value conv folded with the FyO conv (exact: softmax rows sum to 1);
    # the folded bias is added at finalize.
    wvf = wv_m.T @ wf_m.T                                           # (C, C)
    v_all = jnp.einsum("bnc,cd->bnd", x_nnc, wvf).astype(mx_dtype)  # (B, N, C)
    bvf = (params["bv"].astype(f32)[None, :] @ wf_m.T
           + params["bf"].astype(f32)[None, :])                     # (1, C)

    tq = _pick_tile(N, max_tile)
    tk = _pick_tile(N, max_tile)
    nq, nk = N // tq, N // tk

    kernel = functools.partial(self_atten_kernel, tk=tk)

    itemsize = jnp.dtype(mx_dtype).itemsize
    cost = pl.CostEstimate(
        flops=int(2 * B * (N * C * DK + N * N * DK + N * N * C)),
        transcendentals=int(B * N * N),
        bytes_accessed=int(4 * B * N * C                      # x (query rows)
                           + itemsize * B * N * (DK + C)      # resident K, V'
                           + 4 * B * N * C                    # output
                           + itemsize * C * DK + 4 * (DK + C)))

    # VMEM: resident K/V' (double-buffered) + streamed x/out blocks + scratch.
    need = (2 * N * (DK + C) * itemsize
            + 2 * 2 * tq * C * 4
            + tq * DK * itemsize + 2 * tq * 128 * 4 + tq * max(C, 128) * 4
            + 2 * (C * DK * itemsize + (DK + C) * 4))
    vmem_limit = int(min(64 * 1024 * 1024, max(32 * 1024 * 1024, 2 * need)))

    const2 = lambda shape: pl.BlockSpec(shape, lambda b, qi, ki: (0, 0))

    out_nnc = pl.pallas_call(
        kernel,
        out_shape=jax.ShapeDtypeStruct((B, N, C), f32),
        grid_spec=pltpu.PrefetchScalarGridSpec(
            num_scalar_prefetch=0,
            grid=(B, nq, nk),
            in_specs=[
                pl.BlockSpec((None, tq, C), lambda b, qi, ki: (b, qi, 0)),  # x (query rows)
                pl.BlockSpec((None, N, DK), lambda b, qi, ki: (b, 0, 0)),   # K  (resident per batch)
                pl.BlockSpec((None, N, C),  lambda b, qi, ki: (b, 0, 0)),   # V' (resident per batch)
                const2((C, DK)),    # wq (padded)
                const2((1, DK)),    # bq (padded)
                const2((1, C)),     # bvf (folded bias)
            ],
            out_specs=pl.BlockSpec((None, tq, C), lambda b, qi, ki: (b, qi, 0)),
            scratch_shapes=[
                pltpu.VMEM((tq, DK), mx_dtype),     # cached Q projection
                pltpu.VMEM((tq, 1), jnp.float32),   # running max m
                pltpu.VMEM((tq, 1), jnp.float32),   # running denom l
                pltpu.VMEM((tq, C), jnp.float32),   # output accumulator
            ],
        ),
        compiler_params=pltpu.CompilerParams(
            dimension_semantics=("parallel", "parallel", "arbitrary"),
            vmem_limit_bytes=vmem_limit,
        ),
        cost_estimate=cost,
    )(x_nnc, k_pad, v_all, wq_pad, bq_pad, bvf)

    # (B, N, C) -> NCHW
    return jnp.transpose(out_nnc, (0, 2, 1)).reshape(B, C, W, H)


def self_atten_ref(x, params):
    """Pure-JAX reference matching the PyTorch forward (NCHW)."""
    B, C, W, H = x.shape
    N = W * H

    def conv1x1(inp, w, b):  # inp (B, C, N), w (out, in, 1, 1), b (out,)
        wm = w.reshape(w.shape[0], w.shape[1])
        return jnp.einsum("oc,bcn->bon", wm, inp) + b[None, :, None]

    xf = x.reshape(B, C, N)
    q = conv1x1(xf, params["wq"], params["bq"])          # (B, C8, N)
    k = conv1x1(xf, params["wk"], params["bk"])          # (B, C8, N)
    v = conv1x1(xf, params["wv"], params["bv"])          # (B, C, N)
    energy = jnp.einsum("bcn,bcm->bnm", q, k)            # (B, N, N)
    attn = jax.nn.softmax(energy, axis=-1)
    out = jnp.einsum("bcn,bmn->bcm", v, attn)            # (B, C, N)
    out = conv1x1(out, params["wf"], params["bf"])
    return (out + xf).reshape(B, C, W, H)


def _make_params(key, C):
    C8 = C // 8
    ks = jax.random.split(key, 8)
    return {
        "wq": 0.1 * jax.random.normal(ks[0], (C8, C, 1, 1), dtype=jnp.float32),
        "bq": 0.1 * jax.random.normal(ks[1], (C8,), dtype=jnp.float32),
        "wk": 0.1 * jax.random.normal(ks[2], (C8, C, 1, 1), dtype=jnp.float32),
        "bk": 0.1 * jax.random.normal(ks[3], (C8,), dtype=jnp.float32),
        "wv": 0.1 * jax.random.normal(ks[4], (C, C, 1, 1), dtype=jnp.float32),
        "bv": 0.1 * jax.random.normal(ks[5], (C,), dtype=jnp.float32),
        "wf": 0.1 * jax.random.normal(ks[6], (C, C, 1, 1), dtype=jnp.float32),
        "bf": 0.1 * jax.random.normal(ks[7], (C,), dtype=jnp.float32),
    }


if __name__ == "__main__":
    def run_case(B, C, W, H, seed):
        key = jax.random.fold_in(jax.random.PRNGKey(0), seed)
        kx, kp = jax.random.split(key)
        x = jax.random.normal(kx, (B, C, W, H), dtype=jnp.float32)
        params = _make_params(kp, C)
        ref = self_atten_ref(x, params)

        # f32 MXU path: tight check of the algorithm (fold, padding, flash).
        out_f32 = self_atten_pallas(x, params, use_bf16_matmul=False)
        jax.block_until_ready(out_f32)
        assert out_f32.shape == (B, C, W, H)
        assert jnp.allclose(out_f32, ref, atol=5e-4, rtol=5e-4), "f32 mismatch"

        # Default bf16 MXU path (f32 accumulation / softmax / residual):
        # looser, relative check against the f32 reference.
        out = self_atten_pallas(x, params)
        jax.block_until_ready(out)
        rel = jnp.sqrt(jnp.mean((out - ref) ** 2)) / jnp.sqrt(jnp.mean(ref ** 2))
        assert float(rel) < 3e-2, f"bf16 relative error too large: {float(rel)}"

    # Module-default channel count (C=128, lane-dense output) and a multi-tile
    # flash case (N=1024 -> grid (B, 2, 2), tq=tk=512) exercising C<128 padding.
    run_case(2, 128, 16, 16, 0)
    run_case(2, 32, 32, 32, 1)
    print("KERNEL_OK")
</pallas_src>

<mosaic_0001>
module attributes {stable_mosaic.version = 11 : i64} {
  func.func @self_atten_kernel(%arg0: i32, %arg1: i32, %arg2: i32, %arg3: memref<1x256x128xf32, #tpu.memory_space<vmem>>, %arg4: memref<1x256x128xf32, #tpu.memory_space<vmem>>, %arg5: memref<1x256x128xf32, #tpu.memory_space<vmem>>, %arg6: memref<128x128xf32, #tpu.memory_space<vmem>>, %arg7: memref<1x128xf32, #tpu.memory_space<vmem>>, %arg8: memref<1x128xf32, #tpu.memory_space<vmem>>, %arg9: memref<1x256x128xf32, #tpu.memory_space<vmem>>, %arg10: memref<256x128xf32, #tpu.memory_space<vmem>>, %arg11: memref<256x1xf32, #tpu.memory_space<vmem>>, %arg12: memref<256x1xf32, #tpu.memory_space<vmem>>, %arg13: memref<256x128xf32, #tpu.memory_space<vmem>>) attributes {dimension_semantics = [#tpu.dimension_semantics<parallel>, #tpu.dimension_semantics<parallel>, #tpu.dimension_semantics<arbitrary>], iteration_bounds = array<i64: 2, 1, 1>, scalar_prefetch = 0 : i64, scratch_operands = 4 : i64, tpu.core_type = #tpu.core_type<tc>, window_params = [{transform_indices = @transform_0, window_bounds = array<i64: 1, 256, 128>}, {transform_indices = @transform_1, window_bounds = array<i64: 1, 256, 128>}, {transform_indices = @transform_2, window_bounds = array<i64: 1, 256, 128>}, {pipeline_mode = #tpu.pipeline_mode<synchronous>, transform_indices = @transform_3, window_bounds = array<i64: 128, 128>}, {pipeline_mode = #tpu.pipeline_mode<synchronous>, transform_indices = @transform_4, window_bounds = array<i64: 1, 128>}, {pipeline_mode = #tpu.pipeline_mode<synchronous>, transform_indices = @transform_5, window_bounds = array<i64: 1, 128>}, {transform_indices = @transform_6, window_bounds = array<i64: 1, 256, 128>}]} {
    %c0_i32 = arith.constant 0 : i32
    %0 = arith.cmpi eq, %arg2, %c0_i32 : i32
    %1 = arith.extui %0 : i1 to i32
    %c0_i32_0 = arith.constant 0 : i32
    %2 = arith.cmpi ne, %1, %c0_i32_0 : i32
    scf.if %2 {
      %c0_23 = arith.constant 0 : index
      %c0_24 = arith.constant 0 : index
      %c0_25 = arith.constant 0 : index
      %38 = vector.load %arg3[%c0_23, %c0_24, %c0_25] : memref<1x256x128xf32, #tpu.memory_space<vmem>>, vector<1x256x128xf32>
      %39 = vector.shape_cast %38 : vector<1x256x128xf32> to vector<256x128xf32>
      %c0_26 = arith.constant 0 : index
      %c0_27 = arith.constant 0 : index
      %40 = vector.load %arg6[%c0_26, %c0_27] : memref<128x128xf32, #tpu.memory_space<vmem>>, vector<128x128xf32>
      %cst_28 = arith.constant dense<0.000000e+00> : vector<256x128xf32>
      %41 = tpu.matmul %39, %40, %cst_28 {dimension_numbers = #tpu.dot_dimension_numbers<[1], [0], [0], [1], [0, 0, 1, 1], [], []>} : vector<256x128xf32>, vector<128x128xf32>, vector<256x128xf32> -> vector<256x128xf32>
      %c0_29 = arith.constant 0 : index
      %c0_30 = arith.constant 0 : index
      %42 = vector.load %arg7[%c0_29, %c0_30] : memref<1x128xf32, #tpu.memory_space<vmem>>, vector<1x128xf32>
      %43 = vector.broadcast %42 : vector<1x128xf32> to vector<256x128xf32>
      %44 = arith.addf %41, %43 : vector<256x128xf32>
      %c0_31 = arith.constant 0 : index
      %c0_32 = arith.constant 0 : index
      %45 = vector.load %arg10[%c0_31, %c0_32] : memref<256x128xf32, #tpu.memory_space<vmem>>, vector<256x128xf32>
      tpu.vector_store %arg10[%c0_31, %c0_32], %44 {strides = array<i32>} : memref<256x128xf32, #tpu.memory_space<vmem>>, vector<256x128xf32>,
      %cst_33 = arith.constant 0xFF800000 : f32
      %46 = vector.broadcast %cst_33 : f32 to vector<256x1xf32>
      %c0_34 = arith.constant 0 : index
      %c0_35 = arith.constant 0 : index
      %47 = vector.load %arg11[%c0_34, %c0_35] : memref<256x1xf32, #tpu.memory_space<vmem>>, vector<256x1xf32>
      tpu.vector_store %arg11[%c0_34, %c0_35], %46 {strides = array<i32>} : memref<256x1xf32, #tpu.memory_space<vmem>>, vector<256x1xf32>,
      %cst_36 = arith.constant 0.000000e+00 : f32
      %48 = vector.broadcast %cst_36 : f32 to vector<256x1xf32>
      %c0_37 = arith.constant 0 : index
      %c0_38 = arith.constant 0 : index
      %49 = vector.load %arg12[%c0_37, %c0_38] : memref<256x1xf32, #tpu.memory_space<vmem>>, vector<256x1xf32>
      tpu.vector_store %arg12[%c0_37, %c0_38], %48 {strides = array<i32>} : memref<256x1xf32, #tpu.memory_space<vmem>>, vector<256x1xf32>,
      %cst_39 = arith.constant 0.000000e+00 : f32
      %50 = vector.broadcast %cst_39 : f32 to vector<256x128xf32>
      %c0_40 = arith.constant 0 : index
      %c0_41 = arith.constant 0 : index
      %51 = vector.load %arg13[%c0_40, %c0_41] : memref<256x128xf32, #tpu.memory_space<vmem>>, vector<256x128xf32>
      tpu.vector_store %arg13[%c0_40, %c0_41], %50 {strides = array<i32>} : memref<256x128xf32, #tpu.memory_space<vmem>>, vector<256x128xf32>,
    } else {
    }
    %c256_i32 = arith.constant 256 : i32
    %3 = arith.muli %arg2, %c256_i32 : i32
    %4 = tpu.assume_multiple %3, 128 : i32
    %c0 = arith.constant 0 : index
    %5 = arith.index_cast %4 : i32 to index
    %c0_1 = arith.constant 0 : index
    %6 = vector.load %arg4[%c0, %5, %c0_1] : memref<1x256x128xf32, #tpu.memory_space<vmem>>, vector<1x256x128xf32>
    %7 = vector.shape_cast %6 : vector<1x256x128xf32> to vector<256x128xf32>
    %c0_2 = arith.constant 0 : index
    %8 = arith.index_cast %4 : i32 to index
    %c0_3 = arith.constant 0 : index
    %9 = vector.load %arg5[%c0_2, %8, %c0_3] : memref<1x256x128xf32, #tpu.memory_space<vmem>>, vector<1x256x128xf32>
    %10 = vector.shape_cast %9 : vector<1x256x128xf32> to vector<256x128xf32>
    %c0_4 = arith.constant 0 : index
    %c0_5 = arith.constant 0 : index
    %11 = vector.load %arg10[%c0_4, %c0_5] : memref<256x128xf32, #tpu.memory_space<vmem>>, vector<256x128xf32>
    %cst = arith.constant dense<0.000000e+00> : vector<256x256xf32>
    %12 = tpu.matmul %11, %7, %cst {dimension_numbers = #tpu.dot_dimension_numbers<[1], [1], [0], [0], [0, 0, 1, 0], [], []>} : vector<256x128xf32>, vector<256x128xf32>, vector<256x256xf32> -> vector<256x256xf32>
    %c0_6 = arith.constant 0 : index
    %c0_7 = arith.constant 0 : index
    %13 = vector.load %arg11[%c0_6, %c0_7] : memref<256x1xf32, #tpu.memory_space<vmem>>, vector<256x1xf32>
    %cst_8 = arith.constant dense<0xFF800000> : vector<256xf32>
    %14 = vector.multi_reduction <maximumf>, %12, %cst_8 [1] : vector<256x256xf32> to vector<256xf32>
    %15 = vector.shape_cast %14 : vector<256xf32> to vector<256x1xf32>
    %16 = arith.maximumf %13, %15 : vector<256x1xf32>
    %17 = arith.subf %13, %16 : vector<256x1xf32>
    %18 = math.exp %17 : vector<256x1xf32>
    %19 = vector.broadcast %16 : vector<256x1xf32> to vector<256x256xf32>
    %20 = arith.subf %12, %19 : vector<256x256xf32>
    %21 = math.exp %20 : vector<256x256xf32>
    %c0_9 = arith.constant 0 : index
    %c0_10 = arith.constant 0 : index
    %22 = vector.load %arg12[%c0_9, %c0_10] : memref<256x1xf32, #tpu.memory_space<vmem>>, vector<256x1xf32>
    %23 = arith.mulf %18, %22 : vector<256x1xf32>
    %cst_11 = arith.constant dense<0.000000e+00> : vector<256xf32>
    %24 = vector.multi_reduction <add>, %21, %cst_11 [1] : vector<256x256xf32> to vector<256xf32>
    %25 = vector.shape_cast %24 : vector<256xf32> to vector<256x1xf32>
    %26 = arith.addf %23, %25 : vector<256x1xf32>
    %c0_12 = arith.constant 0 : index
    %c0_13 = arith.constant 0 : index
    %27 = vector.load %arg12[%c0_12, %c0_13] : memref<256x1xf32, #tpu.memory_space<vmem>>, vector<256x1xf32>
    tpu.vector_store %arg12[%c0_12, %c0_13], %26 {strides = array<i32>} : memref<256x1xf32, #tpu.memory_space<vmem>>, vector<256x1xf32>,
    %c0_14 = arith.constant 0 : index
    %c0_15 = arith.constant 0 : index
    %28 = vector.load %arg13[%c0_14, %c0_15] : memref<256x128xf32, #tpu.memory_space<vmem>>, vector<256x128xf32>
    %29 = vector.broadcast %18 : vector<256x1xf32> to vector<256x128xf32>
    %30 = arith.mulf %29, %28 : vector<256x128xf32>
    %cst_16 = arith.constant dense<0.000000e+00> : vector<256x128xf32>
    %31 = tpu.matmul %21, %10, %cst_16 {dimension_numbers = #tpu.dot_dimension_numbers<[1], [0], [0], [1], [0, 0, 1, 1], [], []>} : vector<256x256xf32>, vector<256x128xf32>, vector<256x128xf32> -> vector<256x128xf32>
    %32 = arith.addf %30, %31 : vector<256x128xf32>
    %c0_17 = arith.constant 0 : index
    %c0_18 = arith.constant 0 : index
    %33 = vector.load %arg13[%c0_17, %c0_18] : memref<256x128xf32, #tpu.memory_space<vmem>>, vector<256x128xf32>
    tpu.vector_store %arg13[%c0_17, %c0_18], %32 {strides = array<i32>} : memref<256x128xf32, #tpu.memory_space<vmem>>, vector<256x128xf32>,
    %c0_19 = arith.constant 0 : index
    %c0_20 = arith.constant 0 : index
    %34 = vector.load %arg11[%c0_19, %c0_20] : memref<256x1xf32, #tpu.memory_space<vmem>>, vector<256x1xf32>
    tpu.vector_store %arg11[%c0_19, %c0_20], %16 {strides = array<i32>} : memref<256x1xf32, #tpu.memory_space<vmem>>, vector<256x1xf32>,
    %c0_i32_21 = arith.constant 0 : i32
    %35 = arith.cmpi eq, %arg2, %c0_i32_21 : i32
    %36 = arith.extui %35 : i1 to i32
    %c0_i32_22 = arith.constant 0 : i32
    %37 = arith.cmpi ne, %36, %c0_i32_22 : i32
    scf.if %37 {
      %c0_23 = arith.constant 0 : index
      %c0_24 = arith.constant 0 : index
      %38 = vector.load %arg12[%c0_23, %c0_24] : memref<256x1xf32, #tpu.memory_space<vmem>>, vector<256x1xf32>
      %39 = tpu.reciprocal %38 : vector<256x1xf32> -> vector<256x1xf32>
      %c0_25 = arith.constant 0 : index
      %c0_26 = arith.constant 0 : index
      %40 = vector.load %arg13[%c0_25, %c0_26] : memref<256x128xf32, #tpu.memory_space<vmem>>, vector<256x128xf32>
      %41 = vector.broadcast %39 : vector<256x1xf32> to vector<256x128xf32>
      %42 = arith.mulf %40, %41 : vector<256x128xf32>
      %c0_27 = arith.constant 0 : index
      %c0_28 = arith.constant 0 : index
      %43 = vector.load %arg8[%c0_27, %c0_28] : memref<1x128xf32, #tpu.memory_space<vmem>>, vector<1x128xf32>
      %44 = vector.broadcast %43 : vector<1x128xf32> to vector<256x128xf32>
      %45 = arith.addf %42, %44 : vector<256x128xf32>
      %c0_29 = arith.constant 0 : index
      %c0_30 = arith.constant 0 : index
      %c0_31 = arith.constant 0 : index
      %46 = vector.load %arg3[%c0_29, %c0_30, %c0_31] : memref<1x256x128xf32, #tpu.memory_space<vmem>>, vector<1x256x128xf32>
      %47 = vector.shape_cast %46 : vector<1x256x128xf32> to vector<256x128xf32>
      %48 = arith.addf %45, %47 : vector<256x128xf32>
      %c0_32 = arith.constant 0 : index
      %c0_33 = arith.constant 0 : index
      %c0_34 = arith.constant 0 : index
      %49 = vector.load %arg9[%c0_32, %c0_33, %c0_34] : memref<1x256x128xf32, #tpu.memory_space<vmem>>, vector<1x256x128xf32>
      %50 = vector.shape_cast %49 : vector<1x256x128xf32> to vector<256x128xf32>
      %51 = vector.shape_cast %48 : vector<256x128xf32> to vector<1x256x128xf32>
      tpu.vector_store %arg9[%c0_32, %c0_33, %c0_34], %51 {strides = array<i32>} : memref<1x256x128xf32, #tpu.memory_space<vmem>>, vector<1x256x128xf32>,
    } else {
    }
    return
  }
  func.func @transform_0(%arg0: i32, %arg1: i32, %arg2: i32) -> (i32, i32, i32) {
    %c0_i32 = arith.constant 0 : i32
    %c0_i32_0 = arith.constant 0 : i32
    return %arg0, %arg1, %c0_i32 : i32, i32, i32
  }
  func.func @transform_1(%arg0: i32, %arg1: i32, %arg2: i32) -> (i32, i32, i32) {
    %c0_i32 = arith.constant 0 : i32
    %c0_i32_0 = arith.constant 0 : i32
    %c0_i32_1 = arith.constant 0 : i32
    return %arg0, %c0_i32, %c0_i32_0 : i32, i32, i32
  }
  func.func @transform_2(%arg0: i32, %arg1: i32, %arg2: i32) -> (i32, i32, i32) {
    %c0_i32 = arith.constant 0 : i32
    %c0_i32_0 = arith.constant 0 : i32
    %c0_i32_1 = arith.constant 0 : i32
    return %arg0, %c0_i32, %c0_i32_0 : i32, i32, i32
  }
  func.func @transform_3(%arg0: i32, %arg1: i32, %arg2: i32) -> (i32, i32) {
    %c0_i32 = arith.constant 0 : i32
    %c0_i32_0 = arith.constant 0 : i32
    %c0_i32_1 = arith.constant 0 : i32
    return %c0_i32, %c0_i32_0 : i32, i32
  }
  func.func @transform_4(%arg0: i32, %arg1: i32, %arg2: i32) -> (i32, i32) {
    %c0_i32 = arith.constant 0 : i32
    %c0_i32_0 = arith.constant 0 : i32
    %c0_i32_1 = arith.constant 0 : i32
    return %c0_i32, %c0_i32_0 : i32, i32
  }
  func.func @transform_5(%arg0: i32, %arg1: i32, %arg2: i32) -> (i32, i32) {
    %c0_i32 = arith.constant 0 : i32
    %c0_i32_0 = arith.constant 0 : i32
    %c0_i32_1 = arith.constant 0 : i32
    return %c0_i32, %c0_i32_0 : i32, i32
  }
  func.func @transform_6(%arg0: i32, %arg1: i32, %arg2: i32) -> (i32, i32, i32) {
    %c0_i32 = arith.constant 0 : i32
    %c0_i32_0 = arith.constant 0 : i32
    return %arg0, %arg1, %c0_i32 : i32, i32, i32
  }
}

</mosaic_0001>

<bundles_post_ra>
// kernel: tpu_custom_call.1
= control target key start
LH: loop header
LB: loop body
LE: loop exit
PB: predicated region body
PF: predicated region fallthrough
CT: control target
= control target key end

     0   :  { %s5859_s0 = inlined_call_operand.hbm [shape: f32[2,256,128], index: 0, kind: input, shape index: {}]   ;;  %s5860_s1 = inlined_call_operand.hbm [shape: f32[2,256,128], index: 1, kind: input, shape index: {}]   ;;  %s5861_s2 = inlined_call_operand.hbm [shape: f32[2,256,128], index: 2, kind: input, shape index: {}]   ;;  %s5862_s3 = inlined_call_operand.hbm [shape: f32[128,128], index: 3, kind: input, shape index: {}]   ;;  %s5863_s4 = inlined_call_operand.vmem [shape: f32[1,128], index: 4, kind: input, shape index: {}]   ;;  %s5864_s5 = inlined_call_operand.vmem [shape: f32[1,128], index: 5, kind: input, shape index: {}]   ;;  %s5865_s6 = inlined_call_operand.hbm [shape: f32[2,256,128], index: 6, kind: output, shape index: {}]  }
   0x1   :  { %5953 = sst [smem:[#allocation88_spill]] %s5859_s0 }
   0x2   :  { %5954 = sst [smem:[#allocation89_spill]] %s5860_s1 }
   0x3   :  { %11 = vsyncpa [#allocation7], 0 }
   0x4   :  { %13 = vsyncpa [#allocation7 + $0x1], 0 }
   0x5   :  { %14 = vsyncpa [#allocation10], 0 }
   0x6   :  { %16 = vsyncpa [#allocation10 + $0x1], 0 }
   0x7   :  { %17 = vsyncpa [#allocation13], 0 }
   0x8   :  { %18 = vsyncpa [#allocation8], 0 }
   0x9   :  { %20 = vsyncpa [#allocation8 + $0x1], 0  ;;  %s4131_s21 = smov 0   ;;  %s4133_s22 = smov 0  }
   0xa   :  { %s4135_s23 = smov 0   ;;  %s4137_s24 = smov 0  }
   0xb   :  { %s4139_s25 = smov 0   ;;  %s4141_s26 = smov 0  }
   0xc LB: > { %5955 = sst [smem:[#allocation19_spill]] %s4069_s23  ;;  %s45_s27 = sadd.s32 1, %s4077_s25  ;;  %s4081_s26 = sphi %s4141_s26, %s26_s26   ;;  %s4077_s25 = sphi %s4139_s25, %s6169_s25   ;;  %s4073_s24 = sphi %s4137_s24, %s6168_s24   ;;  %s4069_s23 = sphi %s4135_s23, %s6167_s23   ;;  %s4065_s22 = sphi %s4133_s22, %s6171_s22   ;;  %s4061_s21 = sphi %s4131_s21, %s6170_s21  }
   0xd   : > { %5956 = sst [smem:[#allocation20_spill]] %s4077_s25  ;;  %s54_s28 = sadd.s32 1, %s4069_s23 }
   0xe   : > { %5957 = sst [smem:[#allocation21_spill]] %s4081_s26  ;;  %p47_p0 = scmp.ge.s32.totalorder %s45_s27, 2 }
   0xf   : > { %p5866_p1 = scmp.ne.s32.totalorder %s4069_s23, %s4065_s22  ;;  %p62_p2 = scmp.eq.s32.totalorder %s4081_s26, 0 }
  0x10   : > { %s6173_s27 = smov (%p47_p0, %s45_s27), 0  ;;  %p3555_p6 = scmp.lt.s32.totalorder %s4081_s26, 2 }
  0x11   : > { %5958 = sst [smem:[#allocation22_spill]] %s6173_s27  ;;  %p63_p3 = por %p62_p2, %p5866_p1 }
  0x12   : > { %s49_s29 = ssub.s32 %s4077_s25, %s6173_s27  ;;  %s5871_s30 = sand.u32 1, %s4069_s23  }
  0x13   : > { %p52_p5 = scmp.eq.s32.totalorder %s49_s29, 0  ;;  %s4177_s7 = sshll.u32 %s4077_s25, 12 }
  0x14   : > { %s4184_s9 = sshll.u32 %s5871_s30, 8  ;;  %p4186_p7 = pnand %p3555_p6, %p63_p3 }
  0x15   : > { %s4180_s8 = scalar_select %p52_p5, %s4069_s23, %s54_s28  }
  0x16   : > { %s5960_s10 = scalar_select %p4186_p7, 1, 0 }
  0x17   : > { %5959 = sst [smem:[#allocation23_spill]] %s4180_s8  ;;  %s276_s11 = sand.u32 1, %s4081_s26  }
  0x18   : > { %s5961_s1 = sld [smem:[#allocation89_spill]]  ;;  %s280_s15 = scalar_lea.vmem [#allocation9], %s4184_s9 }
  0x19   : > { %s287_s16 = sshll.u32 %s280_s15, 4  ;;  %s4200_s17 = scalar_lea.sflag [#allocation10], %s276_s11  ;;  %s4198_s16 = int_to_ptr.vmem [resolvable:$true] %s287_s16 }
  0x1a   : > { %p4206_p9 = pneg %p4186_p7 }
  0x1c   : > { %s5962_s19 = scalar_select %p4206_p9, 1, 0 }
  0x1e   : > { %s4195_s14 = scalar_lea.hbm %s5961_s1, %s4177_s7  ;;  %s3878_s29 = scalar_lea.hbm %s5961_s1, 8192 }
  0x1f   : > { %s3873_s18 = scalar_lea.hbm %s4195_s14, 4096  ;;  %p3879_p12 = scmp.lt.u32.totalorder %s4195_s14, %s5961_s1 }
  0x20   : > { %p3874_p8 = scmp.ne.s32.totalorder %s4195_s14, %s3873_s18  ;;  %p3880_p13 = scmp.lt.u32.totalorder %s3878_s29, %s3873_s18 }
  0x21   : > { %p3882_p2 = scmp.lt.u32.totalorder %s3873_s18, %s4195_s14 }
  0x22   : > { %p3876_p10 = pnand %p4206_p9, %p3874_p8  ;;  %p3881_p0 = por %p3880_p13, %p3879_p12 }
  0x24   : > { %p3877_p11 = pneg %p3876_p10  ;;  %p3883_p3 = por %p3882_p2, %p3881_p0 }
  0x26   : > { %p3884_p5 = pnand %p3883_p3, %p3877_p11 }
  0x28   : > { %3887 = shalt.err (!%p3884_p5)
}
  0x29   : > { %s3888_s11 = scalar_lea.vmem %s4198_s16, 4096  ;;  %s4083_s15 = smov [#allocation9]  }
  0x2a   : > { %p3889_p6 = scmp.ne.s32.totalorder %s4198_s16, %s3888_s11  ;;  %s3893_s20 = sshll.u32 %s4083_s15, 4  ;;  %s3894_s20 = int_to_ptr.vmem [resolvable:$false] %s3893_s20 }
  0x2b   : > { %s3895_s28 = scalar_lea.vmem %s3894_s20, 8192  ;;  %p3896_p4 = scmp.lt.s32.totalorder %s4198_s16, %s3894_s20 }
  0x2c   : > { %p3891_p8 = pnand %p3889_p6, %p4206_p9  ;;  %p3897_p1 = scmp.lt.s32.totalorder %s3895_s28, %s3888_s11 }
  0x2e   : > { %p3892_p10 = pneg %p3891_p8  ;;  %p3898_p12 = por %p3897_p1, %p3896_p4 }
  0x30   : > { %p3899_p13 = pnand %p3898_p12, %p3892_p10 }
  0x32   : > { %3902 = shalt.err (!%p3899_p13)
}
  0x33   : > { %s5867_s18 = smov 128   ;;  %s5869_s29 = smov 8  }
  0x34   : > { %3546 = dma.hbm_to_vmem [thread:$0]  (!%p4186_p7), %s4195_s14, 4096, %s4198_s16, %s4200_s17, %s5867_s18, %s5867_s18, %s5869_s29  }
  0x35   : > { %s4234_s12 = sadd.s32 4294967295, %s4081_s26   ;;  %s3126_s13 = sadd.s32 4294967294, %s4081_s26  }
  0x36   : > { %p67_p1 = scmp.ne.s32.totalorder %s4065_s22, %s4061_s21  ;;  %p5877_p4 = scmp.eq.s32.totalorder %s4234_s12, 0 }
  0x37   : > { %p208_p11 = scmp.eq.s32.totalorder %s4234_s12, 1  ;;  %p214_p0 = scmp.eq.s32.totalorder %s3126_s13, 1 }
  0x38   : > { %p3127_p2 = scmp.ge.s32.totalorder %s4081_s26, 1  ;;  %p4244_p3 = por %p5877_p4, %p67_p1 }
  0x39   : > { %p5964_p5 = scmp.ne.s32.totalorder %s4069_s23, %s4065_s22  ;;  %p4255_p8 = por %p214_p0, %p67_p1 }
  0x3a   : > { %s5963_s11 = scalar_select %p4244_p3, 1, 0 }
  0x3b   : > { %p4251_p6 = por %p208_p11, %p5964_p5  ;;  %p221_p10 = scmp.lt.s32.totalorder %s4081_s26, 3 }
  0x3c   : > { %s5966_s16 = scalar_select %p4255_p8, 1, 0 }
  0x3d   : > { %s5965_s14 = scalar_select %p4251_p6, 1, 0 }
  0x3e   : > { %5967 = sst [smem:[#allocation24_spill]] %s5966_s16  ;;  %p4260_p12 = pnand %p3127_p2, %p221_p10 }
  0x3f   : > { %s4086_s20 = smov [#allocation12]   ;;  %s5969_s0 = sld [smem:[#allocation88_spill]] }
  0x40   : > { %s5968_s15 = scalar_select %p4260_p12, 1, 0 }
  0x41   : > { %s233_s28 = sshll.u32 %s4086_s20, 4  ;;  %p3536_p13 = pneg %p4260_p12  ;;  %s4264_s28 = int_to_ptr.vmem [resolvable:$true] %s233_s28 }
  0x42   : > { %s257_s30 = scalar_lea.vmem [#allocation6], %s4184_s9  ;;  %s5971_s20 = sand.u32 1, %s4069_s23  }
  0x43   : > { %s266_s1 = sshll.u32 %s257_s30, 4  ;;  %p4277_p1 = pnand %p3536_p13, %p5877_p4  ;;  %s4281_s1 = int_to_ptr.vmem [resolvable:$true] %s266_s1 }
  0x44   : > { %s4285_s25 = scalar_lea.sflag [#allocation7], %s5971_s20 }
  0x45   : > { %s4272_s29 = scalar_lea.hbm %s5969_s0, %s4177_s7  ;;  %s3908_s26 = scalar_lea.hbm %s5969_s0, 8192 }
  0x46   : > { %s5970_s27 = scalar_select %p4277_p1, 1, 0 }
  0x47   : > { %s3903_s8 = scalar_lea.hbm %s4272_s29, 4096  ;;  %p3909_p5 = scmp.lt.u32.totalorder %s4272_s29, %s5969_s0 }
  0x48   : > { %p3904_p11 = scmp.ne.s32.totalorder %s4272_s29, %s3903_s8  ;;  %p3910_p10 = scmp.lt.u32.totalorder %s3908_s26, %s3903_s8 }
  0x49   : > { %p3912_p4 = scmp.lt.u32.totalorder %s3903_s8, %s4272_s29 }
  0x4a   : > { %p3906_p0 = pnand %p3904_p11, %p4206_p9  ;;  %p3911_p13 = por %p3910_p10, %p3909_p5 }
  0x4c   : > { %p3907_p2 = pneg %p3906_p0  ;;  %p3913_p8 = por %p3912_p4, %p3911_p13 }
  0x4e   : > { %p3914_p6 = pnand %p3913_p8, %p3907_p2 }
  0x50   : > { %3917 = shalt.err (!%p3914_p6)
}
  0x51   : > { %s3918_s20 = scalar_lea.vmem %s4281_s1, 4096  ;;  %s4087_s18 = smov [#allocation6]  }
  0x52   : > { %p3919_p11 = scmp.ne.s32.totalorder %s4281_s1, %s3918_s20  ;;  %s3923_s13 = sshll.u32 %s4087_s18, 4  ;;  %s3924_s13 = int_to_ptr.vmem [resolvable:$false] %s3923_s13 }
  0x53   : > { %s3925_s16 = scalar_lea.vmem %s3924_s13, 8192  ;;  %p3926_p12 = scmp.lt.s32.totalorder %s4281_s1, %s3924_s13 }
  0x54   : > { %p3921_p0 = pnand %p3919_p11, %p4206_p9  ;;  %p3927_p1 = scmp.lt.s32.totalorder %s3925_s16, %s3918_s20 }
  0x56   : > { %p3922_p3 = pneg %p3921_p0  ;;  %p3928_p5 = por %p3927_p1, %p3926_p12 }
  0x58   : > { %p3929_p10 = pnand %p3928_p5, %p3922_p3 }
  0x5a   : > { %3932 = shalt.err (!%p3929_p10)
}
  0x5b   : > { %s5972_s26 = smov 8   ;;  %s5973_s8 = smov 128  }
  0x5c   : > { %3543 = dma.hbm_to_vmem [thread:$0]  (!%p4186_p7), %s4272_s29, 4096, %s4281_s1, %s4285_s25, %s5973_s8, %s5973_s8, %s5972_s26  }
  0x5d   : > { %s3933_s18 = scalar_lea.hbm %s5862_s3, 2048  ;;  %p5974_p3 = scmp.ne.s32.totalorder %s5970_s27, 0 }
  0x5e   : > { %p3934_p4 = scmp.ne.s32.totalorder %s5862_s3, %s3933_s18  ;;  %p3940_p1 = scmp.lt.u32.totalorder %s3933_s18, %s5862_s3 }
  0x5f   : > { %p3935_p6 = pneg %p5974_p3 }
  0x61   : > { %p3936_p8 = pnand %p3935_p6, %p3934_p4 }
  0x63   : > { %p3937_p12 = pneg %p3936_p8 }
  0x65   : > { %p3942_p2 = pnand %p3940_p1, %p3937_p12 }
  0x67   : > { %3945 = shalt.err (!%p3942_p2)
}
  0x68   : > { %s3946_s1 = scalar_lea.vmem %s4264_s28, 2048  ;;  %p3954_p5 = scmp.lt.s32.totalorder %s4264_s28, %s4264_s28 }
  0x69   : > { %p3947_p13 = scmp.ne.s32.totalorder %s4264_s28, %s3946_s1  ;;  %p3955_p10 = scmp.lt.s32.totalorder %s3946_s1, %s3946_s1 }
  0x6b   : > { %p3949_p11 = pnand %p3947_p13, %p3935_p6  ;;  %p3956_p7 = por %p3955_p10, %p3954_p5 }
  0x6d   : > { %p3950_p0 = pneg %p3949_p11 }
  0x6f   : > { %p3957_p9 = pnand %p3956_p7, %p3950_p0 }
  0x71   : > { %3960 = shalt.err (!%p3957_p9)
}
  0x72   : > { %3539 = dma.hbm_to_vmem [thread:$0]  (!%p5974_p3), %s5862_s3, 2048, %s4264_s28, [#allocation13], %s5973_s8, %s5973_s8, %s5972_s26  }
  0x73   : > { %s4340_s30 = scalar_lea.hbm %s5861_s2, %s4177_s7  ;;  %s301_s27 = scalar_lea.vmem [#allocation11], %s4184_s9 }
  0x74   : > { %s308_s18 = sshll.u32 %s301_s27, 4  ;;  %s3961_s13 = scalar_lea.hbm %s4340_s30, 4096  ;;  %s4343_s18 = int_to_ptr.vmem [resolvable:$true] %s308_s18 }
  0x75   : > { %p3962_p7 = scmp.ne.s32.totalorder %s4340_s30, %s3961_s13  ;;  %p5975_p9 = scmp.ne.s32.totalorder %s5962_s19, 0 }
  0x76   : > { %s3966_s16 = scalar_lea.hbm %s5861_s2, 8192  ;;  %p3967_p3 = scmp.lt.u32.totalorder %s4340_s30, %s5861_s2 }
  0x77   : > { %p3964_p4 = pnand %p3962_p7, %p5975_p9  ;;  %p3968_p8 = scmp.lt.u32.totalorder %s3966_s16, %s3961_s13 }
  0x78   : > { %p3970_p1 = scmp.lt.u32.totalorder %s3961_s13, %s4340_s30 }
  0x79   : > { %p3965_p6 = pneg %p3964_p4  ;;  %p3969_p12 = por %p3968_p8, %p3967_p3 }
  0x7b   : > { %p3971_p2 = por %p3970_p1, %p3969_p12 }
  0x7d   : > { %p3972_p13 = pnand %p3971_p2, %p3965_p6 }
  0x7f   : > { %3975 = shalt.err (!%p3972_p13)
}
  0x80   : > { %s3976_s9 = scalar_lea.vmem %s4343_s18, 4096  ;;  %s4088_s0 = smov [#allocation11]  }
  0x81   : > { %p3977_p11 = scmp.ne.s32.totalorder %s4343_s18, %s3976_s9  ;;  %s3981_s23 = sshll.u32 %s4088_s0, 4  ;;  %s3982_s23 = int_to_ptr.vmem [resolvable:$false] %s3981_s23 }
  0x82   : > { %s3983_s25 = scalar_lea.vmem %s3982_s23, 8192  ;;  %p3984_p10 = scmp.lt.s32.totalorder %s4343_s18, %s3982_s23 }
  0x83   : > { %p3979_p0 = pnand %p3977_p11, %p5975_p9  ;;  %p3985_p7 = scmp.lt.s32.totalorder %s3983_s25, %s3976_s9 }
  0x85   : > { %p3980_p5 = pneg %p3979_p0  ;;  %p3986_p4 = por %p3985_p7, %p3984_p10 }
  0x87   : > { %p3987_p3 = pnand %p3986_p4, %p3980_p5 }
  0x89   : > { %3990 = shalt.err (!%p3987_p3)
}
  0x8a   : > { %p5976_p6 = scmp.ne.s32.totalorder %s5960_s10, 0  ;;  %p5977_p9 = scmp.ne.s32.totalorder %s5968_s15, 0 }
  0x8c   : > { %3549 = dma.hbm_to_vmem [thread:$0]  (!%p5976_p6), %s4340_s30, 4096, %s4343_s18, %s4200_s17, %s5973_s8, %s5973_s8, %s5972_s26  }
  0x8d   : > { %320 = sbr.rel (%p5977_p9) target bundleno = 1361 (0x551), region = 44 }
  0x94   : > { %s4373_s19 = sand.u32 1, %s4065_s22   ;;  %p5978_p8 = scmp.ne.s32.totalorder %s5963_s11, 0 }
  0x95   : > { %s4376_s29 = sshll.u32 %s4373_s19, 8  ;;  %s323_s10 = scalar_lea.sflag [#allocation7], %s4373_s19 }
  0x96   : > { %s4380_s27 = scalar_lea.vmem [#allocation6], %s4376_s29 }
  0x97   : > { %4044 = dma.done.wait (%p5978_p8), %s323_s10, 4096  }
  0x98   : > { %4046 = vsyncadd (%p5978_p8), %s323_s10, 4294963200  ;;  %s331_s17 = sand.u32 1, %s4234_s12   ;;  %s4388_s26 = scalar_lea.vmem [#allocation9], %s4376_s29 }
  0x99   : > { %s332_s15 = scalar_lea.sflag [#allocation10], %s331_s17 }
  0x9a   : > { %4048 = dma.done.wait (%p5978_p8), %s332_s15, 8192  }
  0x9b   : > { %4050 = vsyncadd (%p5978_p8), %s332_s15, 4294959104  ;;  %s4395_s8 = scalar_lea.vmem [#allocation11], %s4376_s29  ;;  %p5979_p12 = scmp.eq.s32.totalorder %s4234_s12, 0 }
  0x9d   : > { %4052 = dma.done.wait (%p5979_p12), [#allocation13], 2048   ;;  %p5980_p1 = pmov %p5979_p12 }
  0x9e   : > { %v425_v0 = vld [vmem:[#allocation12] sm:$0xff]  ;;  %v426_v1 = vld [vmem:[#allocation12 + $0x8] sm:$0xff]  ;;  %v427_v2 = vld [vmem:[#allocation12 + $0x10] sm:$0xff]  ;;  %vm705_vm0 = vcmask 7168   ;;  %s5675_s13 = scalar_lea.vmem [#allocation14], %s4376_s29  ;;  %s3155_s20 = sshll.u32 %s4073_s24, 12 }
  0x9f   : > { %4054 = vsyncadd (%p5980_p1), [#allocation13], 4294965248  ;;  %v3380_v3 = vpack.c.bf16 %v426_v1, %v425_v0  ;;  %v428_v4 = vld [vmem:[#allocation12 + $0x18] sm:$0xff]  ;;  %v429_v6 = vld [vmem:[#allocation12 + $0x20] sm:$0xff]  ;;  %s2978_s28 = sshll.u32 %s5675_s13, 4  ;;  %s5806_s7 = scalar_lea.hbm %s5865_s6, %s3155_s20  ;;  %s5808_s28 = int_to_ptr.vmem [resolvable:$true] %s2978_s28 }
  0xa0   : > { %v3384_v5 = vpack.c.bf16 %v428_v4, %v427_v2  ;;  %v430_v7 = vld [vmem:[#allocation12 + $0x28] sm:$0xff]  ;;  %v393_v9 = vld [vmem:[%s4380_s27] sm:$0xff]  ;;  %v431_v10 = vld [vmem:[#allocation12 + $0x30] sm:$0xff]  ;;  %s2963_s24 = scalar_lea.sflag [#allocation8], %s4373_s19  ;;  %s3991_s9 = scalar_lea.vmem %s5808_s28, 4096 }
  0xa1   : > { %3381 = vmatprep.subr.bf16.mxu0 %v3380_v3  ;;  %v3388_v8 = vpack.c.bf16 %v430_v7, %v429_v6  ;;  %v432_v11 = vld [vmem:[#allocation12 + $0x38] sm:$0xff]  ;;  %3332 = vmatprep.mubr.f32.mxu0 %v393_v9  ;;  %v433_v13 = vld [vmem:[#allocation12 + $0x40] sm:$0xff]  ;;  %v434_v14 = vld [vmem:[#allocation12 + $0x48] sm:$0xff]  ;;  %p3992_p2 = scmp.ne.s32.totalorder %s5808_s28, %s3991_s9  ;;  %p6161_p13 = scmp.ne.s32.totalorder %s5965_s14, 0 }
  0xa2   : > { %3383 = vmatpush3.bf16.msra.mxu0 %v3380_v3  ;;  %v3392_v12 = vpack.c.bf16 %v432_v11, %v431_v10  ;;  %v3396_v15 = vpack.c.bf16 %v434_v14, %v433_v13  ;;  %v435_v16 = vld [vmem:[#allocation12 + $0x50] sm:$0xff]  ;;  %v436_v17 = vld [vmem:[#allocation12 + $0x58] sm:$0xff]  ;;  %v820_v18 = vld [vmem:[%s4388_s26 + $0x80] sm:$0xff]  ;;  %s4093_s0 = smov [#allocation14]  }
  0xa3   : > { %3385 = vmatprep.subr.bf16.mxu0 %v3384_v5  ;;  %v821_v19 = vld [vmem:[%s4388_s26 + $0x88] sm:$0xff]  ;;  %v804_v20 = vld [vmem:[%s4388_s26] sm:$0xff]  ;;  %v3400_v21 = vpack.c.bf16 %v436_v17, %v435_v16  ;;  %v822_v24 = vld [vmem:[%s4388_s26 + $0x90] sm:$0xff]  ;;  %p3993_p11 = pnand %p3992_p2, %p6161_p13  ;;  %s3995_s23 = sshll.u32 %s4093_s0, 4  ;;  %s3996_s23 = int_to_ptr.vmem [resolvable:$false] %s3995_s23 }
  0xa4   : > { %v3412_v22 = vpack.c.bf16 %v821_v19, %v820_v18  ;;  %v805_v23 = vld [vmem:[%s4388_s26 + $0x8] sm:$0xff]  ;;  %v823_v25 = vld [vmem:[%s4388_s26 + $0x98] sm:$0xff]  ;;  %v437_v26 = vld [vmem:[#allocation12 + $0x60] sm:$0xff]  ;;  %s3997_s25 = scalar_lea.vmem %s3996_s23, 8192  ;;  %p3998_p5 = scmp.lt.s32.totalorder %s5808_s28, %s3996_s23 }
  0xa5   : > { %v438_v27 = vld [vmem:[#allocation12 + $0x68] sm:$0xff]  ;;  %v3414_v28 = vpack.c.bf16 %v805_v23, %v804_v20  ;;  %v3416_v29 = vpack.c.bf16 %v823_v25, %v822_v24  ;;  %v439_v31 = vld [vmem:[#allocation12 + $0x70] sm:$0xff]  ;;  %v807_v33 = vld [vmem:[%s4388_s26 + $0x18] sm:$0xff]  ;;  %p3994_p0 = pneg %p3993_p11  ;;  %p3999_p10 = scmp.lt.s32.totalorder %s3997_s25, %s3991_s9 }
  0xa6   : > { %3387 = vmatpush3.bf16.msra.mxu0 %v3384_v5  ;;  %3413 = vmatprep.subr.bf16.mxu1 %v3412_v22  ;;  %v3404_v30 = vpack.c.bf16 %v438_v27, %v437_v26  ;;  %v806_v32 = vld [vmem:[%s4388_s26 + $0x10] sm:$0xff]  ;;  %v440_v34 = vld [vmem:[#allocation12 + $0x78] sm:$0xff]  ;;  %v824_v35 = vld [vmem:[%s4388_s26 + $0xa0] sm:$0xff] }
  0xa7   : > { %3389 = vmatprep.subr.bf16.mxu0 %v3388_v8  ;;  %3415 = vmatpush3.bf16.xpose.msra.mxu1 %v3414_v28  ;;  %v825_v36 = vld [vmem:[%s4388_s26 + $0xa8] sm:$0xff]  ;;  %v3418_v37 = vpack.c.bf16 %v807_v33, %v806_v32  ;;  %v3408_v38 = vpack.c.bf16 %v440_v34, %v439_v31  ;;  %v808_v40 = vld [vmem:[%s4388_s26 + $0x20] sm:$0xff]  ;;  %v826_v42 = vld [vmem:[%s4388_s26 + $0xb0] sm:$0xff]  ;;  %p4000_p7 = por %p3999_p10, %p3998_p5 }
  0xa8   : > { %3417 = vmatprep.subr.bf16.mxu1 %v3416_v29  ;;  %v3420_v39 = vpack.c.bf16 %v825_v36, %v824_v35  ;;  %v809_v41 = vld [vmem:[%s4388_s26 + $0x28] sm:$0xff]  ;;  %v827_v43 = vld [vmem:[%s4388_s26 + $0xb8] sm:$0xff]  ;;  %v395_v46 = vld [vmem:[%s4380_s27 + $0x10] sm:$0xff] }
  0xa9   : > { %v394_v44 = vld [vmem:[%s4380_s27 + $0x8] sm:$0xff]  ;;  %v3422_v45 = vpack.c.bf16 %v809_v41, %v808_v40  ;;  %v3424_v47 = vpack.c.bf16 %v827_v43, %v826_v42  ;;  %v396_v48 = vld [vmem:[%s4380_s27 + $0x18] sm:$0xff]  ;;  %v397_v49 = vld [vmem:[%s4380_s27 + $0x20] sm:$0xff]  ;;  %p4001_p4 = pnand %p4000_p7, %p3994_p0 }
  0xaa   : > { %3391 = vmatpush3.bf16.msra.mxu0 %v3388_v8  ;;  %v810_v50 = vld [vmem:[%s4388_s26 + $0x30] sm:$0xff]  ;;  %v811_v51 = vld [vmem:[%s4388_s26 + $0x38] sm:$0xff]  ;;  %v828_v52 = vld [vmem:[%s4388_s26 + $0xc0] sm:$0xff] }
  0xab   : > { %3393 = vmatprep.subr.bf16.mxu0 %v3392_v12  ;;  %v829_v53 = vld [vmem:[%s4388_s26 + $0xc8] sm:$0xff]  ;;  %v3426_v55 = vpack.c.bf16 %v811_v51, %v810_v50  ;;  %v399_v56 = vld [vmem:[%s4380_s27 + $0x30] sm:$0xff]  ;;  %v400_v58 = vld [vmem:[%s4380_s27 + $0x38] sm:$0xff] }
  0xac   : > { %v398_v54 = vld [vmem:[%s4380_s27 + $0x28] sm:$0xff]  ;;  %v3428_v57 = vpack.c.bf16 %v829_v53, %v828_v52  ;;  %v401_v59 = vld [vmem:[%s4380_s27 + $0x40] sm:$0xff]  ;;  %v830_v62 = vld [vmem:[%s4388_s26 + $0xd0] sm:$0xff] }
  0xad   : > { %v812_v60 = vld [vmem:[%s4388_s26 + $0x40] sm:$0xff]  ;;  %v813_v61 = vld [vmem:[%s4388_s26 + $0x48] sm:$0xff]  ;;  %v831_v63 = vld [vmem:[%s4388_s26 + $0xd8] sm:$0xff] }
  0xae   : > { %3395 = vmatpush3.bf16.msra.mxu0 %v3392_v12  ;;  %v402_v0 = vld [vmem:[%s4380_s27 + $0x48] sm:$0xff]  ;;  %v3430_v1 = vpack.c.bf16 %v813_v61, %v812_v60  ;;  %v403_v2 = vld [vmem:[%s4380_s27 + $0x50] sm:$0xff]  ;;  %v3432_v3 = vpack.c.bf16 %v831_v63, %v830_v62  ;;  %v404_v4 = vld [vmem:[%s4380_s27 + $0x58] sm:$0xff] }
  0xaf   : > { %3397 = vmatprep.subr.bf16.mxu0 %v3396_v15  ;;  %3419 = vmatpush3.bf16.xpose.msra.mxu1 %v3418_v37  ;;  %v405_v5 = vld [vmem:[%s4380_s27 + $0x60] sm:$0xff]  ;;  %v814_v6 = vld [vmem:[%s4388_s26 + $0x50] sm:$0xff]  ;;  %v815_v7 = vld [vmem:[%s4388_s26 + $0x58] sm:$0xff] }
  0xb0   : > { %3421 = vmatprep.subr.bf16.mxu1 %v3420_v39  ;;  %v832_v8 = vld [vmem:[%s4388_s26 + $0xe0] sm:$0xff]  ;;  %v833_v9 = vld [vmem:[%s4388_s26 + $0xe8] sm:$0xff]  ;;  %v3434_v11 = vpack.c.bf16 %v815_v7, %v814_v6  ;;  %v407_v12 = vld [vmem:[%s4380_s27 + $0x70] sm:$0xff] }
  0xb1   : > { %v406_v10 = vld [vmem:[%s4380_s27 + $0x68] sm:$0xff]  ;;  %v3436_v13 = vpack.c.bf16 %v833_v9, %v832_v8  ;;  %v408_v14 = vld [vmem:[%s4380_s27 + $0x78] sm:$0xff]  ;;  %v816_v16 = vld [vmem:[%s4388_s26 + $0x60] sm:$0xff] }
  0xb2   : > { %3399 = vmatpush3.bf16.msra.mxu0 %v3396_v15  ;;  %v409_v15 = vld [vmem:[%s4380_s27 + $0x80] sm:$0xff]  ;;  %v817_v17 = vld [vmem:[%s4388_s26 + $0x68] sm:$0xff]  ;;  %v834_v18 = vld [vmem:[%s4388_s26 + $0xf0] sm:$0xff] }
  0xb3   : > { %3401 = vmatprep.subr.bf16.mxu0 %v3400_v21  ;;  %v835_v19 = vld [vmem:[%s4388_s26 + $0xf8] sm:$0xff]  ;;  %v410_v20 = vld [vmem:[%s4380_s27 + $0x88] sm:$0xff]  ;;  %v411_v22 = vld [vmem:[%s4380_s27 + $0x90] sm:$0xff] }
  0xb4   : > { %v3440_v23 = vpack.c.bf16 %v835_v19, %v834_v18  ;;  %v412_v24 = vld [vmem:[%s4380_s27 + $0x98] sm:$0xff]  ;;  %v413_v25 = vld [vmem:[%s4380_s27 + $0xa0] sm:$0xff]  ;;  %v818_v26 = vld [vmem:[%s4388_s26 + $0x70] sm:$0xff] }
  0xb5   : > { %v819_v27 = vld [vmem:[%s4388_s26 + $0x78] sm:$0xff]  ;;  %v414_v28 = vld [vmem:[%s4380_s27 + $0xa8] sm:$0xff]  ;;  %v417_v32 = vld [vmem:[%s4380_s27 + $0xc0] sm:$0xff] }
  0xb6   : > { %3403 = vmatpush3.bf16.msra.mxu0 %v3400_v21  ;;  %v3438_v21 = vpack.c.bf16 %v817_v17, %v816_v16  ;;  %v3442_v29 = vpack.c.bf16 %v819_v27, %v818_v26  ;;  %v416_v31 = vld [vmem:[%s4380_s27 + $0xb8] sm:$0xff]  ;;  %v418_v33 = vld [vmem:[%s4380_s27 + $0xc8] sm:$0xff]  ;;  %v419_v34 = vld [vmem:[%s4380_s27 + $0xd0] sm:$0xff] }
  0xb7   : > { %3405 = vmatprep.subr.bf16.mxu0 %v3404_v30  ;;  %3423 = vmatpush3.bf16.xpose.msra.mxu1 %v3422_v45  ;;  %v420_v35 = vld [vmem:[%s4380_s27 + $0xd8] sm:$0xff]  ;;  %v421_v36 = vld [vmem:[%s4380_s27 + $0xe0] sm:$0xff]  ;;  %v422_v37 = vld [vmem:[%s4380_s27 + $0xe8] sm:$0xff] }
  0xb8   : > { %3425 = vmatprep.subr.bf16.mxu1 %v3424_v47  ;;  %v424_v39 = vld [vmem:[%s4380_s27 + $0xf8] sm:$0xff]  ;;  %v4468_v40 = vld [vmem:[%s5863_s4] ss:$0 sm:$0xff] }
  0xba   : > { %3407 = vmatpush3.bf16.msra.mxu0 %v3404_v30  ;;  %v415_v30 = vld [vmem:[%s4380_s27 + $0xb0] sm:$0xff] }
  0xbb   : > { %3409 = vmatprep.subr.bf16.mxu0 %v3408_v38 }
  0xbe   : > { %3411 = vmatpush3.bf16.msra.mxu0 %v3408_v38  ;;  %v423_v38 = vld [vmem:[%s4380_s27 + $0xf0] sm:$0xff] }
  0xbf   : > { %3427 = vmatpush3.bf16.xpose.msra.mxu1 %v3426_v55 }
  0xc0   : > { %3429 = vmatprep.subr.bf16.mxu1 %v3428_v57 }
  0xc1   : > { %3333 = vmatmul.mubr.f32.vlgmr.msra.gmra.mrb[0].mxu0 %v394_v44 }
  0xc2   : > { %3335 = vmatprep.mubr.f32.mxu0 %v395_v46 }
  0xc5   : > { %3336 = vmatmul.mubr.f32.gmra.mrb[2].mxu0 %v396_v48 }
  0xc6   : > { %3338 = vmatprep.mubr.f32.mxu0 %v397_v49 }
  0xc7   : > { %3431 = vmatpush3.bf16.xpose.msra.mxu1 %v3430_v1 }
  0xc8   : > { %3433 = vmatprep.subr.bf16.mxu1 %v3432_v3 }
  0xc9   : > { %3339 = vmatmul.mubr.f32.gmra.mrb[4].mxu0 %v398_v54 }
  0xca   : > { %3341 = vmatprep.mubr.f32.mxu0 %v399_v56 }
  0xcd   : > { %3342 = vmatmul.mubr.f32.gmra.mrb[6].mxu0 %v400_v58 }
  0xce   : > { %3344 = vmatprep.mubr.f32.mxu0 %v401_v59 }
  0xcf   : > { %3435 = vmatpush3.bf16.xpose.msra.mxu1 %v3434_v11 }
  0xd0   : > { %3437 = vmatprep.subr.bf16.mxu1 %v3436_v13 }
  0xd1   : > { %3345 = vmatmul.mubr.f32.gmra.mrb[8].mxu0 %v402_v0 }
  0xd2   : > { %3347 = vmatprep.mubr.f32.mxu0 %v403_v2 }
  0xd5   : > { %3348 = vmatmul.mubr.f32.gmra.mrb[10].mxu0 %v404_v4 }
  0xd6   : > { %3350 = vmatprep.mubr.f32.mxu0 %v405_v5 }
  0xd7   : > { %3439 = vmatpush3.bf16.xpose.msra.mxu1 %v3438_v21 }
  0xd8   : > { %3441 = vmatprep.subr.bf16.mxu1 %v3440_v23 }
  0xd9   : > { %3351 = vmatmul.mubr.f32.gmra.mrb[12].mxu0 %v406_v10 }
  0xda   : > { %3353 = vmatprep.mubr.f32.mxu0 %v407_v12 }
  0xdd   : > { %3354 = vmatmul.mubr.f32.gmra.mrb[14].mxu0 %v408_v14 }
  0xde   : > { %3356 = vmatprep.mubr.f32.mxu0 %v409_v15 }
  0xdf   : > { %3443 = vmatpush3.bf16.xpose.msra.mxu1 %v3442_v29 }
  0xe1   : > { %3357 = vmatmul.mubr.f32.gmra.mrb[16].mxu0 %v410_v20 }
  0xe2   : > { %3359 = vmatprep.mubr.f32.mxu0 %v411_v22 }
  0xe5   : > { %3360 = vmatmul.mubr.f32.gmra.mrb[18].mxu0 %v412_v24 }
  0xe6   : > { %3362 = vmatprep.mubr.f32.mxu0 %v413_v25 }
  0xe9   : > { %3363 = vmatmul.mubr.f32.gmra.mrb[20].mxu0 %v414_v28 }
  0xea   : > { %3365 = vmatprep.mubr.f32.mxu0 %v415_v30 }
  0xed   : > { %3366 = vmatmul.mubr.f32.gmra.mrb[22].mxu0 %v416_v31 }
  0xee   : > { %3368 = vmatprep.mubr.f32.mxu0 %v417_v32 }
  0xf1   : > { %3369 = vmatmul.mubr.f32.gmra.mrb[24].mxu0 %v418_v33 }
  0xf2   : > { %3371 = vmatprep.mubr.f32.mxu0 %v419_v34 }
  0xf5   : > { %3372 = vmatmul.mubr.f32.gmra.mrb[26].mxu0 %v420_v35 }
  0xf6   : > { %3374 = vmatprep.mubr.f32.mxu0 %v421_v36 }
  0xf9   : > { %3375 = vmatmul.mubr.f32.gmra.mrb[28].mxu0 %v422_v37 }
  0xfa   : > { %3377 = vmatprep.mubr.f32.mxu0 %v423_v38 }
  0xfd   : > { %3378 = vmatmul.mubr.f32.gmra.mrb[30].mxu0 %v424_v39 }
 0x194   : > { %v3334_v41 = vpop.f32.mrb[0].mxu0 }
 0x195   : > { %v514_v42 = vpop.f32.mrb[1].mxu0  ;;  %v520_v44 = vadd.f32 %v3334_v41, %v4468_v40 }
 0x196   : > { %v515_v43 = vadd.f32 %v4468_v40, %v514_v42 }
 0x198   : > { %3236 = vmatprep.mubr.f32.mxu1 %v515_v43  ;;  %v3337_v45 = vpop.f32.mrb[2].mxu0 }
 0x199   : > { %3237 = vmatmul.mubr.f32.vlgmr.msra.gmra.mrb[0].mxu1 %v515_v43  ;;  %v524_v46 = vpop.f32.mrb[3].mxu0  ;;  %v530_v50 = vadd.f32 %v3337_v45, %v4468_v40  ;;  %v4089_v43 = vmov -inf  }
 0x19a   : > { %3238 = vmatprep.mubr.f32.mxu1 %v520_v44  ;;  %v525_v47 = vadd.f32 %v4468_v40, %v524_v46  ;;  %706 = vst.msk [vmem:[#allocation3] sm:$0xff] %vm705_vm0, %v4089_v43  ;;  %707 = vst.msk [vmem:[#allocation3 + $0x8] sm:$0xff] %vm705_vm0, %v4089_v43 }
 0x19b   : > { %708 = vst.msk [vmem:[#allocation3 + $0x10] sm:$0xff] %vm705_vm0, %v4089_v43  ;;  %709 = vst.msk [vmem:[#allocation3 + $0x18] sm:$0xff] %vm705_vm0, %v4089_v43 }
 0x19c   : > { %v3340_v48 = vpop.f32.mrb[4].mxu0  ;;  %710 = vst.msk [vmem:[#allocation3 + $0x20] sm:$0xff] %vm705_vm0, %v4089_v43  ;;  %711 = vst.msk [vmem:[#allocation3 + $0x28] sm:$0xff] %vm705_vm0, %v4089_v43 }
 0x19d   : > { %3239 = vmatmul.mubr.f32.gmra.mrb[2].mxu1 %v520_v44  ;;  %v534_v49 = vpop.f32.mrb[5].mxu0  ;;  %v540_v56 = vadd.f32 %v3340_v48, %v4468_v40  ;;  %712 = vst.msk [vmem:[#allocation3 + $0x30] sm:$0xff] %vm705_vm0, %v4089_v43  ;;  %713 = vst.msk [vmem:[#allocation3 + $0x38] sm:$0xff] %vm705_vm0, %v4089_v43 }
 0x19e   : > { %3240 = vmatprep.mubr.f32.mxu1 %v525_v47  ;;  %v535_v53 = vadd.f32 %v4468_v40, %v534_v49  ;;  %714 = vst.msk [vmem:[#allocation3 + $0x40] sm:$0xff] %vm705_vm0, %v4089_v43  ;;  %715 = vst.msk [vmem:[#allocation3 + $0x48] sm:$0xff] %vm705_vm0, %v4089_v43 }
 0x19f   : > { %716 = vst.msk [vmem:[#allocation3 + $0x50] sm:$0xff] %vm705_vm0, %v4089_v43  ;;  %717 = vst.msk [vmem:[#allocation3 + $0x58] sm:$0xff] %vm705_vm0, %v4089_v43 }
 0x1a0   : > { %v3343_v51 = vpop.f32.mrb[6].mxu0  ;;  %718 = vst.msk [vmem:[#allocation3 + $0x60] sm:$0xff] %vm705_vm0, %v4089_v43  ;;  %719 = vst.msk [vmem:[#allocation3 + $0x68] sm:$0xff] %vm705_vm0, %v4089_v43 }
 0x1a1   : > { %3241 = vmatmul.mubr.f32.gmra.mrb[4].mxu1 %v525_v47  ;;  %v544_v52 = vpop.f32.mrb[7].mxu0  ;;  %v550_v62 = vadd.f32 %v3343_v51, %v4468_v40  ;;  %720 = vst.msk [vmem:[#allocation3 + $0x70] sm:$0xff] %vm705_vm0, %v4089_v43  ;;  %721 = vst.msk [vmem:[#allocation3 + $0x78] sm:$0xff] %vm705_vm0, %v4089_v43 }
 0x1a2   : > { %3242 = vmatprep.mubr.f32.mxu1 %v530_v50  ;;  %v545_v59 = vadd.f32 %v4468_v40, %v544_v52  ;;  %722 = vst.msk [vmem:[#allocation3 + $0x80] sm:$0xff] %vm705_vm0, %v4089_v43  ;;  %723 = vst.msk [vmem:[#allocation3 + $0x88] sm:$0xff] %vm705_vm0, %v4089_v43 }
 0x1a3   : > { %724 = vst.msk [vmem:[#allocation3 + $0x90] sm:$0xff] %vm705_vm0, %v4089_v43  ;;  %725 = vst.msk [vmem:[#allocation3 + $0x98] sm:$0xff] %vm705_vm0, %v4089_v43 }
 0x1a4   : > { %v3346_v54 = vpop.f32.mrb[8].mxu0  ;;  %726 = vst.msk [vmem:[#allocation3 + $0xa0] sm:$0xff] %vm705_vm0, %v4089_v43  ;;  %727 = vst.msk [vmem:[#allocation3 + $0xa8] sm:$0xff] %vm705_vm0, %v4089_v43 }
 0x1a5   : > { %3243 = vmatmul.mubr.f32.gmra.mrb[6].mxu1 %v530_v50  ;;  %v554_v55 = vpop.f32.mrb[9].mxu0  ;;  %v560_v5 = vadd.f32 %v3346_v54, %v4468_v40  ;;  %728 = vst.msk [vmem:[#allocation3 + $0xb0] sm:$0xff] %vm705_vm0, %v4089_v43  ;;  %729 = vst.msk [vmem:[#allocation3 + $0xb8] sm:$0xff] %vm705_vm0, %v4089_v43 }
 0x1a6   : > { %3244 = vmatprep.mubr.f32.mxu1 %v535_v53  ;;  %v555_v1 = vadd.f32 %v4468_v40, %v554_v55  ;;  %730 = vst.msk [vmem:[#allocation3 + $0xc0] sm:$0xff] %vm705_vm0, %v4089_v43  ;;  %731 = vst.msk [vmem:[#allocation3 + $0xc8] sm:$0xff] %vm705_vm0, %v4089_v43 }
 0x1a7   : > { %732 = vst.msk [vmem:[#allocation3 + $0xd0] sm:$0xff] %vm705_vm0, %v4089_v43  ;;  %733 = vst.msk [vmem:[#allocation3 + $0xd8] sm:$0xff] %vm705_vm0, %v4089_v43 }
 0x1a8   : > { %v3349_v57 = vpop.f32.mrb[10].mxu0  ;;  %734 = vst.msk [vmem:[#allocation3 + $0xe0] sm:$0xff] %vm705_vm0, %v4089_v43  ;;  %735 = vst.msk [vmem:[#allocation3 + $0xe8] sm:$0xff] %vm705_vm0, %v4089_v43 }
 0x1a9   : > { %3245 = vmatmul.mubr.f32.gmra.mrb[8].mxu1 %v535_v53  ;;  %v564_v58 = vpop.f32.mrb[11].mxu0  ;;  %v570_v15 = vadd.f32 %v3349_v57, %v4468_v40  ;;  %736 = vst.msk [vmem:[#allocation3 + $0xf0] sm:$0xff] %vm705_vm0, %v4089_v43  ;;  %737 = vst.msk [vmem:[#allocation3 + $0xf8] sm:$0xff] %vm705_vm0, %v4089_v43  ;;  %v4090_v57 = vmov 0  }
 0x1aa   : > { %3246 = vmatprep.mubr.f32.mxu1 %v540_v56  ;;  %v565_v9 = vadd.f32 %v4468_v40, %v564_v58  ;;  %3615 = vset.pattern.permute.xlu0 %v4090_v57 }
 0x1ab   : > { %3616 = vset.pattern.permute.xlu1 %v4090_v57 }
 0x1ac   : > { %v3352_v60 = vpop.f32.mrb[12].mxu0 }
 0x1ad   : > { %3247 = vmatmul.mubr.f32.gmra.mrb[10].mxu1 %v540_v56  ;;  %v574_v61 = vpop.f32.mrb[13].mxu0  ;;  %v580_v25 = vadd.f32 %v3352_v60, %v4468_v40 }
 0x1ae   : > { %3248 = vmatprep.mubr.f32.mxu1 %v545_v59  ;;  %v575_v19 = vadd.f32 %v4468_v40, %v574_v61 }
 0x1b0   : > { %v3355_v63 = vpop.f32.mrb[14].mxu0 }
 0x1b1   : > { %3249 = vmatmul.mubr.f32.gmra.mrb[12].mxu1 %v545_v59  ;;  %v584_v0 = vpop.f32.mrb[15].mxu0  ;;  %v590_v35 = vadd.f32 %v3355_v63, %v4468_v40 }
 0x1b2   : > { %3250 = vmatprep.mubr.f32.mxu1 %v550_v62  ;;  %v585_v29 = vadd.f32 %v4468_v40, %v584_v0 }
 0x1b4   : > { %v3358_v2 = vpop.f32.mrb[16].mxu0 }
 0x1b5   : > { %3251 = vmatmul.mubr.f32.gmra.mrb[14].mxu1 %v550_v62  ;;  %v600_v3 = vadd.f32 %v3358_v2, %v4468_v40  ;;  %v594_v4 = vpop.f32.mrb[17].mxu0  ;;  %v4091_v2 = vmov 0.0  }
 0x1b6   : > { %3252 = vmatprep.mubr.f32.mxu1 %v555_v1  ;;  %v595_v39 = vadd.f32 %v4468_v40, %v594_v4  ;;  %739 = vst.msk [vmem:[#allocation4 + $0x8] sm:$0xff] %vm705_vm0, %v4091_v2  ;;  %738 = vst.msk [vmem:[#allocation4] sm:$0xff] %vm705_vm0, %v4091_v2 }
 0x1b7   : > { %740 = vst.msk [vmem:[#allocation4 + $0x10] sm:$0xff] %vm705_vm0, %v4091_v2  ;;  %741 = vst.msk [vmem:[#allocation4 + $0x18] sm:$0xff] %vm705_vm0, %v4091_v2 }
 0x1b8   : > { %v3361_v6 = vpop.f32.mrb[18].mxu0  ;;  %742 = vst.msk [vmem:[#allocation4 + $0x20] sm:$0xff] %vm705_vm0, %v4091_v2  ;;  %743 = vst.msk [vmem:[#allocation4 + $0x28] sm:$0xff] %vm705_vm0, %v4091_v2 }
 0x1b9   : > { %3253 = vmatmul.mubr.f32.gmra.mrb[16].mxu1 %v555_v1  ;;  %v610_v7 = vadd.f32 %v3361_v6, %v4468_v40  ;;  %v604_v8 = vpop.f32.mrb[19].mxu0  ;;  %744 = vst.msk [vmem:[#allocation4 + $0x30] sm:$0xff] %vm705_vm0, %v4091_v2  ;;  %745 = vst.msk [vmem:[#allocation4 + $0x38] sm:$0xff] %vm705_vm0, %v4091_v2 }
 0x1ba   : > { %3254 = vmatprep.mubr.f32.mxu1 %v560_v5  ;;  %v605_v10 = vadd.f32 %v4468_v40, %v604_v8  ;;  %746 = vst.msk [vmem:[#allocation4 + $0x40] sm:$0xff] %vm705_vm0, %v4091_v2  ;;  %747 = vst.msk [vmem:[#allocation4 + $0x48] sm:$0xff] %vm705_vm0, %v4091_v2 }
 0x1bb   : > { %748 = vst.msk [vmem:[#allocation4 + $0x50] sm:$0xff] %vm705_vm0, %v4091_v2  ;;  %749 = vst.msk [vmem:[#allocation4 + $0x58] sm:$0xff] %vm705_vm0, %v4091_v2 }
 0x1bc   : > { %v3364_v11 = vpop.f32.mrb[20].mxu0  ;;  %750 = vst.msk [vmem:[#allocation4 + $0x60] sm:$0xff] %vm705_vm0, %v4091_v2  ;;  %751 = vst.msk [vmem:[#allocation4 + $0x68] sm:$0xff] %vm705_vm0, %v4091_v2 }
 0x1bd   : > { %3255 = vmatmul.mubr.f32.gmra.mrb[18].mxu1 %v560_v5  ;;  %v620_v12 = vadd.f32 %v3364_v11, %v4468_v40  ;;  %v614_v13 = vpop.f32.mrb[21].mxu0  ;;  %752 = vst.msk [vmem:[#allocation4 + $0x70] sm:$0xff] %vm705_vm0, %v4091_v2  ;;  %753 = vst.msk [vmem:[#allocation4 + $0x78] sm:$0xff] %vm705_vm0, %v4091_v2 }
 0x1be   : > { %3256 = vmatprep.mubr.f32.mxu1 %v565_v9  ;;  %v615_v14 = vadd.f32 %v4468_v40, %v614_v13  ;;  %754 = vst.msk [vmem:[#allocation4 + $0x80] sm:$0xff] %vm705_vm0, %v4091_v2  ;;  %755 = vst.msk [vmem:[#allocation4 + $0x88] sm:$0xff] %vm705_vm0, %v4091_v2 }
 0x1bf   : > { %756 = vst.msk [vmem:[#allocation4 + $0x90] sm:$0xff] %vm705_vm0, %v4091_v2  ;;  %757 = vst.msk [vmem:[#allocation4 + $0x98] sm:$0xff] %vm705_vm0, %v4091_v2 }
 0x1c0   : > { %v3367_v16 = vpop.f32.mrb[22].mxu0  ;;  %758 = vst.msk [vmem:[#allocation4 + $0xa0] sm:$0xff] %vm705_vm0, %v4091_v2  ;;  %759 = vst.msk [vmem:[#allocation4 + $0xa8] sm:$0xff] %vm705_vm0, %v4091_v2 }
 0x1c1   : > { %3257 = vmatmul.mubr.f32.gmra.mrb[20].mxu1 %v565_v9  ;;  %v630_v17 = vadd.f32 %v3367_v16, %v4468_v40  ;;  %v624_v18 = vpop.f32.mrb[23].mxu0  ;;  %760 = vst.msk [vmem:[#allocation4 + $0xb0] sm:$0xff] %vm705_vm0, %v4091_v2  ;;  %761 = vst.msk [vmem:[#allocation4 + $0xb8] sm:$0xff] %vm705_vm0, %v4091_v2 }
 0x1c2   : > { %3258 = vmatprep.mubr.f32.mxu1 %v570_v15  ;;  %v625_v20 = vadd.f32 %v4468_v40, %v624_v18  ;;  %762 = vst.msk [vmem:[#allocation4 + $0xc0] sm:$0xff] %vm705_vm0, %v4091_v2  ;;  %763 = vst.msk [vmem:[#allocation4 + $0xc8] sm:$0xff] %vm705_vm0, %v4091_v2 }
 0x1c3   : > { %764 = vst.msk [vmem:[#allocation4 + $0xd0] sm:$0xff] %vm705_vm0, %v4091_v2  ;;  %765 = vst.msk [vmem:[#allocation4 + $0xd8] sm:$0xff] %vm705_vm0, %v4091_v2 }
 0x1c4   : > { %v3370_v21 = vpop.f32.mrb[24].mxu0  ;;  %766 = vst.msk [vmem:[#allocation4 + $0xe0] sm:$0xff] %vm705_vm0, %v4091_v2  ;;  %767 = vst.msk [vmem:[#allocation4 + $0xe8] sm:$0xff] %vm705_vm0, %v4091_v2 }
 0x1c5   : > { %3259 = vmatmul.mubr.f32.gmra.mrb[22].mxu1 %v570_v15  ;;  %v640_v22 = vadd.f32 %v3370_v21, %v4468_v40  ;;  %v634_v23 = vpop.f32.mrb[25].mxu0  ;;  %768 = vst.msk [vmem:[#allocation4 + $0xf0] sm:$0xff] %vm705_vm0, %v4091_v2  ;;  %769 = vst.msk [vmem:[#allocation4 + $0xf8] sm:$0xff] %vm705_vm0, %v4091_v2 }
 0x1c6   : > { %3260 = vmatprep.mubr.f32.mxu1 %v575_v19  ;;  %v635_v24 = vadd.f32 %v4468_v40, %v634_v23 }
 0x1c8   : > { %v3373_v26 = vpop.f32.mrb[26].mxu0 }
 0x1c9   : > { %3261 = vmatmul.mubr.f32.gmra.mrb[24].mxu1 %v575_v19  ;;  %v650_v27 = vadd.f32 %v3373_v26, %v4468_v40  ;;  %v644_v28 = vpop.f32.mrb[27].mxu0 }
 0x1ca   : > { %3262 = vmatprep.mubr.f32.mxu1 %v580_v25  ;;  %v645_v30 = vadd.f32 %v4468_v40, %v644_v28 }
 0x1cc   : > { %v3376_v31 = vpop.f32.mrb[28].mxu0 }
 0x1cd   : > { %3263 = vmatmul.mubr.f32.gmra.mrb[26].mxu1 %v580_v25  ;;  %v660_v32 = vadd.f32 %v3376_v31, %v4468_v40  ;;  %v654_v33 = vpop.f32.mrb[29].mxu0 }
 0x1ce   : > { %3264 = vmatprep.mubr.f32.mxu1 %v585_v29  ;;  %v655_v34 = vadd.f32 %v4468_v40, %v654_v33 }
 0x1d0   : > { %v3379_v36 = vpop.f32.mrb[30].mxu0 }
 0x1d1   : > { %3265 = vmatmul.mubr.f32.gmra.mrb[28].mxu1 %v585_v29  ;;  %v670_v37 = vadd.f32 %v3379_v36, %v4468_v40  ;;  %v664_v38 = vpop.f32.mrb[31].mxu0 }
 0x1d2   : > { %3266 = vmatprep.mubr.f32.mxu1 %v590_v35  ;;  %v665_v41 = vadd.f32 %v4468_v40, %v664_v38 }
 0x1d5   : > { %3267 = vmatmul.mubr.f32.gmra.mrb[30].mxu1 %v590_v35 }
 0x1d6   : > { %3268 = vmatprep.mubr.f32.mxu1 %v595_v39 }
 0x1d9   : > { %3269 = vmatmul.mubr.f32.gmra.mrb[32].mxu1 %v595_v39 }
 0x1da   : > { %3270 = vmatprep.mubr.f32.mxu1 %v600_v3 }
 0x1dd   : > { %3271 = vmatmul.mubr.f32.gmra.mrb[34].mxu1 %v600_v3 }
 0x1de   : > { %3272 = vmatprep.mubr.f32.mxu1 %v605_v10 }
 0x1e1   : > { %3273 = vmatmul.mubr.f32.gmra.mrb[36].mxu1 %v605_v10 }
 0x1e2   : > { %3274 = vmatprep.mubr.f32.mxu1 %v610_v7 }
 0x1e5   : > { %3275 = vmatmul.mubr.f32.gmra.mrb[38].mxu1 %v610_v7 }
 0x1e6   : > { %3276 = vmatprep.mubr.f32.mxu1 %v615_v14 }
 0x1e9   : > { %3277 = vmatmul.mubr.f32.gmra.mrb[40].mxu1 %v615_v14 }
 0x1ea   : > { %3278 = vmatprep.mubr.f32.mxu1 %v620_v12 }
 0x1ed   : > { %3279 = vmatmul.mubr.f32.gmra.mrb[42].mxu1 %v620_v12 }
 0x1ee   : > { %3280 = vmatprep.mubr.f32.mxu1 %v625_v20 }
 0x1f1   : > { %3281 = vmatmul.mubr.f32.gmra.mrb[44].mxu1 %v625_v20 }
 0x1f2   : > { %3282 = vmatprep.mubr.f32.mxu1 %v630_v17 }
 0x1f5   : > { %3283 = vmatmul.mubr.f32.gmra.mrb[46].mxu1 %v630_v17 }
 0x1f6   : > { %3284 = vmatprep.mubr.f32.mxu1 %v635_v24 }
 0x1f9   : > { %3285 = vmatmul.mubr.f32.gmra.mrb[48].mxu1 %v635_v24 }
 0x1fa   : > { %3286 = vmatprep.mubr.f32.mxu1 %v640_v22 }
 0x1fd   : > { %3287 = vmatmul.mubr.f32.gmra.mrb[50].mxu1 %v640_v22 }
 0x1fe   : > { %3288 = vmatprep.mubr.f32.mxu1 %v645_v30 }
 0x201   : > { %3289 = vmatmul.mubr.f32.gmra.mrb[52].mxu1 %v645_v30 }
 0x202   : > { %3290 = vmatprep.mubr.f32.mxu1 %v650_v27 }
 0x205   : > { %3291 = vmatmul.mubr.f32.gmra.mrb[54].mxu1 %v650_v27 }
 0x206   : > { %3292 = vmatprep.mubr.f32.mxu1 %v655_v34 }
 0x209   : > { %3293 = vmatmul.mubr.f32.gmra.mrb[56].mxu1 %v655_v34 }
 0x20a   : > { %3294 = vmatprep.mubr.f32.mxu1 %v660_v32 }
 0x20d   : > { %3295 = vmatmul.mubr.f32.gmra.mrb[58].mxu1 %v660_v32 }
 0x20e   : > { %3296 = vmatprep.mubr.f32.mxu1 %v665_v41 }
 0x211   : > { %3297 = vmatmul.mubr.f32.gmra.mrb[60].mxu1 %v665_v41 }
 0x212   : > { %3298 = vmatprep.mubr.f32.mxu1 %v670_v37 }
 0x215   : > { %3299 = vmatmul.mubr.f32.gmra.mrb[62].mxu1 %v670_v37 }
 0x26c   : > { %v4502_v40 = vpop.f32.mrb[0].mxu1 }
 0x26d   : > { %v4504_v42 = vpop.f32.mrb[1].mxu1 }
 0x26e   : > { %v1190_v44 = vmax.f32 %v4502_v40, %v4504_v42 }
 0x270   : > { %1191 = vmax.xlane.f32.xlu0 %v1190_v44  ;;  %v4540_v45 = vpop.f32.mrb[2].mxu1 }
 0x271   : > { %v4542_v46 = vpop.f32.mrb[3].mxu1 }
 0x272   : > { %v1193_v47 = vmax.f32 %v4540_v45, %v4542_v46 }
 0x274   : > { %1194 = vmax.xlane.f32.xlu0 %v1193_v47  ;;  %v4546_v48 = vpop.f32.mrb[4].mxu1 }
 0x275   : > { %v4548_v49 = vpop.f32.mrb[5].mxu1 }
 0x276   : > { %v1196_v50 = vmax.f32 %v4546_v48, %v4548_v49 }
 0x278   : > { %1197 = vmax.xlane.f32.xlu1 %v1196_v50  ;;  %v4552_v51 = vpop.f32.mrb[6].mxu1 }
 0x279   : > { %v4554_v52 = vpop.f32.mrb[7].mxu1 }
 0x27a   : > { %v1199_v53 = vmax.f32 %v4552_v51, %v4554_v52 }
 0x27c   : > { %1200 = vmax.xlane.f32.xlu1 %v1199_v53  ;;  %v4558_v54 = vpop.f32.mrb[8].mxu1 }
 0x27d   : > { %v4560_v55 = vpop.f32.mrb[9].mxu1 }
 0x27e   : > { %v1202_v56 = vmax.f32 %v4558_v54, %v4560_v55 }
 0x280   : > { %1203 = vmax.xlane.f32.xlu0 %v1202_v56  ;;  %v4564_v58 = vpop.f32.mrb[10].mxu1 }
 0x281   : > { %5981 = vst [vmem:[#allocation25_spill] sm:$0xff] %v4564_v58  ;;  %v4566_v59 = vpop.f32.mrb[11].mxu1 }
 0x282   : > { %5982 = vst [vmem:[#allocation26_spill] sm:$0xff] %v4566_v59  ;;  %v1205_v60 = vmax.f32 %v4564_v58, %v4566_v59  ;;  %v5081_v58 = vld [vmem:[#allocation3 + $0xd8] sm:$0xff] }
 0x284   : > { %1206 = vmax.xlane.f32.xlu1 %v1205_v60  ;;  %v4570_v61 = vpop.f32.mrb[12].mxu1 }
 0x285   : > { %5983 = vst [vmem:[#allocation27_spill] sm:$0xff] %v4570_v61  ;;  %v4572_v62 = vpop.f32.mrb[13].mxu1 }
 0x286   : > { %5984 = vst [vmem:[#allocation28_spill] sm:$0xff] %v4572_v62  ;;  %v1208_v63 = vmax.f32 %v4570_v61, %v4572_v62  ;;  %v5057_v61 = vld [vmem:[#allocation3 + $0xc0] sm:$0xff] }
 0x287   : > { %6038 = vst [vmem:[#allocation82_spill] sm:$0xff] %v5057_v61 }
 0x288   : > { %1209 = vmax.xlane.f32.xlu0 %v1208_v63  ;;  %v4576_v0 = vpop.f32.mrb[14].mxu1 }
 0x289   : > { %5985 = vst [vmem:[#allocation29_spill] sm:$0xff] %v4576_v0  ;;  %v4578_v1 = vpop.f32.mrb[15].mxu1 }
 0x28a   : > { %5986 = vst [vmem:[#allocation30_spill] sm:$0xff] %v4578_v1  ;;  %v1211_v3 = vmax.f32 %v4576_v0, %v4578_v1  ;;  %v5047_v0 = vld [vmem:[#allocation3 + $0xb8] sm:$0xff] }
 0x28b   : > { %6037 = vst [vmem:[#allocation81_spill] sm:$0xff] %v5047_v0 }
 0x28c   : > { %1212 = vmax.xlane.f32.xlu1 %v1211_v3  ;;  %v4614_v4 = vpop.f32.mrb[16].mxu1 }
 0x28d   : > { %5987 = vst [vmem:[#allocation31_spill] sm:$0xff] %v4614_v4  ;;  %v4616_v5 = vpop.f32.mrb[17].mxu1 }
 0x28e   : > { %5988 = vst [vmem:[#allocation32_spill] sm:$0xff] %v4616_v5  ;;  %v1214_v6 = vmax.f32 %v4614_v4, %v4616_v5  ;;  %v5037_v4 = vld [vmem:[#allocation3 + $0xb0] sm:$0xff] }
 0x28f   : > { %6035 = vst [vmem:[#allocation79_spill] sm:$0xff] %v5037_v4 }
 0x290   : > { %1215 = vmax.xlane.f32.xlu0 %v1214_v6  ;;  %v4620_v7 = vpop.f32.mrb[18].mxu1 }
 0x291   : > { %5989 = vst [vmem:[#allocation33_spill] sm:$0xff] %v4620_v7  ;;  %v4622_v8 = vpop.f32.mrb[19].mxu1 }
 0x292   : > { %5990 = vst [vmem:[#allocation34_spill] sm:$0xff] %v4622_v8  ;;  %v1217_v9 = vmax.f32 %v4620_v7, %v4622_v8  ;;  %v5027_v7 = vld [vmem:[#allocation3 + $0xa8] sm:$0xff] }
 0x294   : > { %1218 = vmax.xlane.f32.xlu1 %v1217_v9  ;;  %v4626_v10 = vpop.f32.mrb[20].mxu1 }
 0x295   : > { %5991 = vst [vmem:[#allocation35_spill] sm:$0xff] %v4626_v10  ;;  %v4628_v11 = vpop.f32.mrb[21].mxu1 }
 0x296   : > { %5992 = vst [vmem:[#allocation36_spill] sm:$0xff] %v4628_v11  ;;  %v1220_v12 = vmax.f32 %v4626_v10, %v4628_v11  ;;  %v5017_v10 = vld [vmem:[#allocation3 + $0xa0] sm:$0xff] }
 0x298   : > { %1221 = vmax.xlane.f32.xlu0 %v1220_v12  ;;  %v4632_v13 = vpop.f32.mrb[22].mxu1 }
 0x299   : > { %5993 = vst [vmem:[#allocation37_spill] sm:$0xff] %v4632_v13  ;;  %v4634_v14 = vpop.f32.mrb[23].mxu1 }
 0x29a   : > { %5994 = vst [vmem:[#allocation38_spill] sm:$0xff] %v4634_v14  ;;  %v1223_v15 = vmax.f32 %v4632_v13, %v4634_v14  ;;  %v5007_v13 = vld [vmem:[#allocation3 + $0x98] sm:$0xff] }
 0x29c   : > { %1224 = vmax.xlane.f32.xlu1 %v1223_v15  ;;  %v4638_v16 = vpop.f32.mrb[24].mxu1  ;;  %v837_v15 = vld [vmem:[%s4395_s8] sm:$0xff] }
 0x29d   : > { %5995 = vst [vmem:[#allocation39_spill] sm:$0xff] %v4638_v16  ;;  %v4640_v17 = vpop.f32.mrb[25].mxu1 }
 0x29e   : > { %5996 = vst [vmem:[#allocation40_spill] sm:$0xff] %v4640_v17  ;;  %v1226_v18 = vmax.f32 %v4638_v16, %v4640_v17  ;;  %v4997_v16 = vld [vmem:[#allocation3 + $0x90] sm:$0xff] }
 0x2a0   : > { %1227 = vmax.xlane.f32.xlu0 %v1226_v18  ;;  %v4644_v19 = vpop.f32.mrb[26].mxu1  ;;  %v838_v18 = vld [vmem:[%s4395_s8 + $0x8] sm:$0xff] }
 0x2a1   : > { %5997 = vst [vmem:[#allocation41_spill] sm:$0xff] %v4644_v19  ;;  %v4646_v20 = vpop.f32.mrb[27].mxu1 }
 0x2a2   : > { %5998 = vst [vmem:[#allocation42_spill] sm:$0xff] %v4646_v20  ;;  %v1229_v21 = vmax.f32 %v4644_v19, %v4646_v20  ;;  %v4987_v19 = vld [vmem:[#allocation3 + $0x88] sm:$0xff] }
 0x2a4   : > { %1230 = vmax.xlane.f32.xlu1 %v1229_v21  ;;  %v4650_v22 = vpop.f32.mrb[28].mxu1  ;;  %v3445_v21 = vpack.c.bf16 %v838_v18, %v837_v15  ;;  %v842_v15 = vld [vmem:[%s4395_s8 + $0x28] sm:$0xff] }
 0x2a5   : > { %5999 = vst [vmem:[#allocation43_spill] sm:$0xff] %v4650_v22  ;;  %v4652_v23 = vpop.f32.mrb[29].mxu1 }
 0x2a6   : > { %6000 = vst [vmem:[#allocation44_spill] sm:$0xff] %v4652_v23  ;;  %v1232_v24 = vmax.f32 %v4650_v22, %v4652_v23  ;;  %v4977_v22 = vld [vmem:[#allocation3 + $0x80] sm:$0xff] }
 0x2a8   : > { %1233 = vmax.xlane.f32.xlu0 %v1232_v24  ;;  %v4656_v25 = vpop.f32.mrb[30].mxu1 }
 0x2a9   : > { %6001 = vst [vmem:[#allocation45_spill] sm:$0xff] %v4656_v25  ;;  %v4658_v26 = vpop.f32.mrb[31].mxu1 }
 0x2aa   : > { %6002 = vst [vmem:[#allocation46_spill] sm:$0xff] %v4658_v26  ;;  %v1235_v27 = vmax.f32 %v4656_v25, %v4658_v26  ;;  %v4967_v25 = vld [vmem:[#allocation3 + $0x78] sm:$0xff] }
 0x2ac   : > { %1236 = vmax.xlane.f32.xlu1 %v1235_v27  ;;  %v4662_v28 = vpop.f32.mrb[32].mxu1  ;;  %v4092_v27 = vmov 0.0|0.0  }
 0x2ad   : > { %6003 = vst [vmem:[#allocation47_spill] sm:$0xff] %v4662_v28  ;;  %v4664_v29 = vpop.f32.mrb[33].mxu1  ;;  %3444 = vmatprep.subr.bf16.mxu0 %v4092_v27  ;;  %3492 = vmatprep.subr.bf16.mxu1 %v4092_v27 }
 0x2ae   : > { %6004 = vst [vmem:[#allocation48_spill] sm:$0xff] %v4664_v29  ;;  %v1238_v30 = vmax.f32 %v4662_v28, %v4664_v29  ;;  %3446 = vmatpush1.bf16.msra.mxu0 %v3445_v21  ;;  %3508 = vmatpush1.bf16.msra.mxu1 %v3445_v21  ;;  %v4957_v28 = vld [vmem:[#allocation3 + $0x70] sm:$0xff] }
 0x2af   : > { %3447 = vmatprep.subr.bf16.mxu0 %v4092_v27  ;;  %3493 = vmatprep.subr.bf16.mxu1 %v4092_v27 }
 0x2b0   : > { %1239 = vmax.xlane.f32.xlu0 %v1238_v30  ;;  %v4668_v31 = vpop.f32.mrb[34].mxu1 }
 0x2b1   : > { %6005 = vst [vmem:[#allocation49_spill] sm:$0xff] %v4668_v31  ;;  %v4670_v32 = vpop.f32.mrb[35].mxu1 }
 0x2b2   : > { %6006 = vst [vmem:[#allocation50_spill] sm:$0xff] %v4670_v32  ;;  %v1241_v33 = vmax.f32 %v4668_v31, %v4670_v32  ;;  %v4947_v31 = vld [vmem:[#allocation3 + $0x68] sm:$0xff] }
 0x2b4   : > { %1242 = vmax.xlane.f32.xlu1 %v1241_v33  ;;  %v4674_v34 = vpop.f32.mrb[36].mxu1 }
 0x2b5   : > { %6007 = vst [vmem:[#allocation51_spill] sm:$0xff] %v4674_v34  ;;  %v4676_v35 = vpop.f32.mrb[37].mxu1 }
 0x2b6   : > { %6008 = vst [vmem:[#allocation52_spill] sm:$0xff] %v4676_v35  ;;  %v1244_v36 = vmax.f32 %v4674_v34, %v4676_v35  ;;  %v4937_v34 = vld [vmem:[#allocation3 + $0x60] sm:$0xff] }
 0x2b8   : > { %1245 = vmax.xlane.f32.xlu0 %v1244_v36  ;;  %v4680_v37 = vpop.f32.mrb[38].mxu1  ;;  %v839_v36 = vld [vmem:[%s4395_s8 + $0x10] sm:$0xff] }
 0x2b9   : > { %6009 = vst [vmem:[#allocation53_spill] sm:$0xff] %v4680_v37  ;;  %v4682_v38 = vpop.f32.mrb[39].mxu1 }
 0x2ba   : > { %6010 = vst [vmem:[#allocation54_spill] sm:$0xff] %v4682_v38  ;;  %v1247_v39 = vmax.f32 %v4680_v37, %v4682_v38  ;;  %v4927_v37 = vld [vmem:[#allocation3 + $0x58] sm:$0xff] }
 0x2bc   : > { %1248 = vmax.xlane.f32.xlu1 %v1247_v39  ;;  %v4686_v41 = vpop.f32.mrb[40].mxu1  ;;  %v840_v39 = vld [vmem:[%s4395_s8 + $0x18] sm:$0xff] }
 0x2bd   : > { %6011 = vst [vmem:[#allocation55_spill] sm:$0xff] %v4686_v41  ;;  %v4688_v43 = vpop.f32.mrb[41].mxu1 }
 0x2be   : > { %6012 = vst [vmem:[#allocation56_spill] sm:$0xff] %v4688_v43  ;;  %v1250_v44 = vmax.f32 %v4686_v41, %v4688_v43  ;;  %v4917_v41 = vld [vmem:[#allocation3 + $0x50] sm:$0xff] }
 0x2c0   : > { %1251 = vmax.xlane.f32.xlu0 %v1250_v44  ;;  %v4692_v47 = vpop.f32.mrb[42].mxu1  ;;  %v3448_v44 = vpack.c.bf16 %v840_v39, %v839_v36  ;;  %v843_v39 = vld [vmem:[%s4395_s8 + $0x30] sm:$0xff] }
 0x2c1   : > { %6013 = vst [vmem:[#allocation57_spill] sm:$0xff] %v4692_v47  ;;  %v4694_v50 = vpop.f32.mrb[43].mxu1 }
 0x2c2   : > { %6014 = vst [vmem:[#allocation58_spill] sm:$0xff] %v4694_v50  ;;  %v1253_v53 = vmax.f32 %v4692_v47, %v4694_v50  ;;  %3449 = vmatpush1.bf16.msra.mxu0 %v3448_v44  ;;  %3509 = vmatpush1.bf16.msra.mxu1 %v3448_v44  ;;  %v4907_v47 = vld [vmem:[#allocation3 + $0x48] sm:$0xff] }
 0x2c3   : > { %3450 = vmatprep.subr.bf16.mxu0 %v4092_v27  ;;  %3494 = vmatprep.subr.bf16.mxu1 %v4092_v27 }
 0x2c4   : > { %1254 = vmax.xlane.f32.xlu1 %v1253_v53  ;;  %v4698_v56 = vpop.f32.mrb[44].mxu1 }
 0x2c5   : > { %6015 = vst [vmem:[#allocation59_spill] sm:$0xff] %v4698_v56  ;;  %v4700_v57 = vpop.f32.mrb[45].mxu1 }
 0x2c6   : > { %6016 = vst [vmem:[#allocation60_spill] sm:$0xff] %v4700_v57  ;;  %v1256_v60 = vmax.f32 %v4698_v56, %v4700_v57  ;;  %v4897_v56 = vld [vmem:[#allocation3 + $0x40] sm:$0xff] }
 0x2c8   : > { %1257 = vmax.xlane.f32.xlu0 %v1256_v60  ;;  %v4704_v63 = vpop.f32.mrb[46].mxu1 }
 0x2c9   : > { %6017 = vst [vmem:[#allocation61_spill] sm:$0xff] %v4704_v63  ;;  %v4706_v2 = vpop.f32.mrb[47].mxu1 }
 0x2ca   : > { %6018 = vst [vmem:[#allocation62_spill] sm:$0xff] %v4706_v2  ;;  %v1259_v3 = vmax.f32 %v4704_v63, %v4706_v2  ;;  %v868_v2 = vld [vmem:[%s4395_s8 + $0xf8] sm:$0xff] }
 0x2cc   : > { %1260 = vmax.xlane.f32.xlu1 %v1259_v3  ;;  %v4710_v6 = vpop.f32.mrb[48].mxu1 }
 0x2cd   : > { %6019 = vst [vmem:[#allocation63_spill] sm:$0xff] %v4710_v6  ;;  %v4712_v9 = vpop.f32.mrb[49].mxu1 }
 0x2ce   : > { %6020 = vst [vmem:[#allocation64_spill] sm:$0xff] %v4712_v9  ;;  %v1262_v12 = vmax.f32 %v4710_v6, %v4712_v9  ;;  %v867_v6 = vld [vmem:[%s4395_s8 + $0xf0] sm:$0xff] }
 0x2d0   : > { %1263 = vmax.xlane.f32.xlu0 %v1262_v12  ;;  %v4718_v24 = vpop.f32.mrb[50].mxu1  ;;  %v841_v12 = vld [vmem:[%s4395_s8 + $0x20] sm:$0xff] }
 0x2d1   : > { %6021 = vst [vmem:[#allocation65_spill] sm:$0xff] %v4718_v24  ;;  %v4721_v30 = vpop.f32.mrb[51].mxu1  ;;  %v3451_v18 = vpack.c.bf16 %v842_v15, %v841_v12 }
 0x2d2   : > { %6022 = vst [vmem:[#allocation66_spill] sm:$0xff] %v4721_v30  ;;  %v1265_v33 = vmax.f32 %v4718_v24, %v4721_v30  ;;  %v865_v24 = vld [vmem:[%s4395_s8 + $0xe0] sm:$0xff]  ;;  %v866_v30 = vld [vmem:[%s4395_s8 + $0xe8] sm:$0xff] }
 0x2d3   : > { %3452 = vmatpush1.bf16.msra.mxu0 %v3451_v18  ;;  %3510 = vmatpush1.bf16.msra.mxu1 %v3451_v18 }
 0x2d4   : > { %1266 = vmax.xlane.f32.xlu1 %v1265_v33  ;;  %v4730_v53 = vpop.f32.mrb[52].mxu1  ;;  %3453 = vmatprep.subr.bf16.mxu0 %v4092_v27 }
 0x2d5   : > { %6023 = vst [vmem:[#allocation67_spill] sm:$0xff] %v4730_v53  ;;  %v4732_v60 = vpop.f32.mrb[53].mxu1  ;;  %3495 = vmatprep.subr.bf16.mxu1 %v4092_v27 }
 0x2d6   : > { %6024 = vst [vmem:[#allocation68_spill] sm:$0xff] %v4732_v60  ;;  %v1268_v3 = vmax.f32 %v4730_v53, %v4732_v60  ;;  %v844_v60 = vld [vmem:[%s4395_s8 + $0x38] sm:$0xff]  ;;  %v863_v53 = vld [vmem:[%s4395_s8 + $0xd0] sm:$0xff] }
 0x2d7   : > { %v3454_v44 = vpack.c.bf16 %v844_v60, %v843_v39 }
 0x2d8   : > { %1269 = vmax.xlane.f32.xlu0 %v1268_v3  ;;  %v4740_v21 = vpop.f32.mrb[54].mxu1 }
 0x2d9   : > { %6025 = vst [vmem:[#allocation69_spill] sm:$0xff] %v4740_v21  ;;  %v4742_v33 = vpop.f32.mrb[55].mxu1  ;;  %3455 = vmatpush1.bf16.msra.mxu0 %v3454_v44  ;;  %3511 = vmatpush1.bf16.msra.mxu1 %v3454_v44 }
 0x2da   : > { %6026 = vst [vmem:[#allocation70_spill] sm:$0xff] %v4742_v33  ;;  %v1271_v36 = vmax.f32 %v4740_v21, %v4742_v33  ;;  %3456 = vmatprep.subr.bf16.mxu0 %v4092_v27  ;;  %v845_v33 = vld [vmem:[%s4395_s8 + $0x40] sm:$0xff]  ;;  %v846_v21 = vld [vmem:[%s4395_s8 + $0x48] sm:$0xff]  ;;  %3496 = vmatprep.subr.bf16.mxu1 %v4092_v27 }
 0x2db   : > { %v3457_v18 = vpack.c.bf16 %v846_v21, %v845_v33 }
 0x2dc   : > { %1272 = vmax.xlane.f32.xlu1 %v1271_v36  ;;  %v4750_v3 = vpop.f32.mrb[56].mxu1 }
 0x2dd   : > { %6027 = vst [vmem:[#allocation71_spill] sm:$0xff] %v4750_v3  ;;  %v4752_v12 = vpop.f32.mrb[57].mxu1  ;;  %3458 = vmatpush1.bf16.msra.mxu0 %v3457_v18  ;;  %3512 = vmatpush1.bf16.msra.mxu1 %v3457_v18 }
 0x2de   : > { %6028 = vst [vmem:[#allocation72_spill] sm:$0xff] %v4752_v12  ;;  %v1274_v15 = vmax.f32 %v4750_v3, %v4752_v12  ;;  %3459 = vmatprep.subr.bf16.mxu0 %v4092_v27  ;;  %v847_v12 = vld [vmem:[%s4395_s8 + $0x50] sm:$0xff]  ;;  %v848_v3 = vld [vmem:[%s4395_s8 + $0x58] sm:$0xff]  ;;  %3497 = vmatprep.subr.bf16.mxu1 %v4092_v27 }
 0x2df   : > { %v3460_v44 = vpack.c.bf16 %v848_v3, %v847_v12 }
 0x2e0   : > { %1275 = vmax.xlane.f32.xlu0 %v1274_v15  ;;  %v4760_v60 = vpop.f32.mrb[58].mxu1 }
 0x2e1   : > { %6029 = vst [vmem:[#allocation73_spill] sm:$0xff] %v4760_v60  ;;  %v4762_v36 = vpop.f32.mrb[59].mxu1  ;;  %3461 = vmatpush1.bf16.msra.mxu0 %v3460_v44  ;;  %3513 = vmatpush1.bf16.msra.mxu1 %v3460_v44  ;;  %v852_v44 = vld [vmem:[%s4395_s8 + $0x78] sm:$0xff] }
 0x2e2   : > { %6030 = vst [vmem:[#allocation74_spill] sm:$0xff] %v4762_v36  ;;  %v1277_v39 = vmax.f32 %v4760_v60, %v4762_v36  ;;  %3462 = vmatprep.subr.bf16.mxu0 %v4092_v27  ;;  %v849_v36 = vld [vmem:[%s4395_s8 + $0x60] sm:$0xff]  ;;  %v850_v60 = vld [vmem:[%s4395_s8 + $0x68] sm:$0xff]  ;;  %3498 = vmatprep.subr.bf16.mxu1 %v4092_v27 }
 0x2e3   : > { %v3463_v18 = vpack.c.bf16 %v850_v60, %v849_v36  ;;  %v853_v36 = vld [vmem:[%s4395_s8 + $0x80] sm:$0xff] }
 0x2e4   : > { %1278 = vmax.xlane.f32.xlu1 %v1277_v39  ;;  %v4770_v21 = vpop.f32.mrb[60].mxu1 }
 0x2e5   : > { %6031 = vst [vmem:[#allocation75_spill] sm:$0xff] %v4770_v21  ;;  %v4772_v33 = vpop.f32.mrb[61].mxu1  ;;  %3464 = vmatpush1.bf16.msra.mxu0 %v3463_v18  ;;  %3514 = vmatpush1.bf16.msra.mxu1 %v3463_v18  ;;  %v856_v18 = vld [vmem:[%s4395_s8 + $0x98] sm:$0xff] }
 0x2e6   : > { %6032 = vst [vmem:[#allocation76_spill] sm:$0xff] %v4772_v33  ;;  %v1280_v15 = vmax.f32 %v4770_v21, %v4772_v33  ;;  %3465 = vmatprep.subr.bf16.mxu0 %v4092_v27  ;;  %v851_v33 = vld [vmem:[%s4395_s8 + $0x70] sm:$0xff]  ;;  %3499 = vmatprep.subr.bf16.mxu1 %v4092_v27  ;;  %v862_v21 = vld [vmem:[%s4395_s8 + $0xc8] sm:$0xff] }
 0x2e7   : > { %v3466_v60 = vpack.c.bf16 %v852_v44, %v851_v33  ;;  %v855_v33 = vld [vmem:[%s4395_s8 + $0x90] sm:$0xff]  ;;  %v857_v44 = vld [vmem:[%s4395_s8 + $0xa0] sm:$0xff] }
 0x2e8   : > { %1281 = vmax.xlane.f32.xlu0 %v1280_v15  ;;  %v4780_v3 = vpop.f32.mrb[62].mxu1  ;;  %v854_v15 = vld [vmem:[%s4395_s8 + $0x88] sm:$0xff] }
 0x2e9   : > { %6033 = vst [vmem:[#allocation77_spill] sm:$0xff] %v4780_v3  ;;  %v4782_v12 = vpop.f32.mrb[63].mxu1  ;;  %3467 = vmatpush1.bf16.msra.mxu0 %v3466_v60  ;;  %3515 = vmatpush1.bf16.msra.mxu1 %v3466_v60 }
 0x2ea   : > { %6034 = vst [vmem:[#allocation78_spill] sm:$0xff] %v4782_v12  ;;  %v1283_v39 = vmax.f32 %v4780_v3, %v4782_v12  ;;  %3468 = vmatprep.subr.bf16.mxu0 %v4092_v27  ;;  %v3469_v12 = vpack.c.bf16 %v854_v15, %v853_v36  ;;  %3500 = vmatprep.subr.bf16.mxu1 %v4092_v27  ;;  %v858_v3 = vld [vmem:[%s4395_s8 + $0xa8] sm:$0xff]  ;;  %v859_v36 = vld [vmem:[%s4395_s8 + $0xb0] sm:$0xff]  ;;  %v860_v15 = vld [vmem:[%s4395_s8 + $0xb8] sm:$0xff] }
 0x2eb   : > { %v3475_v60 = vpack.c.bf16 %v858_v3, %v857_v44  ;;  %v4812_v3 = vld [vmem:[#allocation3 + $0x8] sm:$0xff]  ;;  %v861_v44 = vld [vmem:[%s4395_s8 + $0xc0] sm:$0xff] }
 0x2ec   : > { %1284 = vmax.xlane.f32.xlu1 %v1283_v39  ;;  %v3472_v39 = vpack.c.bf16 %v856_v18, %v855_v33  ;;  %v3478_v33 = vpack.c.bf16 %v860_v15, %v859_v36  ;;  %v3481_v36 = vpack.c.bf16 %v862_v21, %v861_v44 }
 0x2ed   : > { %3470 = vmatpush1.bf16.msra.mxu0 %v3469_v12  ;;  %3516 = vmatpush1.bf16.msra.mxu1 %v3469_v12  ;;  %v4805_v12 = vld [vmem:[#allocation3] sm:$0xff] }
 0x2ee   : > { %3471 = vmatprep.subr.bf16.mxu0 %v4092_v27  ;;  %3501 = vmatprep.subr.bf16.mxu1 %v4092_v27 }
 0x2f1   : > { %3473 = vmatpush1.bf16.msra.mxu0 %v3472_v39  ;;  %3517 = vmatpush1.bf16.msra.mxu1 %v3472_v39 }
 0x2f2   : > { %3474 = vmatprep.subr.bf16.mxu0 %v4092_v27  ;;  %3502 = vmatprep.subr.bf16.mxu1 %v4092_v27 }
 0x2f5   : > { %3476 = vmatpush1.bf16.msra.mxu0 %v3475_v60  ;;  %3518 = vmatpush1.bf16.msra.mxu1 %v3475_v60  ;;  %v864_v60 = vld [vmem:[%s4395_s8 + $0xd8] sm:$0xff] }
 0x2f6   : > { %3477 = vmatprep.subr.bf16.mxu0 %v4092_v27  ;;  %3503 = vmatprep.subr.bf16.mxu1 %v4092_v27  ;;  %v3484_v21 = vpack.c.bf16 %v864_v60, %v863_v53  ;;  %v3487_v53 = vpack.c.bf16 %v866_v30, %v865_v24  ;;  %v3490_v24 = vpack.c.bf16 %v868_v2, %v867_v6  ;;  %v4877_v2 = vld [vmem:[#allocation3 + $0x30] sm:$0xff] }
 0x2f9   : > { %3479 = vmatpush1.bf16.msra.mxu0 %v3478_v33  ;;  %3519 = vmatpush1.bf16.msra.mxu1 %v3478_v33  ;;  %v4825_v33 = vld [vmem:[#allocation3 + $0x10] sm:$0xff] }
 0x2fa   : > { %3480 = vmatprep.subr.bf16.mxu0 %v4092_v27  ;;  %3504 = vmatprep.subr.bf16.mxu1 %v4092_v27 }
 0x2fd   : > { %v1192_v18 = vpop.xlane.xlu0 %1191  ;;  %3482 = vmatpush1.bf16.msra.mxu0 %v3481_v36  ;;  %3520 = vmatpush1.bf16.msra.mxu1 %v3481_v36 }
 0x2fe   : > { %v4809_v39 = vmax.f32 %v4805_v12, %v1192_v18  ;;  %3483 = vmatprep.subr.bf16.mxu0 %v4092_v27  ;;  %3505 = vmatprep.subr.bf16.mxu1 %v4092_v27 }
 0x300   : > { %2504 = vst.msk [vmem:[#allocation3] sm:$0xff] %vm705_vm0, %v4809_v39  ;;  %1416 = vperm.xlu0 %3615, %v4809_v39  }
 0x301   : > { %v1195_v15 = vpop.xlane.xlu0 %1194  ;;  %3485 = vmatpush1.bf16.msra.mxu0 %v3484_v21  ;;  %3521 = vmatpush1.bf16.msra.mxu1 %v3484_v21 }
 0x302   : > { %v4823_v18 = vmax.f32 %v4812_v3, %v1195_v15  ;;  %v4839_v15 = vld [vmem:[#allocation3 + $0x18] sm:$0xff]  ;;  %3486 = vmatprep.subr.bf16.mxu0 %v4092_v27  ;;  %3506 = vmatprep.subr.bf16.mxu1 %v4092_v27 }
 0x304   : > { %2505 = vst.msk [vmem:[#allocation3 + $0x8] sm:$0xff] %vm705_vm0, %v4823_v18  ;;  %1421 = vperm.xlu1 %3616, %v4823_v18  }
 0x305   : > { %v1198_v44 = vpop.xlane.xlu1 %1197  ;;  %3488 = vmatpush1.bf16.msra.mxu0 %v3487_v53  ;;  %3522 = vmatpush1.bf16.msra.mxu1 %v3487_v53 }
 0x306   : > { %v4837_v36 = vmax.f32 %v4825_v33, %v1198_v44  ;;  %v4853_v44 = vld [vmem:[#allocation3 + $0x20] sm:$0xff]  ;;  %3489 = vmatprep.subr.bf16.mxu0 %v4092_v27  ;;  %3507 = vmatprep.subr.bf16.mxu1 %v4092_v27  ;;  %v4887_v27 = vld [vmem:[#allocation3 + $0x38] sm:$0xff] }
 0x308   : > { %2506 = vst.msk [vmem:[#allocation3 + $0x10] sm:$0xff] %vm705_vm0, %v4837_v36  ;;  %1426 = vperm.xlu1 %3616, %v4837_v36  }
 0x309   : > { %v1201_v60 = vpop.xlane.xlu1 %1200  ;;  %3491 = vmatpush1.bf16.msra.mxu0 %v3490_v24  ;;  %3523 = vmatpush1.bf16.msra.mxu1 %v3490_v24 }
 0x30a   : > { %v4851_v21 = vmax.f32 %v4839_v15, %v1201_v60  ;;  %v4867_v60 = vld [vmem:[#allocation3 + $0x28] sm:$0xff] }
 0x30c   : > { %2507 = vst.msk [vmem:[#allocation3 + $0x18] sm:$0xff] %vm705_vm0, %v4851_v21  ;;  %1431 = vperm.xlu1 %3616, %v4851_v21  }
 0x30d   : > { %v1204_v30 = vpop.xlane.xlu0 %1203 }
 0x30e   : > { %v4865_v53 = vmax.f32 %v4853_v44, %v1204_v30 }
 0x310   : > { %2508 = vst.msk [vmem:[#allocation3 + $0x20] sm:$0xff] %vm705_vm0, %v4865_v53  ;;  %1436 = vperm.xlu1 %3616, %v4865_v53  }
 0x311   : > { %v1207_v9 = vpop.xlane.xlu1 %1206 }
 0x312   : > { %v4875_v63 = vmax.f32 %v4867_v60, %v1207_v9 }
 0x314   : > { %2509 = vst.msk [vmem:[#allocation3 + $0x28] sm:$0xff] %vm705_vm0, %v4875_v63  ;;  %1441 = vperm.xlu1 %3616, %v4875_v63  }
 0x315   : > { %v1210_v24 = vpop.xlane.xlu0 %1209 }
 0x316   : > { %v4885_v30 = vmax.f32 %v4877_v2, %v1210_v24 }
 0x318   : > { %2510 = vst.msk [vmem:[#allocation3 + $0x30] sm:$0xff] %vm705_vm0, %v4885_v30  ;;  %1446 = vperm.xlu1 %3616, %v4885_v30  }
 0x319   : > { %v1213_v6 = vpop.xlane.xlu1 %1212 }
 0x31a   : > { %v4895_v57 = vmax.f32 %v4887_v27, %v1213_v6 }
 0x31c   : > { %2511 = vst.msk [vmem:[#allocation3 + $0x38] sm:$0xff] %vm705_vm0, %v4895_v57  ;;  %1451 = vperm.xlu1 %3616, %v4895_v57  }
 0x31d   : > { %v1216_v9 = vpop.xlane.xlu0 %1215 }
 0x31e   : > { %v4905_v50 = vmax.f32 %v4897_v56, %v1216_v9 }
 0x320   : > { %2512 = vst.msk [vmem:[#allocation3 + $0x40] sm:$0xff] %vm705_vm0, %v4905_v50  ;;  %1456 = vperm.xlu1 %3616, %v4905_v50  }
 0x321   : > { %v1219_v24 = vpop.xlane.xlu1 %1218 }
 0x322   : > { %v4915_v43 = vmax.f32 %v4907_v47, %v1219_v24 }
 0x324   : > { %2513 = vst.msk [vmem:[#allocation3 + $0x48] sm:$0xff] %vm705_vm0, %v4915_v43  ;;  %1461 = vperm.xlu0 %3615, %v4915_v43  }
 0x325   : > { %v1222_v6 = vpop.xlane.xlu0 %1221 }
 0x326   : > { %v4925_v38 = vmax.f32 %v4917_v41, %v1222_v6 }
 0x328   : > { %2514 = vst.msk [vmem:[#allocation3 + $0x50] sm:$0xff] %vm705_vm0, %v4925_v38  ;;  %1466 = vperm.xlu1 %3616, %v4925_v38  }
 0x329   : > { %v1225_v9 = vpop.xlane.xlu1 %1224 }
 0x32a   : > { %v4935_v35 = vmax.f32 %v4927_v37, %v1225_v9 }
 0x32c   : > { %2515 = vst.msk [vmem:[#allocation3 + $0x58] sm:$0xff] %vm705_vm0, %v4935_v35  ;;  %1471 = vperm.xlu0 %3615, %v4935_v35  }
 0x32d   : > { %v1228_v24 = vpop.xlane.xlu0 %1227 }
 0x32e   : > { %v4945_v32 = vmax.f32 %v4937_v34, %v1228_v24 }
 0x330   : > { %2516 = vst.msk [vmem:[#allocation3 + $0x60] sm:$0xff] %vm705_vm0, %v4945_v32  ;;  %1476 = vperm.xlu1 %3616, %v4945_v32  }
 0x331   : > { %v1231_v6 = vpop.xlane.xlu1 %1230 }
 0x332   : > { %v4955_v29 = vmax.f32 %v4947_v31, %v1231_v6 }
 0x334   : > { %2517 = vst.msk [vmem:[#allocation3 + $0x68] sm:$0xff] %vm705_vm0, %v4955_v29  ;;  %1481 = vperm.xlu0 %3615, %v4955_v29  }
 0x335   : > { %v1234_v9 = vpop.xlane.xlu0 %1233 }
 0x336   : > { %v4965_v26 = vmax.f32 %v4957_v28, %v1234_v9 }
 0x338   : > { %2518 = vst.msk [vmem:[#allocation3 + $0x70] sm:$0xff] %vm705_vm0, %v4965_v26  ;;  %1486 = vperm.xlu1 %3616, %v4965_v26  }
 0x339   : > { %v1237_v24 = vpop.xlane.xlu1 %1236 }
 0x33a   : > { %v4975_v23 = vmax.f32 %v4967_v25, %v1237_v24 }
 0x33c   : > { %2519 = vst.msk [vmem:[#allocation3 + $0x78] sm:$0xff] %vm705_vm0, %v4975_v23  ;;  %1491 = vperm.xlu0 %3615, %v4975_v23  }
 0x33d   : > { %v1240_v6 = vpop.xlane.xlu0 %1239 }
 0x33e   : > { %v4985_v20 = vmax.f32 %v4977_v22, %v1240_v6 }
 0x340   : > { %2520 = vst.msk [vmem:[#allocation3 + $0x80] sm:$0xff] %vm705_vm0, %v4985_v20  ;;  %1496 = vperm.xlu1 %3616, %v4985_v20  }
 0x341   : > { %v1243_v9 = vpop.xlane.xlu1 %1242 }
 0x342   : > { %v4995_v17 = vmax.f32 %v4987_v19, %v1243_v9 }
 0x344   : > { %2521 = vst.msk [vmem:[#allocation3 + $0x88] sm:$0xff] %vm705_vm0, %v4995_v17  ;;  %1501 = vperm.xlu0 %3615, %v4995_v17  }
 0x345   : > { %v1246_v24 = vpop.xlane.xlu0 %1245 }
 0x346   : > { %v5005_v14 = vmax.f32 %v4997_v16, %v1246_v24 }
 0x348   : > { %2522 = vst.msk [vmem:[#allocation3 + $0x90] sm:$0xff] %vm705_vm0, %v5005_v14  ;;  %1506 = vperm.xlu1 %3616, %v5005_v14  }
 0x349   : > { %v1249_v6 = vpop.xlane.xlu1 %1248 }
 0x34a   : > { %v5015_v11 = vmax.f32 %v5007_v13, %v1249_v6 }
 0x34c   : > { %2523 = vst.msk [vmem:[#allocation3 + $0x98] sm:$0xff] %vm705_vm0, %v5015_v11  ;;  %1511 = vperm.xlu0 %3615, %v5015_v11  }
 0x34d   : > { %v1252_v9 = vpop.xlane.xlu0 %1251 }
 0x34e   : > { %v5025_v8 = vmax.f32 %v5017_v10, %v1252_v9 }
 0x350   : > { %2524 = vst.msk [vmem:[#allocation3 + $0xa0] sm:$0xff] %vm705_vm0, %v5025_v8  ;;  %1516 = vperm.xlu1 %3616, %v5025_v8  }
 0x351   : > { %v1255_v24 = vpop.xlane.xlu1 %1254 }
 0x352   : > { %v5035_v5 = vmax.f32 %v5027_v7, %v1255_v24  ;;  %v5065_v24 = vld [vmem:[#allocation3 + $0xc8] sm:$0xff] }
 0x353   : > { %6040 = vst [vmem:[#allocation84_spill] sm:$0xff] %v5065_v24 }
 0x354   : > { %2525 = vst.msk [vmem:[#allocation3 + $0xa8] sm:$0xff] %vm705_vm0, %v5035_v5  ;;  %1521 = vperm.xlu0 %3615, %v5035_v5  }
 0x355   : > { %v1258_v6 = vpop.xlane.xlu0 %1257 }
 0x356   : > { %v5045_v1 = vmax.f32 %v5037_v4, %v1258_v6  ;;  %v5073_v4 = vld [vmem:[#allocation3 + $0xd0] sm:$0xff] }
 0x357   : > { %6042 = vst [vmem:[#allocation86_spill] sm:$0xff] %v5073_v4 }
 0x358   : > { %6036 = vst [vmem:[#allocation80_spill] sm:$0xff] %v5045_v1  ;;  %2526 = vst.msk [vmem:[#allocation3 + $0xb0] sm:$0xff] %vm705_vm0, %v5045_v1  ;;  %1526 = vperm.xlu1 %3616, %v5045_v1  }
 0x359   : > { %v1261_v9 = vpop.xlane.xlu1 %1260 }
 0x35a   : > { %v5055_v62 = vmax.f32 %v5047_v0, %v1261_v9 }
 0x35c   : > { %2527 = vst.msk [vmem:[#allocation3 + $0xb8] sm:$0xff] %vm705_vm0, %v5055_v62  ;;  %1531 = vperm.xlu0 %3615, %v5055_v62  }
 0x35d   : > { %v1264_v6 = vpop.xlane.xlu0 %1263 }
 0x35e   : > { %v5063_v59 = vmax.f32 %v5057_v61, %v1264_v6 }
 0x360   : > { %6039 = vst [vmem:[#allocation83_spill] sm:$0xff] %v5063_v59  ;;  %2528 = vst.msk [vmem:[#allocation3 + $0xc0] sm:$0xff] %vm705_vm0, %v5063_v59  ;;  %1536 = vperm.xlu1 %3616, %v5063_v59  }
 0x361   : > { %v1267_v9 = vpop.xlane.xlu1 %1266 }
 0x362   : > { %v5071_v1 = vmax.f32 %v5065_v24, %v1267_v9  ;;  %v6044_v9 = vsub.f32 %v4805_v12, %v4809_v39  ;;  %v5103_v39 = vld [vmem:[#allocation3 + $0xe8] sm:$0xff] }
 0x364   : > { %6041 = vst [vmem:[#allocation85_spill] sm:$0xff] %v5071_v1  ;;  %2529 = vst.msk [vmem:[#allocation3 + $0xc8] sm:$0xff] %vm705_vm0, %v5071_v1  ;;  %1541 = vperm.xlu0 %3615, %v5071_v1   ;;  %v1350_v24 = vmul.f32 1.442695, %v6044_v9  ;;  %v5092_v1 = vld [vmem:[#allocation3 + $0xe0] sm:$0xff] }
 0x365   : > { %v1270_v6 = vpop.xlane.xlu0 %1269 }
 0x366   : > { %v5079_v61 = vmax.f32 %v5073_v4, %v1270_v6  ;;  %3617 = vpow2.f32 %v1350_v24  ;;  %v6045_v6 = vsub.f32 %v4812_v3, %v4823_v18  ;;  %v6047_v3 = vsub.f32 %v4839_v15, %v4851_v21 }
 0x368   : > { %6043 = vst [vmem:[#allocation87_spill] sm:$0xff] %v5079_v61  ;;  %2530 = vst.msk [vmem:[#allocation3 + $0xd0] sm:$0xff] %vm705_vm0, %v5079_v61  ;;  %1546 = vperm.xlu1 %3616, %v5079_v61   ;;  %v1352_v4 = vmul.f32 1.442695, %v6045_v6  ;;  %v1356_v18 = vmul.f32 1.442695, %v6047_v3 }
 0x369   : > { %v1273_v59 = vpop.xlane.xlu1 %1272  ;;  %v5117_v6 = vld [vmem:[#allocation3 + $0xf0] sm:$0xff] }
 0x36a   : > { %v5090_v0 = vmax.f32 %v5081_v58, %v1273_v59  ;;  %v6046_v59 = vsub.f32 %v4825_v33, %v4837_v36  ;;  %3619 = vpow2.f32 %v1352_v4  ;;  %v6048_v33 = vsub.f32 %v4853_v44, %v4865_v53 }
 0x36b   : > { %v6049_v4 = vsub.f32 %v4867_v60, %v4875_v63  ;;  %v6050_v44 = vsub.f32 %v4877_v2, %v4885_v30  ;;  %v6051_v63 = vsub.f32 %v4887_v27, %v4895_v57  ;;  %v6052_v2 = vsub.f32 %v4897_v56, %v4905_v50 }
 0x36c   : > { %2531 = vst.msk [vmem:[#allocation3 + $0xd8] sm:$0xff] %vm705_vm0, %v5090_v0  ;;  %1551 = vperm.xlu0 %3615, %v5090_v0   ;;  %v1354_v9 = vmul.f32 1.442695, %v6046_v59  ;;  %v1358_v36 = vmul.f32 1.442695, %v6048_v33  ;;  %v6054_v50 = vsub.f32 %v4917_v41, %v4925_v38 }
 0x36d   : > { %v1276_v61 = vpop.xlane.xlu0 %1275  ;;  %v1360_v15 = vmul.f32 1.442695, %v6049_v4  ;;  %v1362_v53 = vmul.f32 1.442695, %v6050_v44  ;;  %v1364_v60 = vmul.f32 1.442695, %v6051_v63 }
 0x36e   : > { %v5101_v12 = vmax.f32 %v5092_v1, %v1276_v61  ;;  %3621 = vpow2.f32 %v1354_v9  ;;  %v5133_v9 = vld [vmem:[#allocation3 + $0xf8] sm:$0xff]  ;;  %v1366_v30 = vmul.f32 1.442695, %v6052_v2  ;;  %v1370_v56 = vmul.f32 1.442695, %v6054_v50 }
 0x36f   : > { %3623 = vpow2.f32 %v1356_v18 }
 0x370   : > { %2532 = vst.msk [vmem:[#allocation3 + $0xe0] sm:$0xff] %vm705_vm0, %v5101_v12  ;;  %1556 = vperm.xlu1 %3616, %v5101_v12   ;;  %v5131_v3 = vpop.eup %3617  ;;  %3625 = vpow2.f32 %v1358_v36  ;;  %v6053_v36 = vsub.f32 %v4907_v47, %v4915_v43  ;;  %v6055_v43 = vsub.f32 %v4927_v37, %v4935_v35  ;;  %v6057_v37 = vsub.f32 %v4947_v31, %v4955_v29 }
 0x371   : > { %v1279_v24 = vpop.xlane.xlu1 %1278  ;;  %3627 = vpow2.f32 %v1360_v15  ;;  %v6059_v31 = vsub.f32 %v4967_v25, %v4975_v23 }
 0x372   : > { %v5115_v61 = vmax.f32 %v5103_v39, %v1279_v24  ;;  %3629 = vpow2.f32 %v1362_v53  ;;  %v1368_v4 = vmul.f32 1.442695, %v6053_v36  ;;  %v1372_v47 = vmul.f32 1.442695, %v6055_v43 }
 0x373   : > { %3631 = vpow2.f32 %v1364_v60  ;;  %v1376_v41 = vmul.f32 1.442695, %v6057_v37  ;;  %v1380_v36 = vmul.f32 1.442695, %v6059_v31 }
 0x374   : > { %2533 = vst.msk [vmem:[#allocation3 + $0xe8] sm:$0xff] %vm705_vm0, %v5115_v61  ;;  %1561 = vperm.xlu0 %3615, %v5115_v61   ;;  %v5148_v33 = vpop.eup %3619  ;;  %3633 = vpow2.f32 %v1366_v30 }
 0x375   : > { %v1282_v21 = vpop.xlane.xlu0 %1281  ;;  %3635 = vpow2.f32 %v1368_v4 }
 0x376   : > { %v5129_v59 = vmax.f32 %v5117_v6, %v1282_v21  ;;  %v6056_v21 = vsub.f32 %v4937_v34, %v4945_v32  ;;  %3637 = vpow2.f32 %v1370_v56 }
 0x377   : > { %3639 = vpow2.f32 %v1372_v47 }
 0x378   : > { %2534 = vst.msk [vmem:[#allocation3 + $0xf0] sm:$0xff] %vm705_vm0, %v5129_v59  ;;  %2025 = vperm.xlu0 %3615, %v5131_v3   ;;  %1566 = vperm.xlu1 %3616, %v5129_v59   ;;  %v5165_v57 = vpop.eup %3621  ;;  %v1374_v44 = vmul.f32 1.442695, %v6056_v21 }
 0x379   : > { %v1285_v18 = vpop.xlane.xlu1 %1284  ;;  %v5170_v27 = vpop.eup %3623 }
 0x37a   : > { %v5146_v24 = vmax.f32 %v5133_v9, %v1285_v18  ;;  %v5179_v35 = vpop.eup %3625  ;;  %3641 = vpow2.f32 %v1374_v44 }
 0x37b   : > { %v5184_v60 = vpop.eup %3627 }
 0x37c   : > { %2535 = vst.msk [vmem:[#allocation3 + $0xf8] sm:$0xff] %vm705_vm0, %v5146_v24  ;;  %2030 = vperm.xlu1 %3616, %v5148_v33   ;;  %1571 = vperm.xlu0 %3615, %v5146_v24   ;;  %v5193_v29 = vpop.eup %3629 }
 0x37d   : > { %v5198_v4 = vpop.eup %3631 }
 0x37e   : > { %v5207_v23 = vpop.eup %3633 }
 0x37f   : > { %v1417_v53 = vpop.permute.xlu0 %1416  ;;  %v5209_v25 = vpop.eup %3635 }
 0x380   : > { %v1574_v63 = vsub.f32 %v4502_v40, %v1417_v53  ;;  %v1575_v38 = vsub.f32 %v4504_v42, %v1417_v53  ;;  %2035 = vperm.xlu1 %3616, %v5165_v57   ;;  %2040 = vperm.xlu0 %3615, %v5170_v27   ;;  %v6058_v40 = vsub.f32 %v4957_v28, %v4965_v26  ;;  %v5214_v44 = vpop.eup %3637 }
 0x382   : > { %v1638_v32 = vmul.f32 1.442695, %v1574_v63  ;;  %v1640_v34 = vmul.f32 1.442695, %v1575_v38  ;;  %v1378_v42 = vmul.f32 1.442695, %v6058_v40  ;;  %v5219_v63 = vpop.eup %3639 }
 0x383   : > { %v1422_v18 = vpop.permute.xlu1 %1421 }
 0x384   : > { %3643 = vpow2.f32 %v1638_v32  ;;  %v1576_v2 = vsub.f32 %v4540_v45, %v1422_v18  ;;  %v1577_v30 = vsub.f32 %v4542_v46, %v1422_v18  ;;  %2045 = vperm.xlu1 %3616, %v5179_v35   ;;  %2050 = vperm.xlu0 %3615, %v5184_v60   ;;  %v6060_v45 = vsub.f32 %v4977_v22, %v4985_v20 }
 0x385   : > { %3645 = vpow2.f32 %v1640_v34  ;;  %v6061_v20 = vsub.f32 %v4987_v19, %v4995_v17  ;;  %v5225_v17 = vpop.eup %3641 }
 0x386   : > { %3647 = vpow2.f32 %v1376_v41  ;;  %v1642_v26 = vmul.f32 1.442695, %v1576_v2  ;;  %v1644_v28 = vmul.f32 1.442695, %v1577_v30  ;;  %v1382_v46 = vmul.f32 1.442695, %v6060_v45 }
 0x387   : > { %3649 = vpow2.f32 %v1378_v42  ;;  %v1427_v50 = vpop.permute.xlu1 %1426  ;;  %v1384_v22 = vmul.f32 1.442695, %v6061_v20 }
 0x388   : > { %3651 = vpow2.f32 %v1642_v26  ;;  %v1578_v56 = vsub.f32 %v4546_v48, %v1427_v50  ;;  %v1579_v43 = vsub.f32 %v4548_v49, %v1427_v50  ;;  %2055 = vperm.xlu1 %3616, %v5193_v29   ;;  %2060 = vperm.xlu0 %3615, %v5198_v4   ;;  %v6062_v48 = vsub.f32 %v4997_v16, %v5005_v14 }
 0x389   : > { %3653 = vpow2.f32 %v1644_v28  ;;  %v6063_v14 = vsub.f32 %v5007_v13, %v5015_v11 }
 0x38a   : > { %3655 = vpow2.f32 %v1380_v36  ;;  %v1646_v47 = vmul.f32 1.442695, %v1578_v56  ;;  %v1648_v21 = vmul.f32 1.442695, %v1579_v43  ;;  %v1386_v49 = vmul.f32 1.442695, %v6062_v48 }
 0x38b   : > { %3657 = vpow2.f32 %v1382_v46  ;;  %v1432_v53 = vpop.permute.xlu1 %1431  ;;  %v1388_v16 = vmul.f32 1.442695, %v6063_v14  ;;  %v6066_v36 = vld [vmem:[#allocation81_spill] sm:$0xff]  ;;  %v6068_v56 = vld [vmem:[#allocation26_spill] sm:$0xff]  ;;  %v6072_v48 = vld [vmem:[#allocation83_spill] sm:$0xff] }
 0x38c   : > { %3659 = vpow2.f32 %v1646_v47  ;;  %v1580_v38 = vsub.f32 %v4552_v51, %v1432_v53  ;;  %v1581_v37 = vsub.f32 %v4554_v52, %v1432_v53  ;;  %2065 = vperm.xlu1 %3616, %v5207_v23   ;;  %2070 = vperm.xlu0 %3615, %v5209_v25   ;;  %v6064_v51 = vsub.f32 %v5017_v10, %v5025_v8  ;;  %v6067_v46 = vld [vmem:[#allocation25_spill] sm:$0xff] }
 0x38d   : > { %3661 = vpow2.f32 %v1648_v21  ;;  %v1341_v26 = vsub.f32 %v6066_v36, %v5055_v62 }
 0x38e   : > { %v3644_v19 = vpop.eup %3643  ;;  %3663 = vpow2.f32 %v1384_v22  ;;  %v1650_v41 = vmul.f32 1.442695, %v1580_v38  ;;  %v1652_v32 = vmul.f32 1.442695, %v1581_v37  ;;  %v1390_v52 = vmul.f32 1.442695, %v6064_v51 }
 0x38f   : > { %v3646_v34 = vpop.eup %3645  ;;  %3665 = vpow2.f32 %v1386_v49  ;;  %v1437_v40 = vpop.permute.xlu1 %1436  ;;  %v6073_v49 = vld [vmem:[#allocation82_spill] sm:$0xff]  ;;  %v1396_v14 = vmul.f32 1.442695, %v1341_v26 }
 0x390   : > { %v5233_v42 = vpop.eup %3647  ;;  %3667 = vpow2.f32 %v1650_v41  ;;  %2279 = vmatprep.mubr.f32.mxu0 %v3646_v34  ;;  %v1582_v18 = vsub.f32 %v4558_v54, %v1437_v40  ;;  %v1583_v2 = vsub.f32 %v4560_v55, %v1437_v40  ;;  %2075 = vperm.xlu1 %3616, %v5214_v44   ;;  %v5238_v11 = vadd.f32 %v3646_v34, %v3644_v19  ;;  %v6075_v41 = vld [vmem:[#allocation84_spill] sm:$0xff] }
 0x391   : > { %v5240_v13 = vpop.eup %3649  ;;  %3669 = vpow2.f32 %v1652_v32  ;;  %2280 = vmatmul.mubr.f32.vlgmr.msra.gmra.mrb[32].mxu0 %v3644_v19  ;;  %2080 = vperm.xlu0 %3615, %v5219_v63   ;;  %v6065_v54 = vsub.f32 %v5027_v7, %v5035_v5  ;;  %v6069_v5 = vld [vmem:[#allocation79_spill] sm:$0xff]  ;;  %v6070_v7 = vld [vmem:[#allocation80_spill] sm:$0xff]  ;;  %v1342_v53 = vsub.f32 %v6073_v49, %v6072_v48 }
 0x392   : > { %v3652_v8 = vpop.eup %3651  ;;  %3671 = vpow2.f32 %v1388_v16  ;;  %v1654_v10 = vmul.f32 1.442695, %v1582_v18  ;;  %v1656_v30 = vmul.f32 1.442695, %v1583_v2  ;;  %v6071_v47 = vsub.f32 %v6069_v5, %v6070_v7  ;;  %v6074_v16 = vld [vmem:[#allocation85_spill] sm:$0xff]  ;;  %v6077_v18 = vld [vmem:[#allocation28_spill] sm:$0xff] }
 0x393   : > { %v3654_v31 = vpop.eup %3653  ;;  %3673 = vpow2.f32 %v1390_v52  ;;  %v1392_v55 = vmul.f32 1.442695, %v6065_v54  ;;  %v1442_v28 = vpop.permute.xlu1 %1441  ;;  %v1343_v32 = vsub.f32 %v6075_v41, %v6074_v16  ;;  %v6076_v52 = vld [vmem:[#allocation27_spill] sm:$0xff]  ;;  %v6080_v5 = vld [vmem:[#allocation29_spill] sm:$0xff]  ;;  %v1346_v16 = vsub.f32 %v5092_v1, %v5101_v12 }
 0x394   : > { %v5248_v45 = vpop.eup %3655  ;;  %3675 = vpow2.f32 %v1654_v10  ;;  %2284 = vmatprep.mubr.f32.mxu0 %v3654_v31  ;;  %v1584_v50 = vsub.f32 %v6067_v46, %v1442_v28  ;;  %v1585_v43 = vsub.f32 %v6068_v56, %v1442_v28  ;;  %2085 = vperm.xlu1 %3616, %v5225_v17   ;;  %v5253_v20 = vadd.f32 %v3654_v31, %v3652_v8  ;;  %v6078_v28 = vld [vmem:[#allocation87_spill] sm:$0xff]  ;;  %v6079_v46 = vld [vmem:[#allocation86_spill] sm:$0xff] }
 0x395   : > { %v5255_v22 = vpop.eup %3657  ;;  %3677 = vpow2.f32 %v1656_v30  ;;  %2090 = vperm.xlu0 %3615, %v5233_v42   ;;  %2285 = vmatmul.mubr.f32.gmra.mrb[34].mxu0 %v3652_v8  ;;  %v1394_v21 = vmul.f32 1.442695, %v6071_v47  ;;  %v1398_v31 = vmul.f32 1.442695, %v1342_v53  ;;  %v1400_v26 = vmul.f32 1.442695, %v1343_v32 }
 0x396   : > { %v3660_v62 = vpop.eup %3659  ;;  %v1658_v38 = vmul.f32 1.442695, %v1584_v50  ;;  %v1660_v37 = vmul.f32 1.442695, %v1585_v43  ;;  %3679 = vpow2.f32 %v1392_v55  ;;  %v1344_v50 = vsub.f32 %v6079_v46, %v6078_v28  ;;  %v6081_v47 = vld [vmem:[#allocation30_spill] sm:$0xff]  ;;  %v6082_v32 = vld [vmem:[#allocation31_spill] sm:$0xff] }
 0x397   : > { %v3662_v19 = vpop.eup %3661  ;;  %v1447_v34 = vpop.permute.xlu1 %1446  ;;  %v1345_v53 = vsub.f32 %v5081_v58, %v5090_v0  ;;  %v1347_v1 = vsub.f32 %v5103_v39, %v5115_v61  ;;  %v6084_v28 = vld [vmem:[#allocation33_spill] sm:$0xff] }
 0x398   : > { %v5265_v51 = vpop.eup %3663  ;;  %3681 = vpow2.f32 %v1658_v38  ;;  %2289 = vmatprep.mubr.f32.mxu0 %v3662_v19  ;;  %v1586_v40 = vsub.f32 %v6076_v52, %v1447_v34  ;;  %v1587_v2 = vsub.f32 %v6077_v18, %v1447_v34  ;;  %2095 = vperm.xlu1 %3616, %v5240_v13   ;;  %v5270_v8 = vadd.f32 %v3662_v19, %v3660_v62  ;;  %v6083_v52 = vld [vmem:[#allocation32_spill] sm:$0xff] }
 0x399   : > { %v5272_v10 = vpop.eup %3665  ;;  %3683 = vpow2.f32 %v1660_v37  ;;  %2100 = vperm.xlu0 %3615, %v5248_v45   ;;  %2290 = vmatmul.mubr.f32.gmra.mrb[36].mxu0 %v3660_v62 }
 0x39a   : > { %v3668_v30 = vpop.eup %3667  ;;  %3685 = vpow2.f32 %v1394_v21  ;;  %v1662_v54 = vmul.f32 1.442695, %v1586_v40  ;;  %v1664_v55 = vmul.f32 1.442695, %v1587_v2  ;;  %v1404_v2 = vmul.f32 1.442695, %v1345_v53 }
 0x39b   : > { %v3670_v36 = vpop.eup %3669  ;;  %3687 = vpow2.f32 %v1396_v14  ;;  %v1452_v56 = vpop.permute.xlu1 %1451  ;;  %v1402_v14 = vmul.f32 1.442695, %v1344_v50  ;;  %v6085_v50 = vld [vmem:[#allocation34_spill] sm:$0xff] }
 0x39c   : > { %v5277_v43 = vpop.eup %3671  ;;  %3689 = vpow2.f32 %v1662_v54  ;;  %2294 = vmatprep.mubr.f32.mxu0 %v3670_v36  ;;  %v1588_v7 = vsub.f32 %v6080_v5, %v1452_v56  ;;  %v1589_v62 = vsub.f32 %v6081_v47, %v1452_v56  ;;  %2105 = vperm.xlu1 %3616, %v5255_v22   ;;  %v5282_v21 = vadd.f32 %v3670_v36, %v3668_v30 }
 0x39d   : > { %v5284_v48 = vpop.eup %3673  ;;  %3691 = vpow2.f32 %v1664_v55  ;;  %2110 = vperm.xlu0 %3615, %v5265_v51   ;;  %2295 = vmatmul.mubr.f32.gmra.mrb[38].mxu0 %v3668_v30  ;;  %v1406_v54 = vmul.f32 1.442695, %v1346_v16  ;;  %v1348_v55 = vsub.f32 %v5117_v6, %v5129_v59  ;;  %v1408_v59 = vmul.f32 1.442695, %v1347_v1 }
 0x39e   : > { %v3676_v49 = vpop.eup %3675  ;;  %3693 = vpow2.f32 %v1398_v31  ;;  %v1666_v38 = vmul.f32 1.442695, %v1588_v7  ;;  %v1668_v37 = vmul.f32 1.442695, %v1589_v62 }
 0x39f   : > { %v3678_v19 = vpop.eup %3677  ;;  %3695 = vpow2.f32 %v1400_v26  ;;  %v1457_v41 = vpop.permute.xlu1 %1456  ;;  %v1410_v62 = vmul.f32 1.442695, %v1348_v55 }
 0x3a0   : > { %3697 = vpow2.f32 %v1666_v38  ;;  %2299 = vmatprep.mubr.f32.mxu0 %v3678_v19  ;;  %v1590_v34 = vsub.f32 %v6082_v32, %v1457_v41  ;;  %v1591_v40 = vsub.f32 %v6083_v52, %v1457_v41  ;;  %2115 = vperm.xlu1 %3616, %v5272_v10   ;;  %v5294_v18 = vadd.f32 %v3678_v19, %v3676_v49  ;;  %v5296_v58 = vpop.eup %3679  ;;  %v6086_v38 = vld [vmem:[#allocation35_spill] sm:$0xff]  ;;  %v6087_v19 = vld [vmem:[#allocation36_spill] sm:$0xff] }
 0x3a1   : > { %3699 = vpow2.f32 %v1668_v37  ;;  %2120 = vperm.xlu0 %3615, %v5277_v43   ;;  %2300 = vmatmul.mubr.f32.gmra.mrb[40].mxu0 %v3676_v49 }
 0x3a2   : > { %v3682_v0 = vpop.eup %3681  ;;  %v1670_v12 = vmul.f32 1.442695, %v1590_v34  ;;  %v1672_v30 = vmul.f32 1.442695, %v1591_v40  ;;  %3701 = vpow2.f32 %v1402_v14 }
 0x3a3   : > { %v3684_v31 = vpop.eup %3683  ;;  %v1462_v36 = vpop.permute.xlu0 %1461 }
 0x3a4   : > { %v5303_v26 = vpop.eup %3685  ;;  %3703 = vpow2.f32 %v1670_v12  ;;  %v1592_v46 = vsub.f32 %v6084_v28, %v1462_v36  ;;  %v1593_v56 = vsub.f32 %v6085_v50, %v1462_v36  ;;  %2304 = vmatprep.mubr.f32.mxu0 %v3684_v31  ;;  %2125 = vperm.xlu1 %3616, %v5284_v48   ;;  %v5308_v39 = vadd.f32 %v3684_v31, %v3682_v0  ;;  %v6090_v12 = vld [vmem:[#allocation38_spill] sm:$0xff] }
 0x3a5   : > { %v5310_v61 = vpop.eup %3687  ;;  %3705 = vpow2.f32 %v1672_v30  ;;  %2130 = vperm.xlu0 %3615, %v5296_v58   ;;  %2305 = vmatmul.mubr.f32.gmra.mrb[42].mxu0 %v3682_v0 }
 0x3a6   : > { %v3690_v6 = vpop.eup %3689  ;;  %3707 = vpow2.f32 %v1404_v2  ;;  %v1674_v5 = vmul.f32 1.442695, %v1592_v46  ;;  %v1676_v7 = vmul.f32 1.442695, %v1593_v56  ;;  %v6089_v2 = vld [vmem:[#allocation37_spill] sm:$0xff] }
 0x3a7   : > { %v3692_v47 = vpop.eup %3691  ;;  %3709 = vpow2.f32 %v1406_v54  ;;  %v1467_v49 = vpop.permute.xlu1 %1466 }
 0x3a8   : > { %v5313_v53 = vpop.eup %3693  ;;  %3711 = vpow2.f32 %v1674_v5  ;;  %2309 = vmatprep.mubr.f32.mxu0 %v3692_v47  ;;  %v1594_v37 = vsub.f32 %v6086_v38, %v1467_v49  ;;  %v1595_v14 = vsub.f32 %v6087_v19, %v1467_v49  ;;  %2135 = vperm.xlu1 %3616, %v5303_v26   ;;  %v5318_v16 = vadd.f32 %v3692_v47, %v3690_v6  ;;  %v6093_v5 = vld [vmem:[#allocation40_spill] sm:$0xff] }
 0x3a9   : > { %v5320_v41 = vpop.eup %3695  ;;  %3713 = vpow2.f32 %v1676_v7  ;;  %2140 = vperm.xlu0 %3615, %v5310_v61   ;;  %2310 = vmatmul.mubr.f32.gmra.mrb[44].mxu0 %v3690_v6  ;;  %v6092_v6 = vld [vmem:[#allocation39_spill] sm:$0xff] }
 0x3aa   : > { %6088 = vst [vmem:[#allocation81_spill] sm:$0xff] %v5320_v41  ;;  %v3698_v32 = vpop.eup %3697  ;;  %3715 = vpow2.f32 %v1408_v59  ;;  %v1678_v34 = vmul.f32 1.442695, %v1594_v37  ;;  %v1680_v52 = vmul.f32 1.442695, %v1595_v14 }
 0x3ab   : > { %v3700_v40 = vpop.eup %3699  ;;  %3717 = vpow2.f32 %v1410_v62  ;;  %v1472_v0 = vpop.permute.xlu0 %1471 }
 0x3ac   : > { %3719 = vpow2.f32 %v1678_v34  ;;  %v1596_v1 = vsub.f32 %v6089_v2, %v1472_v0  ;;  %v1597_v30 = vsub.f32 %v6090_v12, %v1472_v0  ;;  %2314 = vmatprep.mubr.f32.mxu0 %v3700_v40  ;;  %2145 = vperm.xlu1 %3616, %v5313_v53   ;;  %v5326_v31 = vadd.f32 %v3700_v40, %v3698_v32  ;;  %v5328_v54 = vpop.eup %3701  ;;  %v6095_v34 = vld [vmem:[#allocation41_spill] sm:$0xff]  ;;  %v6096_v40 = vld [vmem:[#allocation42_spill] sm:$0xff] }
 0x3ad   : > { %3721 = vpow2.f32 %v1680_v52  ;;  %2150 = vperm.xlu0 %3615, %v5320_v41   ;;  %2315 = vmatmul.mubr.f32.gmra.mrb[46].mxu0 %v3698_v32 }
 0x3ae   : > { %v3704_v55 = vpop.eup %3703  ;;  %v1682_v36 = vmul.f32 1.442695, %v1596_v1  ;;  %v1684_v28 = vmul.f32 1.442695, %v1597_v30 }
 0x3af   : > { %v3706_v46 = vpop.eup %3705  ;;  %v1477_v50 = vpop.permute.xlu1 %1476 }
 0x3b0   : > { %v5331_v56 = vpop.eup %3707  ;;  %3723 = vpow2.f32 %v1682_v36  ;;  %2319 = vmatprep.mubr.f32.mxu0 %v3706_v46  ;;  %v1598_v59 = vsub.f32 %v6092_v6, %v1477_v50  ;;  %v1599_v7 = vsub.f32 %v6093_v5, %v1477_v50  ;;  %2155 = vperm.xlu1 %3616, %v5328_v54   ;;  %v5336_v47 = vadd.f32 %v3706_v46, %v3704_v55  ;;  %v6098_v46 = vld [vmem:[#allocation43_spill] sm:$0xff]  ;;  %v6099_v6 = vld [vmem:[#allocation44_spill] sm:$0xff] }
 0x3b1   : > { %6091 = vst [vmem:[#allocation25_spill] sm:$0xff] %v5331_v56  ;;  %v5338_v62 = vpop.eup %3709  ;;  %3725 = vpow2.f32 %v1684_v28  ;;  %2160 = vperm.xlu0 %3615, %v5331_v56   ;;  %2320 = vmatmul.mubr.f32.gmra.mrb[48].mxu0 %v3704_v55 }
 0x3b2   : > { %v3712_v49 = vpop.eup %3711  ;;  %v1686_v38 = vmul.f32 1.442695, %v1598_v59  ;;  %v1688_v37 = vmul.f32 1.442695, %v1599_v7 }
 0x3b3   : > { %v3714_v19 = vpop.eup %3713  ;;  %v1482_v14 = vpop.permute.xlu0 %1481 }
 0x3b4   : > { %v5341_v32 = vpop.eup %3715  ;;  %3727 = vpow2.f32 %v1686_v38  ;;  %v1600_v52 = vsub.f32 %v6095_v34, %v1482_v14  ;;  %v1601_v0 = vsub.f32 %v6096_v40, %v1482_v14  ;;  %2324 = vmatprep.mubr.f32.mxu0 %v3714_v19  ;;  %2165 = vperm.xlu1 %3616, %v5338_v62   ;;  %v5346_v2 = vadd.f32 %v3714_v19, %v3712_v49  ;;  %v6100_v14 = vld [vmem:[#allocation45_spill] sm:$0xff] }
 0x3b5   : > { %6094 = vst [vmem:[#allocation26_spill] sm:$0xff] %v5341_v32  ;;  %v5348_v1 = vpop.eup %3717  ;;  %3729 = vpow2.f32 %v1688_v37  ;;  %2170 = vperm.xlu0 %3615, %v5341_v32   ;;  %2325 = vmatmul.mubr.f32.gmra.mrb[50].mxu0 %v3712_v49 }
 0x3b6   : > { %6097 = vst [vmem:[#allocation79_spill] sm:$0xff] %v5348_v1  ;;  %v3720_v12 = vpop.eup %3719  ;;  %v1690_v30 = vmul.f32 1.442695, %v1600_v52  ;;  %v1692_v55 = vmul.f32 1.442695, %v1601_v0  ;;  %v6101_v52 = vld [vmem:[#allocation46_spill] sm:$0xff] }
 0x3b7   : > { %v3722_v36 = vpop.eup %3721  ;;  %v1487_v28 = vpop.permute.xlu1 %1486 }
 0x3b8   : > { %3731 = vpow2.f32 %v1690_v30  ;;  %2329 = vmatprep.mubr.f32.mxu0 %v3722_v36  ;;  %v1602_v50 = vsub.f32 %v6098_v46, %v1487_v28  ;;  %v1603_v59 = vsub.f32 %v6099_v6, %v1487_v28  ;;  %2175 = vperm.xlu1 %3616, %v5348_v1   ;;  %v5354_v5 = vadd.f32 %v3722_v36, %v3720_v12  ;;  %v6102_v46 = vld [vmem:[#allocation47_spill] sm:$0xff]  ;;  %v6103_v6 = vld [vmem:[#allocation48_spill] sm:$0xff] }
 0x3b9   : > { %3733 = vpow2.f32 %v1692_v55  ;;  %2330 = vmatmul.mubr.f32.gmra.mrb[52].mxu0 %v3720_v12 }
 0x3ba   : > { %v3724_v7 = vpop.eup %3723  ;;  %v1694_v38 = vmul.f32 1.442695, %v1602_v50  ;;  %v1696_v49 = vmul.f32 1.442695, %v1603_v59 }
 0x3bb   : > { %v3726_v37 = vpop.eup %3725  ;;  %v1492_v19 = vpop.permute.xlu0 %1491 }
 0x3bc   : > { %3735 = vpow2.f32 %v1694_v38  ;;  %v1604_v34 = vsub.f32 %v6100_v14, %v1492_v19  ;;  %v1605_v40 = vsub.f32 %v6101_v52, %v1492_v19  ;;  %2334 = vmatprep.mubr.f32.mxu0 %v3726_v37  ;;  %v5358_v0 = vadd.f32 %v3726_v37, %v3724_v7 }
 0x3bd   : > { %3737 = vpow2.f32 %v1696_v49  ;;  %2335 = vmatmul.mubr.f32.gmra.mrb[54].mxu0 %v3724_v7 }
 0x3be   : > { %v3728_v30 = vpop.eup %3727  ;;  %v1698_v36 = vmul.f32 1.442695, %v1604_v34  ;;  %v1700_v28 = vmul.f32 1.442695, %v1605_v40  ;;  %v6104_v34 = vld [vmem:[#allocation49_spill] sm:$0xff]  ;;  %v6105_v40 = vld [vmem:[#allocation50_spill] sm:$0xff] }
 0x3bf   : > { %v3730_v55 = vpop.eup %3729  ;;  %v1497_v12 = vpop.permute.xlu1 %1496 }
 0x3c0   : > { %3739 = vpow2.f32 %v1698_v36  ;;  %2339 = vmatprep.mubr.f32.mxu0 %v3730_v55  ;;  %v1606_v50 = vsub.f32 %v6102_v46, %v1497_v12  ;;  %v1607_v59 = vsub.f32 %v6103_v6, %v1497_v12  ;;  %v5362_v38 = vadd.f32 %v3730_v55, %v3728_v30 }
 0x3c1   : > { %3741 = vpow2.f32 %v1700_v28  ;;  %2340 = vmatmul.mubr.f32.gmra.mrb[56].mxu0 %v3728_v30 }
 0x3c2   : > { %v3732_v19 = vpop.eup %3731  ;;  %v1702_v37 = vmul.f32 1.442695, %v1606_v50  ;;  %v1704_v14 = vmul.f32 1.442695, %v1607_v59  ;;  %v6106_v50 = vld [vmem:[#allocation51_spill] sm:$0xff]  ;;  %v6107_v59 = vld [vmem:[#allocation52_spill] sm:$0xff] }
 0x3c3   : > { %v3734_v49 = vpop.eup %3733  ;;  %v1502_v7 = vpop.permute.xlu0 %1501 }
 0x3c4   : > { %3743 = vpow2.f32 %v1702_v37  ;;  %v1608_v52 = vsub.f32 %v6104_v34, %v1502_v7  ;;  %v1609_v15 = vsub.f32 %v6105_v40, %v1502_v7  ;;  %2344 = vmatprep.mubr.f32.mxu0 %v3734_v49  ;;  %v5366_v36 = vadd.f32 %v3734_v49, %v3732_v19  ;;  %v6109_v40 = vld [vmem:[#allocation54_spill] sm:$0xff] }
 0x3c5   : > { %3745 = vpow2.f32 %v1704_v14  ;;  %2345 = vmatmul.mubr.f32.gmra.mrb[58].mxu0 %v3732_v19 }
 0x3c6   : > { %v3736_v12 = vpop.eup %3735  ;;  %v1706_v55 = vmul.f32 1.442695, %v1608_v52  ;;  %v1708_v46 = vmul.f32 1.442695, %v1609_v15  ;;  %v6108_v52 = vld [vmem:[#allocation53_spill] sm:$0xff] }
 0x3c7   : > { %v3738_v28 = vpop.eup %3737  ;;  %v1507_v30 = vpop.permute.xlu1 %1506 }
 0x3c8   : > { %3747 = vpow2.f32 %v1706_v55  ;;  %2349 = vmatprep.mubr.f32.mxu0 %v3738_v28  ;;  %v1610_v6 = vsub.f32 %v6106_v50, %v1507_v30  ;;  %v1611_v37 = vsub.f32 %v6107_v59, %v1507_v30  ;;  %v5370_v32 = vadd.f32 %v3738_v28, %v3736_v12 }
 0x3c9   : > { %3749 = vpow2.f32 %v1708_v46  ;;  %2350 = vmatmul.mubr.f32.gmra.mrb[60].mxu0 %v3736_v12 }
 0x3ca   : > { %v3740_v7 = vpop.eup %3739  ;;  %v1710_v49 = vmul.f32 1.442695, %v1610_v6  ;;  %v1712_v34 = vmul.f32 1.442695, %v1611_v37  ;;  %v6110_v6 = vld [vmem:[#allocation55_spill] sm:$0xff]  ;;  %v6111_v37 = vld [vmem:[#allocation56_spill] sm:$0xff] }
 0x3cb   : > { %v3742_v14 = vpop.eup %3741  ;;  %v1512_v19 = vpop.permute.xlu0 %1511 }
 0x3cc   : > { %3751 = vpow2.f32 %v1710_v49  ;;  %v1612_v15 = vsub.f32 %v6108_v52, %v1512_v19  ;;  %v1613_v56 = vsub.f32 %v6109_v40, %v1512_v19  ;;  %2354 = vmatprep.mubr.f32.mxu0 %v3742_v14  ;;  %v5374_v55 = vadd.f32 %v3742_v14, %v3740_v7  ;;  %v6113_v40 = vld [vmem:[#allocation58_spill] sm:$0xff] }
 0x3cd   : > { %3753 = vpow2.f32 %v1712_v34  ;;  %2355 = vmatmul.mubr.f32.gmra.mrb[62].mxu0 %v3740_v7 }
 0x3ce   : > { %v3744_v30 = vpop.eup %3743  ;;  %v1714_v28 = vmul.f32 1.442695, %v1612_v15  ;;  %v1716_v50 = vmul.f32 1.442695, %v1613_v56  ;;  %v6112_v15 = vld [vmem:[#allocation57_spill] sm:$0xff] }
 0x3cf   : > { %v3746_v46 = vpop.eup %3745  ;;  %v1517_v12 = vpop.permute.xlu1 %1516 }
 0x3d0   : > { %3755 = vpow2.f32 %v1714_v28  ;;  %2359 = vmatprep.mubr.f32.mxu0 %v3746_v46  ;;  %v1614_v59 = vsub.f32 %v6110_v6, %v1517_v12  ;;  %v1615_v49 = vsub.f32 %v6111_v37, %v1517_v12  ;;  %v5378_v1 = vadd.f32 %v3746_v46, %v3744_v30 }
 0x3d1   : > { %3757 = vpow2.f32 %v1716_v50  ;;  %2360 = vmatmul.mubr.f32.gmra.mrb[64].mxu0 %v3744_v30 }
 0x3d2   : > { %v3748_v19 = vpop.eup %3747  ;;  %v1718_v14 = vmul.f32 1.442695, %v1614_v59  ;;  %v1720_v52 = vmul.f32 1.442695, %v1615_v49  ;;  %v6114_v59 = vld [vmem:[#allocation59_spill] sm:$0xff]  ;;  %v6115_v49 = vld [vmem:[#allocation60_spill] sm:$0xff] }
 0x3d3   : > { %v3750_v34 = vpop.eup %3749  ;;  %v1522_v7 = vpop.permute.xlu0 %1521 }
 0x3d4   : > { %3759 = vpow2.f32 %v1718_v14  ;;  %v1616_v56 = vsub.f32 %v6112_v15, %v1522_v7  ;;  %v1617_v41 = vsub.f32 %v6113_v40, %v1522_v7  ;;  %1834 = vadd.xlane.f32.xlu0 %v5253_v20  ;;  %2364 = vmatprep.mubr.f32.mxu0 %v3750_v34  ;;  %v5383_v28 = vadd.f32 %v3750_v34, %v3748_v19  ;;  %v6117_v40 = vld [vmem:[#allocation62_spill] sm:$0xff] }
 0x3d5   : > { %3761 = vpow2.f32 %v1720_v52  ;;  %2365 = vmatmul.mubr.f32.gmra.mrb[66].mxu0 %v3748_v19 }
 0x3d6   : > { %v3752_v46 = vpop.eup %3751  ;;  %v1722_v50 = vmul.f32 1.442695, %v1616_v56  ;;  %v1724_v30 = vmul.f32 1.442695, %v1617_v41  ;;  %v6116_v41 = vld [vmem:[#allocation61_spill] sm:$0xff] }
 0x3d7   : > { %v3754_v12 = vpop.eup %3753  ;;  %v1527_v6 = vpop.permute.xlu1 %1526 }
 0x3d8   : > { %3763 = vpow2.f32 %v1722_v50  ;;  %1837 = vadd.xlane.f32.xlu0 %v5270_v8  ;;  %2369 = vmatprep.mubr.f32.mxu0 %v3754_v12  ;;  %v1618_v37 = vsub.f32 %v6114_v59, %v1527_v6  ;;  %v1619_v14 = vsub.f32 %v6115_v49, %v1527_v6  ;;  %v5388_v7 = vadd.f32 %v3754_v12, %v3752_v46 }
 0x3d9   : > { %3765 = vpow2.f32 %v1724_v30  ;;  %2370 = vmatmul.mubr.f32.gmra.mrb[68].mxu0 %v3752_v46 }
 0x3da   : > { %v3756_v20 = vpop.eup %3755  ;;  %v1726_v52 = vmul.f32 1.442695, %v1618_v37  ;;  %v1728_v19 = vmul.f32 1.442695, %v1619_v14  ;;  %v6118_v37 = vld [vmem:[#allocation63_spill] sm:$0xff]  ;;  %v6119_v14 = vld [vmem:[#allocation64_spill] sm:$0xff] }
 0x3db   : > { %v3758_v34 = vpop.eup %3757  ;;  %v1532_v15 = vpop.permute.xlu0 %1531 }
 0x3dc   : > { %3767 = vpow2.f32 %v1726_v52  ;;  %v1620_v56 = vsub.f32 %v6116_v41, %v1532_v15  ;;  %v1621_v50 = vsub.f32 %v6117_v40, %v1532_v15  ;;  %1843 = vadd.xlane.f32.xlu0 %v5294_v18  ;;  %2374 = vmatprep.mubr.f32.mxu0 %v3758_v34  ;;  %v5393_v8 = vadd.f32 %v3758_v34, %v3756_v20  ;;  %v6120_v41 = vld [vmem:[#allocation65_spill] sm:$0xff] }
 0x3dd   : > { %3769 = vpow2.f32 %v1728_v19  ;;  %1831 = vadd.xlane.f32.xlu1 %v5238_v11  ;;  %2375 = vmatmul.mubr.f32.gmra.mrb[70].mxu0 %v3756_v20 }
 0x3de   : > { %v3760_v46 = vpop.eup %3759  ;;  %v1730_v30 = vmul.f32 1.442695, %v1620_v56  ;;  %v1732_v12 = vmul.f32 1.442695, %v1621_v50 }
 0x3df   : > { %v3762_v6 = vpop.eup %3761  ;;  %v1537_v59 = vpop.permute.xlu1 %1536 }
 0x3e0   : > { %3771 = vpow2.f32 %v1730_v30  ;;  %1849 = vadd.xlane.f32.xlu0 %v5318_v16  ;;  %2379 = vmatprep.mubr.f32.mxu0 %v3762_v6  ;;  %v1622_v49 = vsub.f32 %v6118_v37, %v1537_v59  ;;  %v1623_v18 = vsub.f32 %v6119_v14, %v1537_v59  ;;  %v5399_v52 = vadd.f32 %v3762_v6, %v3760_v46  ;;  %v6121_v16 = vld [vmem:[#allocation66_spill] sm:$0xff]  ;;  %v6122_v59 = vld [vmem:[#allocation67_spill] sm:$0xff] }
 0x3e1   : > { %3773 = vpow2.f32 %v1732_v12  ;;  %1840 = vadd.xlane.f32.xlu1 %v5282_v21  ;;  %2380 = vmatmul.mubr.f32.gmra.mrb[72].mxu0 %v3760_v46 }
 0x3e2   : > { %v3764_v11 = vpop.eup %3763  ;;  %v1734_v20 = vmul.f32 1.442695, %v1622_v49  ;;  %v1736_v19 = vmul.f32 1.442695, %v1623_v18  ;;  %v6123_v49 = vld [vmem:[#allocation68_spill] sm:$0xff] }
 0x3e3   : > { %v3766_v34 = vpop.eup %3765  ;;  %v1542_v15 = vpop.permute.xlu0 %1541 }
 0x3e4   : > { %3775 = vpow2.f32 %v1734_v20  ;;  %v1624_v56 = vsub.f32 %v6120_v41, %v1542_v15  ;;  %v1625_v40 = vsub.f32 %v6121_v16, %v1542_v15  ;;  %1855 = vadd.xlane.f32.xlu0 %v5336_v47  ;;  %2384 = vmatprep.mubr.f32.mxu0 %v3766_v34  ;;  %v5405_v50 = vadd.f32 %v3766_v34, %v3764_v11  ;;  %v6124_v34 = vld [vmem:[#allocation69_spill] sm:$0xff] }
 0x3e5   : > { %3777 = vpow2.f32 %v1736_v19  ;;  %1846 = vadd.xlane.f32.xlu1 %v5308_v39  ;;  %2385 = vmatmul.mubr.f32.gmra.mrb[74].mxu0 %v3764_v11 }
 0x3e6   : > { %v3768_v21 = vpop.eup %3767  ;;  %v1738_v46 = vmul.f32 1.442695, %v1624_v56  ;;  %v1740_v30 = vmul.f32 1.442695, %v1625_v40 }
 0x3e7   : > { %v3770_v12 = vpop.eup %3769  ;;  %v1547_v6 = vpop.permute.xlu1 %1546 }
 0x3e8   : > { %3779 = vpow2.f32 %v1738_v46  ;;  %1861 = vadd.xlane.f32.xlu0 %v5354_v5  ;;  %2389 = vmatprep.mubr.f32.mxu0 %v3770_v12  ;;  %v1626_v37 = vsub.f32 %v6122_v59, %v1547_v6  ;;  %v1627_v47 = vsub.f32 %v6123_v49, %v1547_v6  ;;  %v5411_v14 = vadd.f32 %v3770_v12, %v3768_v21  ;;  %v6125_v5 = vld [vmem:[#allocation70_spill] sm:$0xff]  ;;  %v6127_v6 = vld [vmem:[#allocation72_spill] sm:$0xff] }
 0x3e9   : > { %3781 = vpow2.f32 %v1740_v30  ;;  %1852 = vadd.xlane.f32.xlu1 %v5326_v31  ;;  %2390 = vmatmul.mubr.f32.gmra.mrb[76].mxu0 %v3768_v21  ;;  %v6126_v30 = vld [vmem:[#allocation71_spill] sm:$0xff] }
 0x3ea   : > { %v3772_v39 = vpop.eup %3771  ;;  %v1742_v18 = vmul.f32 1.442695, %v1626_v37  ;;  %v1744_v11 = vmul.f32 1.442695, %v1627_v47 }
 0x3eb   : > { %v3774_v20 = vpop.eup %3773  ;;  %v1552_v19 = vpop.permute.xlu0 %1551 }
 0x3ec   : > { %3783 = vpow2.f32 %v1742_v18  ;;  %v1628_v15 = vsub.f32 %v6124_v34, %v1552_v19  ;;  %v1629_v41 = vsub.f32 %v6125_v5, %v1552_v19  ;;  %1867 = vadd.xlane.f32.xlu0 %v5362_v38  ;;  %2394 = vmatprep.mubr.f32.mxu0 %v3774_v20  ;;  %v5417_v56 = vadd.f32 %v3774_v20, %v3772_v39  ;;  %v6128_v18 = vld [vmem:[#allocation73_spill] sm:$0xff]  ;;  %v6129_v20 = vld [vmem:[#allocation74_spill] sm:$0xff] }
 0x3ed   : > { %3785 = vpow2.f32 %v1744_v11  ;;  %1858 = vadd.xlane.f32.xlu1 %v5346_v2  ;;  %2395 = vmatmul.mubr.f32.gmra.mrb[78].mxu0 %v3772_v39 }
 0x3ee   : > { %v3776_v31 = vpop.eup %3775  ;;  %v1746_v16 = vmul.f32 1.442695, %v1628_v15  ;;  %v1748_v40 = vmul.f32 1.442695, %v1629_v41 }
 0x3ef   : > { %v3778_v21 = vpop.eup %3777  ;;  %v1557_v46 = vpop.permute.xlu1 %1556 }
 0x3f0   : > { %3787 = vpow2.f32 %v1746_v16  ;;  %1873 = vadd.xlane.f32.xlu0 %v5370_v32  ;;  %2399 = vmatprep.mubr.f32.mxu0 %v3778_v21  ;;  %v1630_v12 = vsub.f32 %v6126_v30, %v1557_v46  ;;  %v1631_v38 = vsub.f32 %v6127_v6, %v1557_v46  ;;  %v1902_v59 = vadd.f32 %v3778_v21, %v3776_v31  ;;  %v6130_v16 = vld [vmem:[#allocation75_spill] sm:$0xff] }
 0x3f1   : > { %3789 = vpow2.f32 %v1748_v40  ;;  %1864 = vadd.xlane.f32.xlu1 %v5358_v0  ;;  %2400 = vmatmul.mubr.f32.gmra.mrb[80].mxu0 %v3776_v31  ;;  %v6131_v40 = vld [vmem:[#allocation76_spill] sm:$0xff] }
 0x3f2   : > { %v3780_v2 = vpop.eup %3779  ;;  %v1750_v37 = vmul.f32 1.442695, %v1630_v12  ;;  %v1752_v49 = vmul.f32 1.442695, %v1631_v38 }
 0x3f3   : > { %v3782_v47 = vpop.eup %3781  ;;  %v1562_v39 = vpop.permute.xlu0 %1561 }
 0x3f4   : > { %3791 = vpow2.f32 %v1750_v37  ;;  %v1632_v11 = vsub.f32 %v6128_v18, %v1562_v39  ;;  %v1633_v32 = vsub.f32 %v6129_v20, %v1562_v39  ;;  %1879 = vadd.xlane.f32.xlu0 %v5378_v1  ;;  %2404 = vmatprep.mubr.f32.mxu0 %v3782_v47  ;;  %v5427_v19 = vadd.f32 %v3782_v47, %v3780_v2 }
 0x3f5   : > { %3793 = vpow2.f32 %v1752_v49  ;;  %1870 = vadd.xlane.f32.xlu1 %v5366_v36  ;;  %2405 = vmatmul.mubr.f32.gmra.mrb[82].mxu0 %v3780_v2  ;;  %v6132_v2 = vld [vmem:[#allocation77_spill] sm:$0xff]  ;;  %v6133_v49 = vld [vmem:[#allocation78_spill] sm:$0xff] }
 0x3f6   : > { %v3784_v0 = vpop.eup %3783  ;;  %v1754_v34 = vmul.f32 1.442695, %v1632_v11  ;;  %v1756_v15 = vmul.f32 1.442695, %v1633_v32 }
 0x3f7   : > { %v3786_v5 = vpop.eup %3785  ;;  %v5430_v41 = vpop.permute.xlu0 %2025 }
 0x3f8   : > { %v1567_v31 = vpop.permute.xlu1 %1566  ;;  %3795 = vpow2.f32 %v1754_v34  ;;  %1885 = vadd.xlane.f32.xlu0 %v5388_v7  ;;  %2409 = vmatprep.mubr.f32.mxu0 %v3786_v5  ;;  %v1908_v36 = vadd.f32 %v3786_v5, %v3784_v0 }
 0x3f9   : > { %v1634_v1 = vsub.f32 %v6130_v16, %v1567_v31  ;;  %v1635_v21 = vsub.f32 %v6131_v40, %v1567_v31  ;;  %3797 = vpow2.f32 %v1756_v15  ;;  %1876 = vadd.xlane.f32.xlu1 %v5374_v55  ;;  %2410 = vmatmul.mubr.f32.gmra.mrb[84].mxu0 %v3784_v0 }
 0x3fa   : > { %v3788_v46 = vpop.eup %3787 }
 0x3fb   : > { %v1758_v30 = vmul.f32 1.442695, %v1634_v1  ;;  %v1760_v12 = vmul.f32 1.442695, %v1635_v21  ;;  %v3790_v6 = vpop.eup %3789  ;;  %v1572_v38 = vpop.permute.xlu0 %1571 }
 0x3fc   : > { %v1636_v37 = vsub.f32 %v6132_v2, %v1572_v38  ;;  %v1637_v7 = vsub.f32 %v6133_v49, %v1572_v38  ;;  %1891 = vadd.xlane.f32.xlu0 %v5399_v52  ;;  %2414 = vmatprep.mubr.f32.mxu0 %v3790_v6  ;;  %v1911_v55 = vadd.f32 %v3790_v6, %v3788_v46 }
 0x3fd   : > { %3799 = vpow2.f32 %v1758_v30  ;;  %1882 = vadd.xlane.f32.xlu1 %v5383_v28  ;;  %2415 = vmatmul.mubr.f32.gmra.mrb[86].mxu0 %v3788_v46 }
 0x3fe   : > { %3801 = vpow2.f32 %v1760_v12  ;;  %v3792_v47 = vpop.eup %3791  ;;  %v1762_v39 = vmul.f32 1.442695, %v1636_v37  ;;  %v1764_v18 = vmul.f32 1.442695, %v1637_v7 }
 0x3ff   : > { %v3794_v11 = vpop.eup %3793 }
 0x400   : > { %3803 = vpow2.f32 %v1762_v39  ;;  %1897 = vadd.xlane.f32.xlu0 %v5411_v14  ;;  %2419 = vmatprep.mubr.f32.mxu1 %v3794_v11  ;;  %v1914_v20 = vadd.f32 %v3794_v11, %v3792_v47 }
 0x401   : > { %3805 = vpow2.f32 %v1764_v18  ;;  %1888 = vadd.xlane.f32.xlu1 %v5393_v8  ;;  %2420 = vmatmul.mubr.f32.vlgmr.msra.gmra.mrb[64].mxu1 %v3792_v47  ;;  %v2031_v8 = vpop.permute.xlu1 %2030 }
 0x402   : > { %v3796_v52 = vpop.eup %3795 }
 0x403   : > { %v3798_v32 = vpop.eup %3797 }
 0x404   : > { %1903 = vadd.xlane.f32.xlu0 %v1902_v59  ;;  %2424 = vmatprep.mubr.f32.mxu1 %v3798_v32  ;;  %v1917_v28 = vadd.f32 %v3798_v32, %v3796_v52  ;;  %v5445_v59 = vpop.permute.xlu0 %2040 }
 0x405   : > { %1894 = vadd.xlane.f32.xlu1 %v5405_v50  ;;  %2425 = vmatmul.mubr.f32.gmra.mrb[66].mxu1 %v3796_v52  ;;  %v2036_v50 = vpop.permute.xlu1 %2035 }
 0x407   : > { %v3800_v0 = vpop.eup %3799 }
 0x408   : > { %v3802_v34 = vpop.eup %3801  ;;  %1909 = vadd.xlane.f32.xlu0 %v1908_v36  ;;  %v5447_v16 = vpop.permute.xlu0 %2050 }
 0x409   : > { %2429 = vmatprep.mubr.f32.mxu1 %v3802_v34  ;;  %v1920_v15 = vadd.f32 %v3802_v34, %v3800_v0  ;;  %1900 = vadd.xlane.f32.xlu1 %v5417_v56  ;;  %v6134_v56 = vsub.f32 %v5133_v9, %v5146_v24  ;;  %v5452_v40 = vpop.permute.xlu1 %2045  ;;  %v1767_v34 = vld [vmem:[#allocation4 + $0x8] sm:$0xff] }
 0x40a   : > { %2430 = vmatmul.mubr.f32.gmra.mrb[68].mxu1 %v3800_v0  ;;  %v3804_v14 = vpop.eup %3803 }
 0x40b   : > { %v3806_v5 = vpop.eup %3805  ;;  %v1412_v1 = vmul.f32 1.442695, %v6134_v56 }
 0x40c   : > { %1915 = vadd.xlane.f32.xlu0 %v1914_v20  ;;  %2434 = vmatprep.mubr.f32.mxu1 %v3806_v5  ;;  %v1923_v31 = vadd.f32 %v3806_v5, %v3804_v14  ;;  %v5454_v21 = vpop.permute.xlu0 %2060 }
 0x40d   : > { %1906 = vadd.xlane.f32.xlu1 %v5427_v19  ;;  %3807 = vpow2.f32 %v1412_v1  ;;  %v5456_v19 = vpop.permute.xlu1 %2055  ;;  %v2183_v1 = vmul.f32 0.0, %v5430_v41 }
 0x40e   : > { %2435 = vmatmul.mubr.f32.gmra.mrb[70].mxu1 %v3804_v14  ;;  %v1799_v14 = vmul.f32 %v5148_v33, %v1767_v34  ;;  %v2184_v33 = vmul.f32 0.0, %v2031_v8 }
 0x410   : > { %1921 = vadd.xlane.f32.xlu0 %v1920_v15  ;;  %v5458_v36 = vpop.permute.xlu0 %2070 }
 0x411   : > { %1912 = vadd.xlane.f32.xlu1 %v1911_v55  ;;  %v5460_v46 = vpop.permute.xlu1 %2065 }
 0x414   : > { %v5465_v12 = vpop.permute.xlu0 %2080 }
 0x415   : > { %1918 = vadd.xlane.f32.xlu1 %v1917_v28  ;;  %v5467_v9 = vpop.permute.xlu1 %2075 }
 0x417   : > { %v5462_v30 = vpop.eup %3807 }
 0x418   : > { %v5469_v24 = vpop.permute.xlu0 %2090 }
 0x419   : > { %1924 = vadd.xlane.f32.xlu1 %v1923_v31  ;;  %v5471_v6 = vpop.permute.xlu1 %2085  ;;  %v1768_v31 = vld [vmem:[#allocation4 + $0x10] sm:$0xff] }
 0x41c   : > { %v5473_v38 = vpop.permute.xlu0 %2100 }
 0x41d   : > { %v5475_v2 = vpop.permute.xlu1 %2095 }
 0x420   : > { %v5477_v37 = vpop.permute.xlu0 %2110 }
 0x421   : > { %v5479_v49 = vpop.permute.xlu1 %2105 }
 0x424   : > { %v5481_v7 = vpop.permute.xlu0 %2120 }
 0x425   : > { %v5483_v55 = vpop.permute.xlu1 %2115 }
 0x426   : > { %2180 = vperm.xlu0 %3615, %v5462_v30  }
 0x428   : > { %v5485_v47 = vpop.permute.xlu0 %2130 }
 0x429   : > { %6135 = vst [vmem:[#allocation80_spill] sm:$0xff] %v5485_v47  ;;  %v5487_v39 = vpop.permute.xlu1 %2125  ;;  %v1766_v47 = vld [vmem:[#allocation4] sm:$0xff] }
 0x42c   : > { %v5489_v18 = vpop.permute.xlu0 %2140 }
 0x42d   : > { %6136 = vst [vmem:[#allocation83_spill] sm:$0xff] %v5489_v18  ;;  %v5491_v11 = vpop.permute.xlu1 %2135 }
 0x42e   : > { %6137 = vst [vmem:[#allocation82_spill] sm:$0xff] %v5491_v11 }
 0x430   : > { %v5493_v20 = vpop.permute.xlu0 %2150 }
 0x431   : > { %6138 = vst [vmem:[#allocation85_spill] sm:$0xff] %v5493_v20  ;;  %v5495_v52 = vpop.permute.xlu1 %2145 }
 0x432   : > { %6139 = vst [vmem:[#allocation84_spill] sm:$0xff] %v5495_v52  ;;  %v1800_v52 = vmul.f32 %v5165_v57, %v1768_v31  ;;  %v1798_v57 = vmul.f32 %v5131_v3, %v1766_v47  ;;  %v1774_v47 = vld [vmem:[#allocation4 + $0x40] sm:$0xff] }
 0x434   : > { %v5497_v32 = vpop.permute.xlu0 %2160 }
 0x435   : > { %6140 = vst [vmem:[#allocation27_spill] sm:$0xff] %v5497_v32  ;;  %v5499_v28 = vpop.permute.xlu1 %2155 }
 0x436   : > { %6141 = vst [vmem:[#allocation28_spill] sm:$0xff] %v5499_v28 }
 0x438   : > { %v5501_v0 = vpop.permute.xlu0 %2170 }
 0x439   : > { %6142 = vst [vmem:[#allocation87_spill] sm:$0xff] %v5501_v0  ;;  %v5503_v15 = vpop.permute.xlu1 %2165  ;;  %v1770_v0 = vld [vmem:[#allocation4 + $0x20] sm:$0xff] }
 0x43a   : > { %6143 = vst [vmem:[#allocation86_spill] sm:$0xff] %v5503_v15  ;;  %v1802_v41 = vmul.f32 %v5179_v35, %v1770_v0 }
 0x43d   : > { %v5511_v11 = vpop.permute.xlu1 %2175 }
 0x43e   : > { %6145 = vst [vmem:[#allocation30_spill] sm:$0xff] %v5511_v11 }
 0x461   : > { %v1835_v5 = vpop.xlane.xlu0 %1834 }
 0x462   : > { %v1927_v56 = vadd.f32 %v1835_v5, %v1799_v14 }
 0x464   : > { %1960 = vst.msk [vmem:[#allocation4 + $0x8] sm:$0xff] %vm705_vm0, %v1927_v56  ;;  %v2281_v20 = vpop.f32.mrb[32].mxu0 }
 0x465   : > { %v5509_v32 = vadd.f32 %v2281_v20, %v2183_v1  ;;  %v2283_v28 = vpop.f32.mrb[33].mxu0  ;;  %v1838_v18 = vpop.xlane.xlu0 %1837  ;;  %v1772_v20 = vld [vmem:[#allocation4 + $0x30] sm:$0xff]  ;;  %v1769_v1 = vld [vmem:[#allocation4 + $0x18] sm:$0xff] }
 0x466   : > { %v1928_v15 = vadd.f32 %v1838_v18, %v1800_v52  ;;  %v1804_v52 = vmul.f32 %v5193_v29, %v1772_v20  ;;  %v1801_v3 = vmul.f32 %v5170_v27, %v1769_v1  ;;  %v1806_v29 = vmul.f32 %v5207_v23, %v1774_v47  ;;  %v1776_v20 = vld [vmem:[#allocation4 + $0x50] sm:$0xff]  ;;  %v1773_v1 = vld [vmem:[#allocation4 + $0x38] sm:$0xff] }
 0x467   : > { %6144 = vst [vmem:[#allocation29_spill] sm:$0xff] %v5509_v32  ;;  %v2185_v32 = vmul.f32 0.0, %v2036_v50  ;;  %v1771_v50 = vld [vmem:[#allocation4 + $0x28] sm:$0xff]  ;;  %v1808_v23 = vmul.f32 %v5214_v44, %v1776_v20  ;;  %v1805_v47 = vmul.f32 %v5198_v4, %v1773_v1 }
 0x468   : > { %1961 = vst.msk [vmem:[#allocation4 + $0x10] sm:$0xff] %vm705_vm0, %v1928_v15  ;;  %v2286_v34 = vpop.f32.mrb[34].mxu0  ;;  %v1803_v27 = vmul.f32 %v5184_v60, %v1771_v50 }
 0x469   : > { %v5515_v14 = vadd.f32 %v2286_v34, %v2184_v33  ;;  %v2288_v5 = vpop.f32.mrb[35].mxu0  ;;  %v1844_v56 = vpop.xlane.xlu0 %1843 }
 0x46a   : > { %v1930_v28 = vadd.f32 %v1844_v56, %v1802_v41  ;;  %v1832_v31 = vpop.xlane.xlu1 %1831  ;;  %v2186_v41 = vmul.f32 0.0, %v5445_v59  ;;  %v2187_v59 = vmul.f32 0.0, %v5452_v40 }
 0x46b   : > { %v2540_v11 = vld [vmem:[#allocation4 + $0x8] sm:$0xff]  ;;  %v1926_v18 = vadd.f32 %v1832_v31, %v1798_v57 }
 0x46c   : > { %3809 = vrcp.f32 %v2540_v11  ;;  %1963 = vst.msk [vmem:[#allocation4 + $0x20] sm:$0xff] %vm705_vm0, %v1930_v28  ;;  %v2291_v8 = vpop.f32.mrb[36].mxu0 }
 0x46d   : > { %1959 = vst.msk [vmem:[#allocation4] sm:$0xff] %vm705_vm0, %v1926_v18  ;;  %v5521_v35 = vadd.f32 %v2291_v8, %v2185_v32  ;;  %v2293_v0 = vpop.f32.mrb[37].mxu0  ;;  %v1850_v15 = vpop.xlane.xlu0 %1849 }
 0x46e   : > { %v1932_v33 = vadd.f32 %v1850_v15, %v1804_v52  ;;  %v1841_v34 = vpop.xlane.xlu1 %1840 }
 0x46f   : > { %v1929_v11 = vadd.f32 %v1841_v34, %v1801_v3  ;;  %v2541_v0 = vld [vmem:[#allocation4 + $0x10] sm:$0xff] }
 0x470   : > { %1965 = vst.msk [vmem:[#allocation4 + $0x30] sm:$0xff] %vm705_vm0, %v1932_v33  ;;  %v2296_v5 = vpop.f32.mrb[38].mxu0  ;;  %v1778_v33 = vld [vmem:[#allocation4 + $0x60] sm:$0xff] }
 0x471   : > { %1962 = vst.msk [vmem:[#allocation4 + $0x18] sm:$0xff] %vm705_vm0, %v1929_v11  ;;  %v5528_v32 = vadd.f32 %v2296_v5, %v2186_v41  ;;  %v2298_v56 = vpop.f32.mrb[39].mxu0  ;;  %v1856_v57 = vpop.xlane.xlu0 %1855  ;;  %v1775_v41 = vld [vmem:[#allocation4 + $0x48] sm:$0xff]  ;;  %v2188_v11 = vmul.f32 0.0, %v5447_v16  ;;  %v1780_v16 = vld [vmem:[#allocation4 + $0x70] sm:$0xff] }
 0x472   : > { %v1934_v28 = vadd.f32 %v1856_v57, %v1806_v29  ;;  %v1847_v31 = vpop.xlane.xlu1 %1846  ;;  %v1810_v56 = vmul.f32 %v5225_v17, %v1778_v33  ;;  %v1782_v33 = vld [vmem:[#allocation4 + $0x80] sm:$0xff] }
 0x473   : > { %v1931_v18 = vadd.f32 %v1847_v31, %v1803_v27  ;;  %v2543_v57 = vld [vmem:[#allocation4 + $0x20] sm:$0xff] }
 0x474   : > { %v2539_v8 = vld [vmem:[#allocation4] sm:$0xff]  ;;  %1967 = vst.msk [vmem:[#allocation4 + $0x40] sm:$0xff] %vm705_vm0, %v1934_v28  ;;  %v2301_v52 = vpop.f32.mrb[40].mxu0  ;;  %v1807_v28 = vmul.f32 %v5209_v25, %v1775_v41  ;;  %v2190_v41 = vmul.f32 0.0, %v5454_v21  ;;  %v1784_v21 = vld [vmem:[#allocation4 + $0x90] sm:$0xff] }
 0x475   : > { %3811 = vrcp.f32 %v2539_v8  ;;  %1964 = vst.msk [vmem:[#allocation4 + $0x28] sm:$0xff] %vm705_vm0, %v1931_v18  ;;  %v5535_v15 = vadd.f32 %v2301_v52, %v2187_v59  ;;  %v2303_v60 = vpop.f32.mrb[41].mxu0  ;;  %v1862_v3 = vpop.xlane.xlu0 %1861  ;;  %v1777_v59 = vld [vmem:[#allocation4 + $0x58] sm:$0xff]  ;;  %v2189_v18 = vmul.f32 0.0, %v5456_v19 }
 0x476   : > { %v3810_v34 = vpop.eup %3809  ;;  %v1936_v40 = vadd.f32 %v1862_v3, %v1808_v23  ;;  %v1853_v50 = vpop.xlane.xlu1 %1852  ;;  %3813 = vrcp.f32 %v2541_v0  ;;  %v1812_v23 = vmul.f32 %v5240_v13, %v1780_v16 }
 0x477   : > { %v1933_v5 = vadd.f32 %v1853_v50, %v1805_v47  ;;  %2642 = vperm.xlu0 %3615, %v3810_v34   ;;  %v2545_v0 = vld [vmem:[#allocation4 + $0x30] sm:$0xff]  ;;  %v1809_v47 = vmul.f32 %v5219_v63, %v1777_v59  ;;  %v2191_v59 = vmul.f32 0.0, %v5460_v46 }
 0x478   : > { %v2542_v44 = vld [vmem:[#allocation4 + $0x18] sm:$0xff]  ;;  %1969 = vst.msk [vmem:[#allocation4 + $0x50] sm:$0xff] %vm705_vm0, %v1936_v40  ;;  %v2306_v29 = vpop.f32.mrb[42].mxu0  ;;  %v1779_v40 = vld [vmem:[#allocation4 + $0x68] sm:$0xff] }
 0x479   : > { %3815 = vrcp.f32 %v2542_v44  ;;  %1966 = vst.msk [vmem:[#allocation4 + $0x38] sm:$0xff] %vm705_vm0, %v1933_v5  ;;  %v5542_v4 = vadd.f32 %v2306_v29, %v2188_v11  ;;  %v2308_v27 = vpop.f32.mrb[43].mxu0  ;;  %v1868_v20 = vpop.xlane.xlu0 %1867  ;;  %v1814_v44 = vmul.f32 %v5255_v22, %v1782_v33 }
 0x47a   : > { %v1938_v31 = vadd.f32 %v1868_v20, %v1810_v56  ;;  %v1859_v1 = vpop.xlane.xlu1 %1858  ;;  %3817 = vrcp.f32 %v2543_v57  ;;  %v1811_v27 = vmul.f32 %v5233_v42, %v1779_v40  ;;  %v2192_v40 = vmul.f32 0.0, %v5458_v36 }
 0x47b   : > { %v1935_v8 = vadd.f32 %v1859_v1, %v1807_v28  ;;  %v2547_v29 = vld [vmem:[#allocation4 + $0x40] sm:$0xff] }
 0x47c   : > { %v2544_v52 = vld [vmem:[#allocation4 + $0x28] sm:$0xff]  ;;  %1971 = vst.msk [vmem:[#allocation4 + $0x60] sm:$0xff] %vm705_vm0, %v1938_v31  ;;  %v2311_v17 = vpop.f32.mrb[44].mxu0  ;;  %v1781_v31 = vld [vmem:[#allocation4 + $0x78] sm:$0xff] }
 0x47d   : > { %3819 = vrcp.f32 %v2544_v52  ;;  %1968 = vst.msk [vmem:[#allocation4 + $0x48] sm:$0xff] %vm705_vm0, %v1935_v8  ;;  %v5549_v60 = vadd.f32 %v2311_v17, %v2189_v18  ;;  %v2313_v25 = vpop.f32.mrb[45].mxu0  ;;  %v1874_v3 = vpop.xlane.xlu0 %1873  ;;  %v1816_v52 = vmul.f32 %v5272_v10, %v1784_v21  ;;  %v1813_v46 = vmul.f32 %v5248_v45, %v1781_v31  ;;  %v1785_v21 = vld [vmem:[#allocation4 + $0x98] sm:$0xff] }
 0x47e   : > { %v1940_v19 = vadd.f32 %v1874_v3, %v1812_v23  ;;  %v1865_v34 = vpop.xlane.xlu1 %1864  ;;  %3821 = vrcp.f32 %v2545_v0  ;;  %v1786_v25 = vld [vmem:[#allocation4 + $0xa0] sm:$0xff] }
 0x47f   : > { %v3812_v50 = vpop.eup %3811  ;;  %v1937_v11 = vadd.f32 %v1865_v34, %v1809_v47  ;;  %v2549_v17 = vld [vmem:[#allocation4 + $0x50] sm:$0xff] }
 0x480   : > { %v2546_v13 = vld [vmem:[#allocation4 + $0x38] sm:$0xff]  ;;  %1973 = vst.msk [vmem:[#allocation4 + $0x70] sm:$0xff] %vm705_vm0, %v1940_v19  ;;  %v2316_v5 = vpop.f32.mrb[46].mxu0  ;;  %2637 = vperm.xlu1 %3616, %v3812_v50   ;;  %v3814_v20 = vpop.eup %3813  ;;  %v1783_v19 = vld [vmem:[#allocation4 + $0x88] sm:$0xff] }
 0x481   : > { %3823 = vrcp.f32 %v2546_v13  ;;  %1970 = vst.msk [vmem:[#allocation4 + $0x58] sm:$0xff] %vm705_vm0, %v1937_v11  ;;  %v5556_v63 = vadd.f32 %v2316_v5, %v2190_v41  ;;  %v2318_v56 = vpop.f32.mrb[47].mxu0  ;;  %v1880_v57 = vpop.xlane.xlu0 %1879  ;;  %v1818_v11 = vmul.f32 %v5284_v48, %v1786_v25  ;;  %v1815_v36 = vmul.f32 %v5265_v51, %v1783_v19 }
 0x482   : > { %v1942_v28 = vadd.f32 %v1880_v57, %v1814_v44  ;;  %v1871_v16 = vpop.xlane.xlu1 %1870  ;;  %3825 = vrcp.f32 %v2547_v29  ;;  %v1788_v29 = vld [vmem:[#allocation4 + $0xb0] sm:$0xff]  ;;  %v2194_v25 = vmul.f32 0.0, %v5465_v12 }
 0x483   : > { %v3816_v1 = vpop.eup %3815  ;;  %v1939_v18 = vadd.f32 %v1871_v16, %v1811_v27  ;;  %v2551_v13 = vld [vmem:[#allocation4 + $0x60] sm:$0xff] }
 0x484   : > { %v2548_v22 = vld [vmem:[#allocation4 + $0x48] sm:$0xff]  ;;  %1975 = vst.msk [vmem:[#allocation4 + $0x80] sm:$0xff] %vm705_vm0, %v1942_v28  ;;  %v2321_v8 = vpop.f32.mrb[48].mxu0  ;;  %2647 = vperm.xlu1 %3616, %v3814_v20   ;;  %2652 = vperm.xlu0 %3615, %v3816_v1   ;;  %v3818_v3 = vpop.eup %3817  ;;  %v2193_v28 = vmul.f32 0.0, %v5467_v9  ;;  %v1820_v1 = vmul.f32 %v5303_v26, %v1788_v29  ;;  %v1817_v9 = vmul.f32 %v5277_v43, %v1785_v21 }
 0x485   : > { %3827 = vrcp.f32 %v2548_v22  ;;  %1972 = vst.msk [vmem:[#allocation4 + $0x68] sm:$0xff] %vm705_vm0, %v1939_v18  ;;  %v5563_v42 = vadd.f32 %v2321_v8, %v2191_v59  ;;  %v2323_v23 = vpop.f32.mrb[49].mxu0  ;;  %v1886_v0 = vpop.xlane.xlu0 %1885  ;;  %v1790_v8 = vld [vmem:[#allocation4 + $0xc0] sm:$0xff] }
 0x486   : > { %v1944_v47 = vadd.f32 %v1886_v0, %v1816_v52  ;;  %v1877_v33 = vpop.xlane.xlu1 %1876  ;;  %3829 = vrcp.f32 %v2549_v17  ;;  %v1787_v0 = vld [vmem:[#allocation4 + $0xa8] sm:$0xff] }
 0x487   : > { %v3820_v34 = vpop.eup %3819  ;;  %v1941_v50 = vadd.f32 %v1877_v33, %v1813_v46  ;;  %v2553_v59 = vld [vmem:[#allocation4 + $0x70] sm:$0xff]  ;;  %v1822_v33 = vmul.f32 %v5313_v53, %v1790_v8  ;;  %v1819_v12 = vmul.f32 %v5296_v58, %v1787_v0 }
 0x488   : > { %v2550_v10 = vld [vmem:[#allocation4 + $0x58] sm:$0xff]  ;;  %1977 = vst.msk [vmem:[#allocation4 + $0x90] sm:$0xff] %vm705_vm0, %v1944_v47  ;;  %v2326_v41 = vpop.f32.mrb[50].mxu0  ;;  %2657 = vperm.xlu1 %3616, %v3818_v3   ;;  %2662 = vperm.xlu0 %3615, %v3820_v34   ;;  %v3822_v56 = vpop.eup %3821  ;;  %v1796_v0 = vld [vmem:[#allocation4 + $0xf0] sm:$0xff] }
 0x489   : > { %3831 = vrcp.f32 %v2550_v10  ;;  %1974 = vst.msk [vmem:[#allocation4 + $0x78] sm:$0xff] %vm705_vm0, %v1941_v50  ;;  %v5570_v45 = vadd.f32 %v2326_v41, %v2192_v40  ;;  %v2328_v5 = vpop.f32.mrb[51].mxu0  ;;  %v1892_v44 = vpop.xlane.xlu0 %1891  ;;  %v1792_v50 = vld [vmem:[#allocation4 + $0xd0] sm:$0xff] }
 0x48a   : > { %v1946_v57 = vadd.f32 %v1892_v44, %v1818_v11  ;;  %v1883_v27 = vpop.xlane.xlu1 %1882  ;;  %3833 = vrcp.f32 %v2551_v13  ;;  %v1789_v13 = vld [vmem:[#allocation4 + $0xb8] sm:$0xff]  ;;  %v2195_v44 = vmul.f32 0.0, %v5471_v6 }
 0x48b   : > { %v3824_v20 = vpop.eup %3823  ;;  %v1943_v16 = vadd.f32 %v1883_v27, %v1815_v36  ;;  %v2555_v19 = vld [vmem:[#allocation4 + $0x80] sm:$0xff]  ;;  %v1821_v6 = vmul.f32 %v5310_v61, %v1789_v13 }
 0x48c   : > { %v2552_v48 = vld [vmem:[#allocation4 + $0x68] sm:$0xff]  ;;  %1979 = vst.msk [vmem:[#allocation4 + $0xa0] sm:$0xff] %vm705_vm0, %v1946_v57  ;;  %v2331_v31 = vpop.f32.mrb[52].mxu0  ;;  %2667 = vperm.xlu1 %3616, %v3822_v56   ;;  %2672 = vperm.xlu0 %3615, %v3824_v20   ;;  %v3826_v52 = vpop.eup %3825  ;;  %v1824_v56 = vmul.f32 %v5328_v54, %v1792_v50  ;;  %v1794_v20 = vld [vmem:[#allocation4 + $0xe0] sm:$0xff] }
 0x48d   : > { %3835 = vrcp.f32 %v2552_v48  ;;  %1976 = vst.msk [vmem:[#allocation4 + $0x88] sm:$0xff] %vm705_vm0, %v1943_v16  ;;  %v5577_v51 = vadd.f32 %v2331_v31, %v2193_v28  ;;  %v2333_v18 = vpop.f32.mrb[53].mxu0  ;;  %v1898_v22 = vpop.xlane.xlu0 %1897  ;;  %v1791_v31 = vld [vmem:[#allocation4 + $0xc8] sm:$0xff]  ;;  %v6148_v13 = vld [vmem:[#allocation25_spill] sm:$0xff] }
 0x48e   : > { %v1948_v17 = vadd.f32 %v1898_v22, %v1820_v1  ;;  %v1889_v23 = vpop.xlane.xlu1 %1888  ;;  %3837 = vrcp.f32 %v2553_v59  ;;  %v2196_v59 = vmul.f32 0.0, %v5469_v24 }
 0x48f   : > { %v3828_v46 = vpop.eup %3827  ;;  %v1945_v3 = vadd.f32 %v1889_v23, %v1817_v9  ;;  %v2557_v57 = vld [vmem:[#allocation4 + $0x90] sm:$0xff]  ;;  %v1826_v9 = vmul.f32 %v5338_v62, %v1794_v20  ;;  %v6146_v23 = vld [vmem:[#allocation81_spill] sm:$0xff] }
 0x490   : > { %v2554_v26 = vld [vmem:[#allocation4 + $0x78] sm:$0xff]  ;;  %1981 = vst.msk [vmem:[#allocation4 + $0xb0] sm:$0xff] %vm705_vm0, %v1948_v17  ;;  %v2336_v47 = vpop.f32.mrb[54].mxu0  ;;  %2677 = vperm.xlu1 %3616, %v3826_v52   ;;  %2682 = vperm.xlu0 %3615, %v3828_v46   ;;  %v3830_v10 = vpop.eup %3829  ;;  %v1823_v24 = vmul.f32 %v6146_v23, %v1791_v31 }
 0x491   : > { %3839 = vrcp.f32 %v2554_v26  ;;  %1978 = vst.msk [vmem:[#allocation4 + $0x98] sm:$0xff] %vm705_vm0, %v1945_v3  ;;  %v5584_v43 = vadd.f32 %v2336_v47, %v2194_v25  ;;  %v2338_v34 = vpop.f32.mrb[55].mxu0  ;;  %v1904_v40 = vpop.xlane.xlu0 %1903  ;;  %v1793_v26 = vld [vmem:[#allocation4 + $0xd8] sm:$0xff] }
 0x492   : > { %v1950_v41 = vadd.f32 %v1904_v40, %v1822_v33  ;;  %v1895_v11 = vpop.xlane.xlu1 %1894  ;;  %3841 = vrcp.f32 %v2555_v19  ;;  %v2197_v33 = vmul.f32 0.0, %v5475_v2  ;;  %v6147_v40 = vld [vmem:[#allocation79_spill] sm:$0xff]  ;;  %v1825_v2 = vmul.f32 %v6148_v13, %v1793_v26 }
 0x493   : > { %v3832_v5 = vpop.eup %3831  ;;  %v1947_v36 = vadd.f32 %v1895_v11, %v1819_v12  ;;  %v2559_v8 = vld [vmem:[#allocation4 + $0xa0] sm:$0xff]  ;;  %v1828_v12 = vmul.f32 %v6147_v40, %v1796_v0 }
 0x494   : > { %v2556_v53 = vld [vmem:[#allocation4 + $0x88] sm:$0xff]  ;;  %1983 = vst.msk [vmem:[#allocation4 + $0xc0] sm:$0xff] %vm705_vm0, %v1950_v41  ;;  %v2341_v29 = vpop.f32.mrb[56].mxu0  ;;  %2687 = vperm.xlu1 %3616, %v3830_v10   ;;  %2692 = vperm.xlu0 %3615, %v3832_v5   ;;  %v3834_v28 = vpop.eup %3833 }
 0x495   : > { %3843 = vrcp.f32 %v2556_v53  ;;  %1980 = vst.msk [vmem:[#allocation4 + $0xa8] sm:$0xff] %vm705_vm0, %v1947_v36  ;;  %v5591_v58 = vadd.f32 %v2341_v29, %v2195_v44  ;;  %v2343_v27 = vpop.f32.mrb[57].mxu0  ;;  %v1910_v21 = vpop.xlane.xlu0 %1909  ;;  %v1795_v53 = vld [vmem:[#allocation4 + $0xe8] sm:$0xff] }
 0x496   : > { %v1952_v16 = vadd.f32 %v1910_v21, %v1824_v56  ;;  %v1901_v48 = vpop.xlane.xlu1 %1900  ;;  %3845 = vrcp.f32 %v2557_v57  ;;  %v2198_v56 = vmul.f32 0.0, %v5473_v38  ;;  %v1797_v38 = vld [vmem:[#allocation4 + $0xf8] sm:$0xff] }
 0x497   : > { %v3836_v1 = vpop.eup %3835  ;;  %v1949_v18 = vadd.f32 %v1901_v48, %v1821_v6  ;;  %v2561_v50 = vld [vmem:[#allocation4 + $0xb0] sm:$0xff]  ;;  %v1829_v23 = vmul.f32 %v5462_v30, %v1797_v38 }
 0x498   : > { %v2558_v54 = vld [vmem:[#allocation4 + $0x98] sm:$0xff]  ;;  %1985 = vst.msk [vmem:[#allocation4 + $0xd0] sm:$0xff] %vm705_vm0, %v1952_v16  ;;  %v2346_v22 = vpop.f32.mrb[58].mxu0  ;;  %2697 = vperm.xlu1 %3616, %v3834_v28   ;;  %2702 = vperm.xlu0 %3615, %v3836_v1   ;;  %v3838_v46 = vpop.eup %3837  ;;  %v6149_v16 = vld [vmem:[#allocation26_spill] sm:$0xff] }
 0x499   : > { %3847 = vrcp.f32 %v2558_v54  ;;  %1982 = vst.msk [vmem:[#allocation4 + $0xb8] sm:$0xff] %vm705_vm0, %v1949_v18  ;;  %v5598_v61 = vadd.f32 %v2346_v22, %v2196_v59  ;;  %v2348_v52 = vpop.f32.mrb[59].mxu0  ;;  %v1916_v17 = vpop.xlane.xlu0 %1915  ;;  %v1827_v48 = vmul.f32 %v6149_v16, %v1795_v53  ;;  %v2199_v18 = vmul.f32 0.0, %v5479_v49 }
 0x49a   : > { %v1954_v25 = vadd.f32 %v1916_v17, %v1826_v9  ;;  %v1907_v3 = vpop.xlane.xlu1 %1906  ;;  %3849 = vrcp.f32 %v2559_v8  ;;  %v2200_v49 = vmul.f32 0.0, %v5477_v37 }
 0x49b   : > { %v3840_v47 = vpop.eup %3839  ;;  %v1951_v19 = vadd.f32 %v1907_v3, %v1823_v24  ;;  %v2563_v6 = vld [vmem:[#allocation4 + $0xc0] sm:$0xff] }
 0x49c   : > { %v2560_v62 = vld [vmem:[#allocation4 + $0xa8] sm:$0xff]  ;;  %1987 = vst.msk [vmem:[#allocation4 + $0xe0] sm:$0xff] %vm705_vm0, %v1954_v25  ;;  %v2351_v34 = vpop.f32.mrb[60].mxu0  ;;  %2707 = vperm.xlu1 %3616, %v3838_v46   ;;  %2712 = vperm.xlu0 %3615, %v3840_v47   ;;  %v3842_v5 = vpop.eup %3841 }
 0x49d   : > { %3851 = vrcp.f32 %v2560_v62  ;;  %1984 = vst.msk [vmem:[#allocation4 + $0xc8] sm:$0xff] %vm705_vm0, %v1951_v19  ;;  %v5605_v10 = vadd.f32 %v2351_v34, %v2197_v33  ;;  %v2353_v41 = vpop.f32.mrb[61].mxu0  ;;  %v1922_v11 = vpop.xlane.xlu0 %1921  ;;  %v2201_v34 = vmul.f32 0.0, %v5483_v55 }
 0x49e   : > { %v1956_v44 = vadd.f32 %v1922_v11, %v1828_v12  ;;  %v1913_v36 = vpop.xlane.xlu1 %1912  ;;  %3853 = vrcp.f32 %v2561_v50 }
 0x49f   : > { %v3844_v29 = vpop.eup %3843  ;;  %v1953_v57 = vadd.f32 %v1913_v36, %v1825_v2  ;;  %v2565_v8 = vld [vmem:[#allocation4 + $0xd0] sm:$0xff]  ;;  %v2202_v2 = vmul.f32 0.0, %v5481_v7 }
 0x4a0   : > { %v2562_v27 = vld [vmem:[#allocation4 + $0xb8] sm:$0xff]  ;;  %1989 = vst.msk [vmem:[#allocation4 + $0xf0] sm:$0xff] %vm705_vm0, %v1956_v44  ;;  %v2356_v21 = vpop.f32.mrb[62].mxu0  ;;  %2717 = vperm.xlu1 %3616, %v3842_v5   ;;  %2722 = vperm.xlu0 %3615, %v3844_v29   ;;  %v3846_v31 = vpop.eup %3845 }
 0x4a1   : > { %3855 = vrcp.f32 %v2562_v27  ;;  %1986 = vst.msk [vmem:[#allocation4 + $0xd8] sm:$0xff] %vm705_vm0, %v1953_v57  ;;  %v5611_v20 = vadd.f32 %v2356_v21, %v2198_v56  ;;  %v2358_v28 = vpop.f32.mrb[63].mxu0  ;;  %v2203_v56 = vmul.f32 0.0, %v5487_v39 }
 0x4a2   : > { %v1919_v1 = vpop.xlane.xlu1 %1918  ;;  %3857 = vrcp.f32 %v2563_v6  ;;  %v6150_v28 = vld [vmem:[#allocation80_spill] sm:$0xff] }
 0x4a3   : > { %v3848_v59 = vpop.eup %3847  ;;  %v1955_v54 = vadd.f32 %v1919_v1, %v1827_v48  ;;  %v2567_v47 = vld [vmem:[#allocation4 + $0xe0] sm:$0xff]  ;;  %v2204_v16 = vmul.f32 0.0, %v6150_v28 }
 0x4a4   : > { %v2564_v22 = vld [vmem:[#allocation4 + $0xc8] sm:$0xff]  ;;  %v2361_v9 = vpop.f32.mrb[64].mxu0  ;;  %2727 = vperm.xlu1 %3616, %v3846_v31   ;;  %2732 = vperm.xlu0 %3615, %v3848_v59   ;;  %v3850_v24 = vpop.eup %3849 }
 0x4a5   : > { %3859 = vrcp.f32 %v2564_v22  ;;  %1988 = vst.msk [vmem:[#allocation4 + $0xe8] sm:$0xff] %vm705_vm0, %v1955_v54  ;;  %v5616_v52 = vadd.f32 %v2361_v9, %v2199_v18  ;;  %v2363_v17 = vpop.f32.mrb[65].mxu0  ;;  %v6151_v18 = vld [vmem:[#allocation82_spill] sm:$0xff] }
 0x4a6   : > { %v1925_v0 = vpop.xlane.xlu1 %1924  ;;  %3861 = vrcp.f32 %v2565_v8  ;;  %v2205_v39 = vmul.f32 0.0, %v6151_v18  ;;  %v6152_v8 = vld [vmem:[#allocation83_spill] sm:$0xff] }
 0x4a7   : > { %v3852_v46 = vpop.eup %3851  ;;  %v1957_v25 = vadd.f32 %v1925_v0, %v1829_v23  ;;  %v2569_v12 = vld [vmem:[#allocation4 + $0xf0] sm:$0xff]  ;;  %v2206_v17 = vmul.f32 0.0, %v6152_v8  ;;  %v5664_v8 = vpop.permute.xlu0 %2180 }
 0x4a8   : > { %v2566_v3 = vld [vmem:[#allocation4 + $0xd8] sm:$0xff]  ;;  %v2366_v26 = vpop.f32.mrb[66].mxu0  ;;  %2737 = vperm.xlu1 %3616, %v3850_v24   ;;  %2742 = vperm.xlu0 %3615, %v3852_v46   ;;  %v3854_v62 = vpop.eup %3853 }
 0x4a9   : > { %3863 = vrcp.f32 %v2566_v3  ;;  %1990 = vst.msk [vmem:[#allocation4 + $0xf8] sm:$0xff] %vm705_vm0, %v1957_v25  ;;  %v5621_v33 = vadd.f32 %v2366_v26, %v2200_v49  ;;  %v2368_v19 = vpop.f32.mrb[67].mxu0  ;;  %v6153_v46 = vld [vmem:[#allocation84_spill] sm:$0xff] }
 0x4aa   : > { %3865 = vrcp.f32 %v2567_v47  ;;  %v2207_v49 = vmul.f32 0.0, %v6153_v46  ;;  %v6154_v47 = vld [vmem:[#allocation85_spill] sm:$0xff]  ;;  %v2867_v46 = vld [vmem:[%s4380_s27 + $0x8] sm:$0xff] }
 0x4ab   : > { %v3856_v30 = vpop.eup %3855  ;;  %v2208_v19 = vmul.f32 0.0, %v6154_v47  ;;  %v6160_v47 = vld [vmem:[#allocation29_spill] sm:$0xff] }
 0x4ac   : > { %v2568_v40 = vld [vmem:[#allocation4 + $0xe8] sm:$0xff]  ;;  %v2371_v37 = vpop.f32.mrb[68].mxu0  ;;  %2747 = vperm.xlu1 %3616, %v3854_v62   ;;  %2752 = vperm.xlu0 %3615, %v3856_v30   ;;  %v3858_v11 = vpop.eup %3857 }
 0x4ad   : > { %3867 = vrcp.f32 %v2568_v40  ;;  %v5624_v50 = vadd.f32 %v2371_v37, %v2201_v34  ;;  %v2373_v41 = vpop.f32.mrb[69].mxu0  ;;  %v6155_v40 = vld [vmem:[#allocation28_spill] sm:$0xff] }
 0x4ae   : > { %3869 = vrcp.f32 %v2569_v12  ;;  %v2209_v37 = vmul.f32 0.0, %v6155_v40 }
 0x4af   : > { %v3860_v13 = vpop.eup %3859 }
 0x4b0   : > { %v2570_v5 = vld [vmem:[#allocation4 + $0xf8] sm:$0xff]  ;;  %v2376_v44 = vpop.f32.mrb[70].mxu0  ;;  %2757 = vperm.xlu1 %3616, %v3858_v11   ;;  %2762 = vperm.xlu0 %3615, %v3860_v13   ;;  %v3862_v53 = vpop.eup %3861  ;;  %v6156_v13 = vld [vmem:[#allocation27_spill] sm:$0xff] }
 0x4b1   : > { %3871 = vrcp.f32 %v2570_v5  ;;  %v5627_v55 = vadd.f32 %v2376_v44, %v2202_v2  ;;  %v2378_v36 = vpop.f32.mrb[71].mxu0  ;;  %v2210_v2 = vmul.f32 0.0, %v6156_v13  ;;  %v2869_v13 = vld [vmem:[%s4380_s27 + $0x18] sm:$0xff] }
 0x4b3   : > { %v3864_v29 = vpop.eup %3863 }
 0x4b4   : > { %v2381_v57 = vpop.f32.mrb[72].mxu0  ;;  %2767 = vperm.xlu1 %3616, %v3862_v53   ;;  %2772 = vperm.xlu0 %3615, %v3864_v29   ;;  %v3866_v7 = vpop.eup %3865  ;;  %v6157_v53 = vld [vmem:[#allocation86_spill] sm:$0xff] }
 0x4b5   : > { %v5630_v27 = vadd.f32 %v2381_v57, %v2203_v56  ;;  %v2383_v21 = vpop.f32.mrb[73].mxu0  ;;  %v2211_v29 = vmul.f32 0.0, %v6157_v53 }
 0x4b7   : > { %v3868_v6 = vpop.eup %3867 }
 0x4b8   : > { %v2386_v48 = vpop.f32.mrb[74].mxu0  ;;  %2777 = vperm.xlu1 %3616, %v3866_v7   ;;  %2782 = vperm.xlu0 %3615, %v3868_v6   ;;  %v3870_v38 = vpop.eup %3869  ;;  %v6158_v7 = vld [vmem:[#allocation87_spill] sm:$0xff] }
 0x4b9   : > { %v5633_v31 = vadd.f32 %v2386_v48, %v2204_v16  ;;  %v2388_v1 = vpop.f32.mrb[75].mxu0  ;;  %v2212_v6 = vmul.f32 0.0, %v6158_v7 }
 0x4ba   : > { %v6159_v1 = vld [vmem:[#allocation30_spill] sm:$0xff] }
 0x4bb   : > { %v3872_v59 = vpop.eup %3871 }
 0x4bc   : > { %v2391_v54 = vpop.f32.mrb[76].mxu0  ;;  %2787 = vperm.xlu1 %3616, %v3870_v38   ;;  %2792 = vperm.xlu0 %3615, %v3872_v59   ;;  %v2213_v38 = vmul.f32 0.0, %v6159_v1 }
 0x4bd   : > { %v5636_v22 = vadd.f32 %v2391_v54, %v2205_v39  ;;  %v2393_v9 = vpop.f32.mrb[77].mxu0 }
 0x4c0   : > { %v2396_v23 = vpop.f32.mrb[78].mxu0 }
 0x4c1   : > { %v5639_v24 = vadd.f32 %v2396_v23, %v2206_v17  ;;  %v2398_v0 = vpop.f32.mrb[79].mxu0  ;;  %v5669_v17 = vld [vmem:[%s5864_s5] ss:$0 sm:$0xff] }
 0x4c4   : > { %v2401_v25 = vpop.f32.mrb[80].mxu0 }
 0x4c5   : > { %v5642_v3 = vadd.f32 %v2401_v25, %v2207_v49  ;;  %v2403_v26 = vpop.f32.mrb[81].mxu0 }
 0x4c8   : > { %v2406_v62 = vpop.f32.mrb[82].mxu0 }
 0x4c9   : > { %v5645_v30 = vadd.f32 %v2406_v62, %v2208_v19  ;;  %v2408_v34 = vpop.f32.mrb[83].mxu0  ;;  %v2866_v62 = vld [vmem:[%s4380_s27] sm:$0xff] }
 0x4cc   : > { %v2411_v12 = vpop.f32.mrb[84].mxu0 }
 0x4cd   : > { %v5648_v41 = vadd.f32 %v2411_v12, %v2209_v37  ;;  %v2413_v11 = vpop.f32.mrb[85].mxu0 }
 0x4d0   : > { %v2416_v5 = vpop.f32.mrb[86].mxu0 }
 0x4d1   : > { %v5651_v44 = vadd.f32 %v2416_v5, %v2210_v2  ;;  %v2418_v36 = vpop.f32.mrb[87].mxu0  ;;  %v2868_v2 = vld [vmem:[%s4380_s27 + $0x10] sm:$0xff] }
 0x4d4   : > { %v2421_v56 = vpop.f32.mrb[64].mxu1 }
 0x4d5   : > { %v5654_v57 = vadd.f32 %v2421_v56, %v2211_v29  ;;  %v2423_v21 = vpop.f32.mrb[65].mxu1 }
 0x4d8   : > { %v2426_v28 = vpop.f32.mrb[66].mxu1 }
 0x4d9   : > { %v5657_v16 = vadd.f32 %v2426_v28, %v2212_v6  ;;  %v2428_v48 = vpop.f32.mrb[67].mxu1  ;;  %v2870_v6 = vld [vmem:[%s4380_s27 + $0x20] sm:$0xff] }
 0x4dd   : > { %v2431_v59 = vpop.f32.mrb[68].mxu1 }
 0x4de   : > { %v5660_v18 = vadd.f32 %v2431_v59, %v2213_v38  ;;  %v2433_v39 = vpop.f32.mrb[69].mxu1 }
 0x4e1   : > { %v5662_v54 = vpop.f32.mrb[70].mxu1 }
 0x4e2   : > { %v2438_v9 = vpop.f32.mrb[71].mxu1 }
 0x4e3   : > { %v2873_v9 = vld [vmem:[%s4380_s27 + $0x38] sm:$0xff] }
 0x4f6   : > { %v2643_v23 = vpop.permute.xlu0 %2642 }
 0x4f7   : > { %v2796_v0 = vmul.f32 %v2643_v23, %v5515_v14  ;;  %v2872_v23 = vld [vmem:[%s4380_s27 + $0x30] sm:$0xff] }
 0x4f9   : > { %v2835_v49 = vadd.f32 %v5669_v17, %v2796_v0 }
 0x4fb   : > { %v2899_v25 = vadd.f32 %v2867_v46, %v2835_v49 }
 0x4fd   : > { %2931 = vst [vmem:[%s5675_s13 + $0x8] sm:$0xff] %v2899_v25 }
 0x4ff   : > { %v2638_v26 = vpop.permute.xlu1 %2637 }
 0x500   : > { %v2795_v19 = vmul.f32 %v2638_v26, %v6160_v47 }
 0x502   : > { %v2834_v34 = vadd.f32 %v5669_v17, %v2795_v19  ;;  %v2875_v19 = vld [vmem:[%s4380_s27 + $0x48] sm:$0xff] }
 0x503   : > { %v2653_v40 = vpop.permute.xlu0 %2652  ;;  %v2648_v37 = vpop.permute.xlu1 %2647 }
 0x504   : > { %v2898_v14 = vadd.f32 %v2866_v62, %v2834_v34  ;;  %v2798_v12 = vmul.f32 %v2653_v40, %v5528_v32  ;;  %v2797_v11 = vmul.f32 %v2648_v37, %v5521_v35  ;;  %v2871_v35 = vld [vmem:[%s4380_s27 + $0x28] sm:$0xff]  ;;  %v2874_v62 = vld [vmem:[%s4380_s27 + $0x40] sm:$0xff] }
 0x506   : > { %2930 = vst [vmem:[%s5675_s13] sm:$0xff] %v2898_v14  ;;  %v2837_v5 = vadd.f32 %v5669_v17, %v2798_v12  ;;  %v2836_v36 = vadd.f32 %v5669_v17, %v2797_v11 }
 0x507   : > { %v2663_v53 = vpop.permute.xlu0 %2662  ;;  %v2658_v29 = vpop.permute.xlu1 %2657 }
 0x508   : > { %v2901_v56 = vadd.f32 %v2869_v13, %v2837_v5  ;;  %v2900_v21 = vadd.f32 %v2868_v2, %v2836_v36  ;;  %v2800_v7 = vmul.f32 %v2663_v53, %v5542_v4  ;;  %v2799_v32 = vmul.f32 %v2658_v29, %v5535_v15  ;;  %v2877_v13 = vld [vmem:[%s4380_s27 + $0x58] sm:$0xff]  ;;  %v2876_v2 = vld [vmem:[%s4380_s27 + $0x50] sm:$0xff] }
 0x50a   : > { %2933 = vst [vmem:[%s5675_s13 + $0x18] sm:$0xff] %v2901_v56  ;;  %2932 = vst [vmem:[%s5675_s13 + $0x10] sm:$0xff] %v2900_v21  ;;  %v2839_v28 = vadd.f32 %v5669_v17, %v2800_v7  ;;  %v2838_v48 = vadd.f32 %v5669_v17, %v2799_v32  ;;  %v2879_v7 = vld [vmem:[%s4380_s27 + $0x68] sm:$0xff]  ;;  %v2878_v32 = vld [vmem:[%s4380_s27 + $0x60] sm:$0xff] }
 0x50b   : > { %v2673_v1 = vpop.permute.xlu0 %2672  ;;  %v2668_v38 = vpop.permute.xlu1 %2667 }
 0x50c   : > { %v2903_v59 = vadd.f32 %v2871_v35, %v2839_v28  ;;  %v2902_v39 = vadd.f32 %v2870_v6, %v2838_v48  ;;  %v2802_v4 = vmul.f32 %v2673_v1, %v5556_v63  ;;  %v2801_v15 = vmul.f32 %v2668_v38, %v5549_v60 }
 0x50e   : > { %2935 = vst [vmem:[%s5675_s13 + $0x28] sm:$0xff] %v2903_v59  ;;  %2934 = vst [vmem:[%s5675_s13 + $0x20] sm:$0xff] %v2902_v39  ;;  %v2841_v0 = vadd.f32 %v5669_v17, %v2802_v4  ;;  %v2840_v46 = vadd.f32 %v5669_v17, %v2801_v15  ;;  %v2881_v59 = vld [vmem:[%s4380_s27 + $0x78] sm:$0xff]  ;;  %v2880_v39 = vld [vmem:[%s4380_s27 + $0x70] sm:$0xff] }
 0x50f   : > { %v2683_v49 = vpop.permute.xlu0 %2682  ;;  %v2678_v25 = vpop.permute.xlu1 %2677 }
 0x510   : > { %v2905_v26 = vadd.f32 %v2873_v9, %v2841_v0  ;;  %v2904_v47 = vadd.f32 %v2872_v23, %v2840_v46  ;;  %v2804_v63 = vmul.f32 %v2683_v49, %v5570_v45  ;;  %v2803_v60 = vmul.f32 %v2678_v25, %v5563_v42  ;;  %v2883_v49 = vld [vmem:[%s4380_s27 + $0x88] sm:$0xff]  ;;  %v2882_v25 = vld [vmem:[%s4380_s27 + $0x80] sm:$0xff] }
 0x512   : > { %2937 = vst [vmem:[%s5675_s13 + $0x38] sm:$0xff] %v2905_v26  ;;  %2936 = vst [vmem:[%s5675_s13 + $0x30] sm:$0xff] %v2904_v47  ;;  %v2843_v34 = vadd.f32 %v5669_v17, %v2804_v63  ;;  %v2842_v40 = vadd.f32 %v5669_v17, %v2803_v60 }
 0x513   : > { %v2693_v37 = vpop.permute.xlu0 %2692  ;;  %v2688_v14 = vpop.permute.xlu1 %2687 }
 0x514   : > { %v2907_v12 = vadd.f32 %v2875_v19, %v2843_v34  ;;  %v2906_v11 = vadd.f32 %v2874_v62, %v2842_v40  ;;  %v2806_v45 = vmul.f32 %v2693_v37, %v5584_v43  ;;  %v2805_v42 = vmul.f32 %v2688_v14, %v5577_v51  ;;  %v2885_v34 = vld [vmem:[%s4380_s27 + $0x98] sm:$0xff]  ;;  %v2884_v40 = vld [vmem:[%s4380_s27 + $0x90] sm:$0xff] }
 0x516   : > { %2939 = vst [vmem:[%s5675_s13 + $0x48] sm:$0xff] %v2907_v12  ;;  %2938 = vst [vmem:[%s5675_s13 + $0x40] sm:$0xff] %v2906_v11  ;;  %v2845_v5 = vadd.f32 %v5669_v17, %v2806_v45  ;;  %v2844_v36 = vadd.f32 %v5669_v17, %v2805_v42 }
 0x517   : > { %v2703_v53 = vpop.permute.xlu0 %2702  ;;  %v2698_v29 = vpop.permute.xlu1 %2697 }
 0x518   : > { %v2909_v56 = vadd.f32 %v2877_v13, %v2845_v5  ;;  %v2908_v21 = vadd.f32 %v2876_v2, %v2844_v36  ;;  %v2808_v43 = vmul.f32 %v2703_v53, %v5598_v61  ;;  %v2807_v51 = vmul.f32 %v2698_v29, %v5591_v58  ;;  %v2887_v13 = vld [vmem:[%s4380_s27 + $0xa8] sm:$0xff]  ;;  %v2886_v2 = vld [vmem:[%s4380_s27 + $0xa0] sm:$0xff] }
 0x51a   : > { %2941 = vst [vmem:[%s5675_s13 + $0x58] sm:$0xff] %v2909_v56  ;;  %2940 = vst [vmem:[%s5675_s13 + $0x50] sm:$0xff] %v2908_v21  ;;  %v2847_v35 = vadd.f32 %v5669_v17, %v2808_v43  ;;  %v2846_v6 = vadd.f32 %v5669_v17, %v2807_v51  ;;  %v2889_v43 = vld [vmem:[%s4380_s27 + $0xb8] sm:$0xff]  ;;  %v2888_v51 = vld [vmem:[%s4380_s27 + $0xb0] sm:$0xff] }
 0x51b   : > { %v2713_v28 = vpop.permute.xlu0 %2712  ;;  %v2708_v48 = vpop.permute.xlu1 %2707 }
 0x51c   : > { %v2911_v1 = vadd.f32 %v2879_v7, %v2847_v35  ;;  %v2910_v38 = vadd.f32 %v2878_v32, %v2846_v6  ;;  %v2810_v61 = vmul.f32 %v2713_v28, %v5611_v20  ;;  %v2809_v58 = vmul.f32 %v2708_v48, %v5605_v10 }
 0x51e   : > { %2943 = vst [vmem:[%s5675_s13 + $0x68] sm:$0xff] %v2911_v1  ;;  %2942 = vst [vmem:[%s5675_s13 + $0x60] sm:$0xff] %v2910_v38  ;;  %v2849_v4 = vadd.f32 %v5669_v17, %v2810_v61  ;;  %v2848_v15 = vadd.f32 %v5669_v17, %v2809_v58  ;;  %v2891_v1 = vld [vmem:[%s4380_s27 + $0xc8] sm:$0xff]  ;;  %v2890_v38 = vld [vmem:[%s4380_s27 + $0xc0] sm:$0xff] }
 0x51f   : > { %v2723_v9 = vpop.permute.xlu0 %2722  ;;  %v2718_v23 = vpop.permute.xlu1 %2717 }
 0x520   : > { %v2913_v0 = vadd.f32 %v2881_v59, %v2849_v4  ;;  %v2912_v46 = vadd.f32 %v2880_v39, %v2848_v15  ;;  %v2812_v20 = vmul.f32 %v2723_v9, %v5621_v33  ;;  %v2811_v10 = vmul.f32 %v2718_v23, %v5616_v52  ;;  %v2892_v23 = vld [vmem:[%s4380_s27 + $0xd0] sm:$0xff] }
 0x522   : > { %2945 = vst [vmem:[%s5675_s13 + $0x78] sm:$0xff] %v2913_v0  ;;  %2944 = vst [vmem:[%s5675_s13 + $0x70] sm:$0xff] %v2912_v46  ;;  %v2851_v26 = vadd.f32 %v5669_v17, %v2812_v20  ;;  %v2850_v47 = vadd.f32 %v5669_v17, %v2811_v10  ;;  %v2214_v20 = vmul.f32 0.0, %v5664_v8 }
 0x523   : > { %v2733_v63 = vpop.permute.xlu0 %2732  ;;  %v2728_v60 = vpop.permute.xlu1 %2727 }
 0x524   : > { %v2915_v19 = vadd.f32 %v2883_v49, %v2851_v26  ;;  %v2914_v62 = vadd.f32 %v2882_v25, %v2850_v47  ;;  %v2814_v33 = vmul.f32 %v2733_v63, %v5627_v55  ;;  %v2813_v52 = vmul.f32 %v2728_v60, %v5624_v50  ;;  %v2895_v47 = vld [vmem:[%s4380_s27 + $0xe8] sm:$0xff]  ;;  %v2894_v63 = vld [vmem:[%s4380_s27 + $0xe0] sm:$0xff] }
 0x525   : > { %v2471_v60 = vadd.f32 %v5662_v54, %v2214_v20  ;;  %v2897_v54 = vld [vmem:[%s4380_s27 + $0xf8] sm:$0xff] }
 0x526   : > { %2947 = vst [vmem:[%s5675_s13 + $0x88] sm:$0xff] %v2915_v19  ;;  %2946 = vst [vmem:[%s5675_s13 + $0x80] sm:$0xff] %v2914_v62  ;;  %v2853_v37 = vadd.f32 %v5669_v17, %v2814_v33  ;;  %v2852_v14 = vadd.f32 %v5669_v17, %v2813_v52 }
 0x527   : > { %v2743_v12 = vpop.permute.xlu0 %2742  ;;  %v2738_v11 = vpop.permute.xlu1 %2737 }
 0x528   : > { %v2917_v45 = vadd.f32 %v2885_v34, %v2853_v37  ;;  %v2916_v42 = vadd.f32 %v2884_v40, %v2852_v14  ;;  %v2816_v55 = vmul.f32 %v2743_v12, %v5633_v31  ;;  %v2815_v50 = vmul.f32 %v2738_v11, %v5630_v27  ;;  %v2896_v40 = vld [vmem:[%s4380_s27 + $0xf0] sm:$0xff] }
 0x52a   : > { %2949 = vst [vmem:[%s5675_s13 + $0x98] sm:$0xff] %v2917_v45  ;;  %2948 = vst [vmem:[%s5675_s13 + $0x90] sm:$0xff] %v2916_v42  ;;  %v2855_v5 = vadd.f32 %v5669_v17, %v2816_v55  ;;  %v2854_v36 = vadd.f32 %v5669_v17, %v2815_v50 }
 0x52b   : > { %v2753_v53 = vpop.permute.xlu0 %2752  ;;  %v2748_v29 = vpop.permute.xlu1 %2747 }
 0x52c   : > { %v2919_v56 = vadd.f32 %v2887_v13, %v2855_v5  ;;  %v2918_v21 = vadd.f32 %v2886_v2, %v2854_v36  ;;  %v2818_v31 = vmul.f32 %v2753_v53, %v5639_v24  ;;  %v2817_v27 = vmul.f32 %v2748_v29, %v5636_v22 }
 0x52e   : > { %2951 = vst [vmem:[%s5675_s13 + $0xa8] sm:$0xff] %v2919_v56  ;;  %2950 = vst [vmem:[%s5675_s13 + $0xa0] sm:$0xff] %v2918_v21  ;;  %v2857_v7 = vadd.f32 %v5669_v17, %v2818_v31  ;;  %v2856_v32 = vadd.f32 %v5669_v17, %v2817_v27 }
 0x52f   : > { %v2763_v35 = vpop.permute.xlu0 %2762  ;;  %v2758_v6 = vpop.permute.xlu1 %2757 }
 0x530   : > { %v2921_v28 = vadd.f32 %v2889_v43, %v2857_v7  ;;  %v2920_v48 = vadd.f32 %v2888_v51, %v2856_v32  ;;  %v2820_v24 = vmul.f32 %v2763_v35, %v5645_v30  ;;  %v2819_v22 = vmul.f32 %v2758_v6, %v5642_v3  ;;  %v2893_v3 = vld [vmem:[%s4380_s27 + $0xd8] sm:$0xff] }
 0x532   : > { %2953 = vst [vmem:[%s5675_s13 + $0xb8] sm:$0xff] %v2921_v28  ;;  %2952 = vst [vmem:[%s5675_s13 + $0xb0] sm:$0xff] %v2920_v48  ;;  %v2859_v61 = vadd.f32 %v5669_v17, %v2820_v24  ;;  %v2858_v58 = vadd.f32 %v5669_v17, %v2819_v22 }
 0x533   : > { %v2773_v59 = vpop.permute.xlu0 %2772  ;;  %v2768_v39 = vpop.permute.xlu1 %2767 }
 0x534   : > { %v2923_v4 = vadd.f32 %v2891_v1, %v2859_v61  ;;  %v2922_v15 = vadd.f32 %v2890_v38, %v2858_v58  ;;  %v2822_v9 = vmul.f32 %v2773_v59, %v5651_v44  ;;  %v2821_v30 = vmul.f32 %v2768_v39, %v5648_v41 }
 0x536   : > { %2955 = vst [vmem:[%s5675_s13 + $0xc8] sm:$0xff] %v2923_v4  ;;  %2954 = vst [vmem:[%s5675_s13 + $0xc0] sm:$0xff] %v2922_v15  ;;  %v2861_v0 = vadd.f32 %v5669_v17, %v2822_v9  ;;  %v2860_v46 = vadd.f32 %v5669_v17, %v2821_v30 }
 0x537   : > { %v2783_v10 = vpop.permute.xlu0 %2782  ;;  %v2778_v49 = vpop.permute.xlu1 %2777 }
 0x538   : > { %v2925_v25 = vadd.f32 %v2893_v3, %v2861_v0  ;;  %v2924_v26 = vadd.f32 %v2892_v23, %v2860_v46  ;;  %v2824_v44 = vmul.f32 %v2783_v10, %v5657_v16  ;;  %v2823_v41 = vmul.f32 %v2778_v49, %v5654_v57 }
 0x53a   : > { %2957 = vst [vmem:[%s5675_s13 + $0xd8] sm:$0xff] %v2925_v25  ;;  %2956 = vst [vmem:[%s5675_s13 + $0xd0] sm:$0xff] %v2924_v26  ;;  %v2863_v8 = vadd.f32 %v5669_v17, %v2824_v44  ;;  %v2862_v19 = vadd.f32 %v5669_v17, %v2823_v41 }
 0x53b   : > { %v2793_v62 = vpop.permute.xlu0 %2792  ;;  %v2788_v33 = vpop.permute.xlu1 %2787 }
 0x53c   : > { %v2927_v16 = vadd.f32 %v2895_v47, %v2863_v8  ;;  %v2926_v52 = vadd.f32 %v2894_v63, %v2862_v19  ;;  %v2826_v57 = vmul.f32 %v2793_v62, %v2471_v60  ;;  %v2825_v34 = vmul.f32 %v2788_v33, %v5660_v18 }
 0x53e   : > { %2959 = vst [vmem:[%s5675_s13 + $0xe8] sm:$0xff] %v2927_v16  ;;  %2958 = vst [vmem:[%s5675_s13 + $0xe0] sm:$0xff] %v2926_v52  ;;  %v2865_v37 = vadd.f32 %v5669_v17, %v2826_v57  ;;  %v2864_v14 = vadd.f32 %v5669_v17, %v2825_v34 }
 0x540   : > { %v2929_v18 = vadd.f32 %v2897_v54, %v2865_v37  ;;  %v2928_v12 = vadd.f32 %v2896_v40, %v2864_v14 }
 0x542   : > { %2961 = vst [vmem:[%s5675_s13 + $0xf8] sm:$0xff] %v2929_v18  ;;  %2960 = vst [vmem:[%s5675_s13 + $0xf0] sm:$0xff] %v2928_v12 }
 0x543   : > { %4004 = shalt.err (!%p4001_p4)
}
 0x544   : > { %s4005_s29 = scalar_lea.hbm %s5806_s7, 4096  ;;  %s4009_s17 = scalar_lea.hbm %s5865_s6, 8192 }
 0x545   : > { %p4006_p3 = scmp.ne.s32.totalorder %s5806_s7, %s4005_s29  ;;  %p4010_p8 = scmp.lt.u32.totalorder %s5806_s7, %s5865_s6 }
 0x546   : > { %p4011_p12 = scmp.lt.u32.totalorder %s4009_s17, %s4005_s29  ;;  %p4013_p2 = scmp.lt.u32.totalorder %s4005_s29, %s5806_s7 }
 0x547   : > { %p4007_p6 = pnand %p4006_p3, %p6161_p13 }
 0x548   : > { %p4012_p1 = por %p4011_p12, %p4010_p8 }
 0x549   : > { %p4008_p9 = pneg %p4007_p6 }
 0x54a   : > { %p4014_p11 = por %p4013_p2, %p4012_p1 }
 0x54c   : > { %p4015_p0 = pnand %p4014_p11, %p4008_p9 }
 0x54e   : > { %4018 = shalt.err (!%p4015_p0)
}
 0x54f   : > { %s4094_s8 = smov 128   ;;  %s4095_s12 = smov 8  }
 0x550   : > { %3534 = dma.vmem_to_hbm [thread:$0]  (%p6161_p13), %s5808_s28, 4096, %s5806_s7, %s2963_s24, %s4094_s8, %s4094_s8, %s4095_s12  }
 0x551 PF: > { %s6162_s11 = sld [smem:[#allocation24_spill]]  ;;  %s6163_s30 = sld [smem:[#allocation21_spill]] }
 0x552   : > { %s2993_s18 = sand.u32 1, %s4061_s21  }
 0x553   : > { %s2994_s13 = scalar_lea.sflag [#allocation8], %s2993_s18 }
 0x557   : > { %p6164_p5 = scmp.ne.s32.totalorder %s6162_s11, 0  ;;  %p6165_p10 = scmp.ge.s32.totalorder %s6163_s30, 2 }
 0x559   : > { %p3551_p7 = pnand %p6165_p10, %p6164_p5 }
 0x55b   : > { %4056 = dma.done.wait (!%p3551_p7), %s2994_s13, 4096  }
 0x55c   : > { %4058 = vsyncadd (!%p3551_p7), %s2994_s13, 4294963200  ;;  %s26_s26 = sadd.s32 1, %s6163_s30   ;;  %s6166_s20 = sld [smem:[#allocation19_spill]] }
 0x55d   : > { %p23_p4 = scmp.ge.s32.totalorder %s26_s26, 4   ;;  %s6167_s23 = sld [smem:[#allocation23_spill]] }
 0x55e   : > { %s6168_s24 = sld [smem:[#allocation20_spill]]  ;;  %s6169_s25 = sld [smem:[#allocation22_spill]] }
 0x55f   : > { %s6170_s21 = smov %s4065_s22  ;;  %25 = sbr.rel (!%p23_p4) target bundleno = 12 (0xc), region = 127 }
 0x562   : > { %s6171_s22 = smov %s6166_s20 }
 0x566   :  { %2999 = vsyncpa [#allocation7], 1 }
 0x567   :  { %3001 = vsyncpa [#allocation7 + $0x1], 1 }
 0x568   :  { %3002 = vsyncpa [#allocation10], 1 }
 0x569   :  { %3004 = vsyncpa [#allocation10 + $0x1], 1 }
 0x56a   :  { %3005 = vsyncpa [#allocation13], 1 }
 0x56b   :  { %3006 = vsyncpa [#allocation8], 1 }
 0x56c   :  { %3008 = vsyncpa [#allocation8 + $0x1], 1 }

</bundles_post_ra>
